<compile_context>
chip_gen: v5e
topology: v5e:2x2
jax: 0.10.0
libtpu: 0.0.40
codegen_flags: <defaults>
</compile_context>

<pallas_src>
import functools

import jax
import jax.numpy as jnp
from jax.experimental import pallas as pl
from jax.experimental.pallas import tpu as pltpu

BN_EPS = 1e-5
LANE = 128
VMEM_LIMIT = 32 * 1024 * 1024  # safe scoped limit on v5e/v6e/v7x; tiles stay far below
ROW_CHUNK_TARGET = 256         # bounds the live f32 accumulator to <= 128 KB per chunk


def _round_up(x, m):
    return (x + m - 1) // m * m


def _pick_chunk(hw, target=ROW_CHUNK_TARGET):
    """Largest divisor of hw that is <= target (trace-time only)."""
    c = min(hw, target)
    while hw % c:
        c -= 1
    return c


# ---------------------------------------------------------------------------
# Pass 1: 3x3 conv as 3 fused-K (= 3*Cin) MXU matmuls over the vertical taps, plus
# per-image per-channel [sum, sum_sq] partials for the two-pass BatchNorm.
# One grid step == one image; output rows computed in bounded chunks.
# ---------------------------------------------------------------------------
def conv_stats_kernel(x_ref, w_ref, o_ref, stats_ref, *, img_w, chunk):
    # x_ref:     (1, (H+2)*W, 3*Cin) bf16  horizontally im2col'ed, H-haloed image
    # w_ref:     (3, 3*Cin, Cp)      bf16  taps stacked over ky, Cout zero-padded to Cp
    # o_ref:     (1, H*W, Cp)        f32   pre-BN conv output
    # stats_ref: (1, 2, Cp)          f32   per-image [sum, sum_of_squares]
    hw = o_ref.shape[1]
    cp = o_ref.shape[2]
    nchunks = hw // chunk

    def compute_chunk(base):
        acc = jnp.zeros((chunk, cp), jnp.float32)
        for ky in range(3):  # static unroll: vertical taps are row-offset halo slices
            xs = x_ref[0, pl.ds(base + ky * img_w, chunk), :]
            acc += jnp.dot(xs, w_ref[ky], preferred_element_type=jnp.float32)
        return acc

    if nchunks == 1:
        acc = compute_chunk(0)
        o_ref[0] = acc
        stats_ref[0, 0:1, :] = jnp.sum(acc, axis=0, keepdims=True)
        stats_ref[0, 1:2, :] = jnp.sum(acc * acc, axis=0, keepdims=True)
    else:
        def body(c, carry):
            s, ss = carry
            base = pl.multiple_of(c * chunk, chunk)
            acc = compute_chunk(base)
            o_ref[0, pl.ds(base, chunk), :] = acc
            return (s + jnp.sum(acc, axis=0, keepdims=True),
                    ss + jnp.sum(acc * acc, axis=0, keepdims=True))

        init = (jnp.zeros((1, cp), jnp.float32), jnp.zeros((1, cp), jnp.float32))
        s, ss = jax.lax.fori_loop(0, nchunks, body, init)
        stats_ref[0, 0:1, :] = s
        stats_ref[0, 1:2, :] = ss


# ---------------------------------------------------------------------------
# Pass 2: combine BN partials, normalize (f32), ReLU, fused 2x2 MaxPool.
# Input viewed as (N*Ho, 2, Wo, 2*Cp): H-pair max over a major dim, W-pair max over
# 128-aligned lane halves.  One grid step == one image.
# ---------------------------------------------------------------------------
def bn_relu_pool_kernel(x_ref, stats_ref, gamma_ref, beta_ref, o_ref, *, count):
    cp = o_ref.shape[-1]
    s = jnp.sum(stats_ref[...], axis=0)                     # (2, Cp) totals over images
    inv_n = 1.0 / count
    mean = s[0:1, :] * inv_n                                # (1, Cp)
    var = jnp.maximum(s[1:2, :] * inv_n - mean * mean, 0.0)
    scale = gamma_ref[...] * jax.lax.rsqrt(var + BN_EPS)    # (1, Cp)
    shift = beta_ref[...] - mean * scale
    scale2 = jnp.concatenate([scale, scale], axis=-1)       # broadcast over the W-pair
    shift2 = jnp.concatenate([shift, shift], axis=-1)
    y = jnp.maximum(x_ref[...] * scale2 + shift2, 0.0)      # (Ho, 2, Wo, 2*Cp)
    yh = jnp.maximum(y[:, 0], y[:, 1])                      # max over the H-pair
    o_ref[...] = jnp.maximum(yh[:, :, :cp], yh[:, :, cp:]).astype(o_ref.dtype)


# ---------------------------------------------------------------------------
# Kernel 3: linear embedding (stand-in for the GCN input projection)
# ---------------------------------------------------------------------------
def linear_kernel(x_ref, w_ref, b_ref, o_ref):
    o_ref[...] = (jnp.dot(x_ref[...], w_ref[...],
                          preferred_element_type=jnp.float32) + b_ref[...])


# ---------------------------------------------------------------------------
# conv_block wrapper (layout glue in JAX, compute in Pallas)
# ---------------------------------------------------------------------------
def conv_block_forward(x_nhwc, w3, gamma, beta, cout, out_dtype):
    N, H, W, Cin = x_nhwc.shape
    Cp = w3.shape[-1]
    assert H % 2 == 0 and W % 2 == 0, "MaxPool2d(2) path assumes even spatial dims"
    Ho, Wo = H // 2, W // 2

    # Single zero-padded copy + horizontal (kx) im2col in bf16 (3x expansion, not 9x).
    xp = jnp.pad(x_nhwc, ((0, 0), (1, 1), (1, 1), (0, 0)))
    xw = jnp.concatenate([xp[:, :, kx:kx + W, :] for kx in range(3)], axis=-1)
    x_flat = xw.reshape(N, (H + 2) * W, 3 * Cin).astype(jnp.bfloat16)

    conv_out, stats = pl.pallas_call(
        functools.partial(conv_stats_kernel, img_w=W, chunk=_pick_chunk(H * W)),
        grid=(N,),
        out_shape=(jax.ShapeDtypeStruct((N, H * W, Cp), jnp.float32),
                   jax.ShapeDtypeStruct((N, 2, Cp), jnp.float32)),
        in_specs=[pl.BlockSpec((1, (H + 2) * W, 3 * Cin), lambda n: (n, 0, 0)),
                  pl.BlockSpec((3, 3 * Cin, Cp), lambda n: (0, 0, 0))],
        out_specs=(pl.BlockSpec((1, H * W, Cp), lambda n: (n, 0, 0)),
                   pl.BlockSpec((1, 2, Cp), lambda n: (n, 0, 0))),
        compiler_params=pltpu.CompilerParams(
            dimension_semantics=("parallel",), vmem_limit_bytes=VMEM_LIMIT),
    )(x_flat, w3)

    # Metadata-only reshape into pooling-window-major layout (row-major compatible).
    x2 = conv_out.reshape(N * Ho, 2, Wo, 2 * Cp)
    pooled = pl.pallas_call(
        functools.partial(bn_relu_pool_kernel, count=float(N * H * W)),
        grid=(N,),
        out_shape=jax.ShapeDtypeStruct((N * Ho, Wo, Cp), out_dtype),
        in_specs=[pl.BlockSpec((Ho, 2, Wo, 2 * Cp), lambda n: (n, 0, 0, 0)),
                  pl.BlockSpec((N, 2, Cp), lambda n: (0, 0, 0)),
                  pl.BlockSpec((1, Cp), lambda n: (0, 0)),
                  pl.BlockSpec((1, Cp), lambda n: (0, 0))],
        out_specs=pl.BlockSpec((Ho, Wo, Cp), lambda n: (n, 0, 0)),
        compiler_params=pltpu.CompilerParams(
            dimension_semantics=("parallel",), vmem_limit_bytes=VMEM_LIMIT),
    )(x2, stats, gamma, beta)

    # Drop the lane padding only at the block boundary (kernels stay lane-dense at Cp).
    return pooled.reshape(N, Ho, Wo, Cp)[..., :cout]


# ---------------------------------------------------------------------------
# Parameters (deterministic, synthetic init — shapes follow the module __init__)
# ---------------------------------------------------------------------------
def init_params(key, x_dim, hid_dim, z_dim, gcn_in, gcn_out):
    params = {"blocks": []}
    dims = [(x_dim, hid_dim), (hid_dim, hid_dim), (hid_dim, hid_dim), (hid_dim, z_dim)]
    for cin, cout in dims:
        key, k1, k2 = jax.random.split(key, 3)
        bound = 1.0 / jnp.sqrt(cin * 9.0)
        w = jax.random.uniform(k1, (3, 3, cin, cout), jnp.float32, -bound, bound)
        # Conv bias intentionally omitted: BN's batch-mean subtraction cancels it exactly.
        gamma = jax.random.uniform(k2, (cout,), jnp.float32, 0.0, 1.0)  # nn.init.uniform_
        beta = jnp.zeros((cout,), jnp.float32)                           # BN bias default
        cp = _round_up(cout, LANE)
        w3 = jnp.pad(w.reshape(3, 3 * cin, cout),
                     ((0, 0), (0, 0), (0, cp - cout))).astype(jnp.bfloat16)
        params["blocks"].append(dict(
            w3=w3,
            gamma=jnp.pad(gamma, (0, cp - cout)).reshape(1, cp),
            beta=jnp.pad(beta, (0, cp - cout)).reshape(1, cp)))
    key, k1, k2 = jax.random.split(key, 3)
    bound = 1.0 / jnp.sqrt(float(gcn_in))
    params["gcn_w"] = jax.random.uniform(k1, (gcn_in, gcn_out), jnp.float32, -bound, bound)
    params["gcn_b"] = jax.random.uniform(k2, (1, gcn_out), jnp.float32, -bound, bound)
    return params


# ---------------------------------------------------------------------------
# GConvnet.forward
# ---------------------------------------------------------------------------
@functools.partial(jax.jit, static_argnames=("couts",))
def gconvnet_forward(params, x_nchw, couts):
    x = jnp.transpose(x_nchw, (0, 2, 3, 1)).astype(jnp.float32)  # NCHW -> NHWC
    n_blocks = len(couts)
    for i, (blk, cout) in enumerate(zip(params["blocks"], couts)):
        # Inter-block activations in bf16 (next block casts to bf16 for the MXU anyway);
        # keep the final block f32 for the f32 linear head.
        out_dtype = jnp.float32 if i == n_blocks - 1 else jnp.bfloat16
        x = conv_block_forward(x, blk["w3"], blk["gamma"], blk["beta"], cout, out_dtype)
    # PyTorch x.view(N, -1) flattens NCHW -> (N, C*H*W); match that order.
    N = x.shape[0]
    feat = jnp.transpose(x, (0, 3, 1, 2)).reshape(N, -1)
    # TODO(synk): GcnNet is not defined in the reference source; stand in with its input
    # linear embedding (input_dim -> output_dim=256) as a Pallas matmul kernel.
    vmem = pl.BlockSpec(memory_space=pltpu.MemorySpace.VMEM)
    out = pl.pallas_call(
        linear_kernel,
        out_shape=jax.ShapeDtypeStruct((N, params["gcn_w"].shape[1]), jnp.float32),
        in_specs=[vmem, vmem, vmem],
        out_specs=vmem,
        compiler_params=pltpu.CompilerParams(vmem_limit_bytes=VMEM_LIMIT),
    )(feat, params["gcn_w"], params["gcn_b"])
    return out


if __name__ == "__main__":
    key = jax.random.PRNGKey(0)
    k_x, k_p = jax.random.split(key)

    # Small shapes consistent with the module: x_dim=3 input channels, 4 conv blocks each
    # halving the spatial dims (16x16 -> 1x1), so the flatten dim is z_dim*1*1 (the
    # small-shape analog of the hard-coded 1600 = 64*5*5 for 80x80 inputs).
    N, x_dim, H, W = 2, 3, 16, 16
    hid_dim = z_dim = 32
    gcn_out = 256  # GcnNet output_dim from the module __init__

    x = jax.random.normal(k_x, (N, x_dim, H, W), jnp.float32)
    flat_dim = z_dim * (H // 16) * (W // 16)
    params = init_params(k_p, x_dim, hid_dim, z_dim, flat_dim, gcn_out)

    couts = (hid_dim, hid_dim, hid_dim, z_dim)
    out = gconvnet_forward(params, x, couts=couts)
    jax.block_until_ready(out)
    assert out.shape == (N, gcn_out) and out.dtype == jnp.float32
    print("KERNEL_OK")
</pallas_src>

<mosaic_0001>
module attributes {stable_mosaic.version = 11 : i64} {
  func.func @bn_relu_pool_kernel(%arg0: i32, %arg1: memref<8x2x8x256xf32, #tpu.memory_space<vmem>>, %arg2: memref<2x2x128xf32, #tpu.memory_space<vmem>>, %arg3: memref<1x128xf32, #tpu.memory_space<vmem>>, %arg4: memref<1x128xf32, #tpu.memory_space<vmem>>, %arg5: memref<8x8x128xbf16, #tpu.memory_space<vmem>>) attributes {dimension_semantics = [#tpu.dimension_semantics<parallel>], iteration_bounds = array<i64: 2>, scalar_prefetch = 0 : i64, scratch_operands = 0 : i64, tpu.core_type = #tpu.core_type<tc>, window_params = [{transform_indices = @transform_0, window_bounds = array<i64: 8, 2, 8, 256>}, {pipeline_mode = #tpu.pipeline_mode<synchronous>, transform_indices = @transform_1, window_bounds = array<i64: 2, 2, 128>}, {pipeline_mode = #tpu.pipeline_mode<synchronous>, transform_indices = @transform_2, window_bounds = array<i64: 1, 128>}, {pipeline_mode = #tpu.pipeline_mode<synchronous>, transform_indices = @transform_3, window_bounds = array<i64: 1, 128>}, {transform_indices = @transform_4, window_bounds = array<i64: 8, 8, 128>}]} {
    %c0 = arith.constant 0 : index
    %c0_0 = arith.constant 0 : index
    %c0_1 = arith.constant 0 : index
    %0 = vector.load %arg2[%c0, %c0_0, %c0_1] : memref<2x2x128xf32, #tpu.memory_space<vmem>>, vector<2x2x128xf32>
    %cst = arith.constant dense<0.000000e+00> : vector<2x128xf32>
    %1 = vector.multi_reduction <add>, %0, %cst [0] : vector<2x2x128xf32> to vector<2x128xf32>
    %2 = vector.extract_strided_slice %1 {offsets = [0, 0], sizes = [1, 128], strides = [1, 1]} : vector<2x128xf32> to vector<1x128xf32>
    %cst_2 = arith.constant 0.001953125 : f32
    %3 = vector.broadcast %cst_2 : f32 to vector<1x128xf32>
    %4 = arith.mulf %2, %3 : vector<1x128xf32>
    %5 = vector.extract_strided_slice %1 {offsets = [1, 0], sizes = [1, 128], strides = [1, 1]} : vector<2x128xf32> to vector<1x128xf32>
    %cst_3 = arith.constant 0.001953125 : f32
    %6 = vector.broadcast %cst_3 : f32 to vector<1x128xf32>
    %7 = arith.mulf %5, %6 : vector<1x128xf32>
    %8 = arith.mulf %4, %4 : vector<1x128xf32>
    %9 = arith.subf %7, %8 : vector<1x128xf32>
    %cst_4 = arith.constant 0.000000e+00 : f32
    %10 = vector.broadcast %cst_4 : f32 to vector<1x128xf32>
    %11 = arith.maximumf %9, %10 : vector<1x128xf32>
    %c0_5 = arith.constant 0 : index
    %c0_6 = arith.constant 0 : index
    %12 = vector.load %arg3[%c0_5, %c0_6] : memref<1x128xf32, #tpu.memory_space<vmem>>, vector<1x128xf32>
    %cst_7 = arith.constant 9.99999974E-6 : f32
    %13 = vector.broadcast %cst_7 : f32 to vector<1x128xf32>
    %14 = arith.addf %11, %13 : vector<1x128xf32>
    %15 = math.rsqrt %14 : vector<1x128xf32>
    %16 = arith.mulf %12, %15 : vector<1x128xf32>
    %c0_8 = arith.constant 0 : index
    %c0_9 = arith.constant 0 : index
    %17 = vector.load %arg4[%c0_8, %c0_9] : memref<1x128xf32, #tpu.memory_space<vmem>>, vector<1x128xf32>
    %18 = arith.mulf %4, %16 : vector<1x128xf32>
    %19 = arith.subf %17, %18 : vector<1x128xf32>
    %20 = tpu.concatenate %16, %16 in 1 : vector<1x128xf32>, vector<1x128xf32> -> vector<1x256xf32>
    %21 = tpu.concatenate %19, %19 in 1 : vector<1x128xf32>, vector<1x128xf32> -> vector<1x256xf32>
    %c0_10 = arith.constant 0 : index
    %c0_11 = arith.constant 0 : index
    %c0_12 = arith.constant 0 : index
    %c0_13 = arith.constant 0 : index
    %22 = vector.load %arg1[%c0_10, %c0_11, %c0_12, %c0_13] : memref<8x2x8x256xf32, #tpu.memory_space<vmem>>, vector<8x2x8x256xf32>
    %23 = vector.shape_cast %20 : vector<1x256xf32> to vector<1x1x1x256xf32>
    %24 = vector.broadcast %23 : vector<1x1x1x256xf32> to vector<8x2x8x256xf32>
    %25 = arith.mulf %22, %24 : vector<8x2x8x256xf32>
    %26 = vector.shape_cast %21 : vector<1x256xf32> to vector<1x1x1x256xf32>
    %27 = vector.broadcast %26 : vector<1x1x1x256xf32> to vector<8x2x8x256xf32>
    %28 = arith.addf %25, %27 : vector<8x2x8x256xf32>
    %cst_14 = arith.constant 0.000000e+00 : f32
    %29 = vector.broadcast %cst_14 : f32 to vector<8x2x8x256xf32>
    %30 = arith.maximumf %28, %29 : vector<8x2x8x256xf32>
    %31 = vector.extract_strided_slice %30 {offsets = [0, 0, 0, 0], sizes = [8, 1, 8, 256], strides = [1, 1, 1, 1]} : vector<8x2x8x256xf32> to vector<8x1x8x256xf32>
    %32 = vector.shape_cast %31 : vector<8x1x8x256xf32> to vector<8x8x256xf32>
    %33 = vector.extract_strided_slice %30 {offsets = [0, 1, 0, 0], sizes = [8, 1, 8, 256], strides = [1, 1, 1, 1]} : vector<8x2x8x256xf32> to vector<8x1x8x256xf32>
    %34 = vector.shape_cast %33 : vector<8x1x8x256xf32> to vector<8x8x256xf32>
    %35 = arith.maximumf %32, %34 : vector<8x8x256xf32>
    %36 = vector.extract_strided_slice %35 {offsets = [0, 0, 0], sizes = [8, 8, 128], strides = [1, 1, 1]} : vector<8x8x256xf32> to vector<8x8x128xf32>
    %37 = vector.extract_strided_slice %35 {offsets = [0, 0, 128], sizes = [8, 8, 128], strides = [1, 1, 1]} : vector<8x8x256xf32> to vector<8x8x128xf32>
    %38 = arith.maximumf %36, %37 : vector<8x8x128xf32>
    %39 = arith.truncf %38 : vector<8x8x128xf32> to vector<8x8x128xbf16>
    %c0_15 = arith.constant 0 : index
    %c0_16 = arith.constant 0 : index
    %c0_17 = arith.constant 0 : index
    %40 = vector.load %arg5[%c0_15, %c0_16, %c0_17] : memref<8x8x128xbf16, #tpu.memory_space<vmem>>, vector<8x8x128xbf16>
    tpu.vector_store %arg5[%c0_15, %c0_16, %c0_17], %39 {strides = array<i32>} : memref<8x8x128xbf16, #tpu.memory_space<vmem>>, vector<8x8x128xbf16>,
    return
  }
  func.func @transform_0(%arg0: i32) -> (i32, i32, i32, i32) {
    %c0_i32 = arith.constant 0 : i32
    %c0_i32_0 = arith.constant 0 : i32
    %c0_i32_1 = arith.constant 0 : i32
    %c0_i32_2 = arith.constant 0 : i32
    return %arg0, %c0_i32, %c0_i32_0, %c0_i32_1 : i32, i32, i32, i32
  }
  func.func @transform_1(%arg0: i32) -> (i32, i32, i32) {
    %c0_i32 = arith.constant 0 : i32
    %c0_i32_0 = arith.constant 0 : i32
    %c0_i32_1 = arith.constant 0 : i32
    %c0_i32_2 = arith.constant 0 : i32
    return %c0_i32, %c0_i32_0, %c0_i32_1 : i32, i32, i32
  }
  func.func @transform_2(%arg0: i32) -> (i32, i32) {
    %c0_i32 = arith.constant 0 : i32
    %c0_i32_0 = arith.constant 0 : i32
    %c0_i32_1 = arith.constant 0 : i32
    return %c0_i32, %c0_i32_0 : i32, i32
  }
  func.func @transform_3(%arg0: i32) -> (i32, i32) {
    %c0_i32 = arith.constant 0 : i32
    %c0_i32_0 = arith.constant 0 : i32
    %c0_i32_1 = arith.constant 0 : i32
    return %c0_i32, %c0_i32_0 : i32, i32
  }
  func.func @transform_4(%arg0: i32) -> (i32, i32, i32) {
    %c0_i32 = arith.constant 0 : i32
    %c0_i32_0 = arith.constant 0 : i32
    %c0_i32_1 = arith.constant 0 : i32
    return %arg0, %c0_i32, %c0_i32_0 : i32, i32, i32
  }
}

module attributes {stable_mosaic.version = 11 : i64} {
  func.func @conv_stats_kernel(%arg0: i32, %arg1: memref<1x288x9xbf16, #tpu.memory_space<vmem>>, %arg2: memref<3x9x128xbf16, #tpu.memory_space<vmem>>, %arg3: memref<1x256x128xf32, #tpu.memory_space<vmem>>, %arg4: memref<1x2x128xf32, #tpu.memory_space<vmem>>) attributes {dimension_semantics = [#tpu.dimension_semantics<parallel>], iteration_bounds = array<i64: 2>, scalar_prefetch = 0 : i64, scratch_operands = 0 : i64, tpu.core_type = #tpu.core_type<tc>, window_params = [{transform_indices = @transform_0, window_bounds = array<i64: 1, 288, 9>}, {pipeline_mode = #tpu.pipeline_mode<synchronous>, transform_indices = @transform_1, window_bounds = array<i64: 3, 9, 128>}, {transform_indices = @transform_2, window_bounds = array<i64: 1, 256, 128>}, {transform_indices = @transform_3, window_bounds = array<i64: 1, 2, 128>}]} {
    %cst = arith.constant 0.000000e+00 : f32
    %0 = vector.broadcast %cst : f32 to vector<256x128xf32>
    %c0 = arith.constant 0 : index
    %c0_0 = arith.constant 0 : index
    %c0_1 = arith.constant 0 : index
    %1 = vector.load %arg1[%c0, %c0_0, %c0_1] : memref<1x288x9xbf16, #tpu.memory_space<vmem>>, vector<1x256x9xbf16>
    %2 = vector.shape_cast %1 : vector<1x256x9xbf16> to vector<256x9xbf16>
    %c0_2 = arith.constant 0 : index
    %c0_3 = arith.constant 0 : index
    %c0_4 = arith.constant 0 : index
    %3 = vector.load %arg2[%c0_2, %c0_3, %c0_4] : memref<3x9x128xbf16, #tpu.memory_space<vmem>>, vector<1x9x128xbf16>
    %4 = vector.shape_cast %3 : vector<1x9x128xbf16> to vector<9x128xbf16>
    %cst_5 = arith.constant dense<0.000000e+00> : vector<256x128xf32>
    %5 = tpu.matmul %2, %4, %cst_5 {dimension_numbers = #tpu.dot_dimension_numbers<[1], [0], [0], [1], [0, 0, 1, 1], [], []>} : vector<256x9xbf16>, vector<9x128xbf16>, vector<256x128xf32> -> vector<256x128xf32>
    %6 = arith.addf %0, %5 : vector<256x128xf32>
    %c0_6 = arith.constant 0 : index
    %c16 = arith.constant 16 : index
    %c0_7 = arith.constant 0 : index
    %7 = vector.load %arg1[%c0_6, %c16, %c0_7] : memref<1x288x9xbf16, #tpu.memory_space<vmem>>, vector<1x256x9xbf16>
    %8 = vector.shape_cast %7 : vector<1x256x9xbf16> to vector<256x9xbf16>
    %c1 = arith.constant 1 : index
    %c0_8 = arith.constant 0 : index
    %c0_9 = arith.constant 0 : index
    %9 = vector.load %arg2[%c1, %c0_8, %c0_9] : memref<3x9x128xbf16, #tpu.memory_space<vmem>>, vector<1x9x128xbf16>
    %10 = vector.shape_cast %9 : vector<1x9x128xbf16> to vector<9x128xbf16>
    %cst_10 = arith.constant dense<0.000000e+00> : vector<256x128xf32>
    %11 = tpu.matmul %8, %10, %cst_10 {dimension_numbers = #tpu.dot_dimension_numbers<[1], [0], [0], [1], [0, 0, 1, 1], [], []>} : vector<256x9xbf16>, vector<9x128xbf16>, vector<256x128xf32> -> vector<256x128xf32>
    %12 = arith.addf %6, %11 : vector<256x128xf32>
    %c0_11 = arith.constant 0 : index
    %c32 = arith.constant 32 : index
    %c0_12 = arith.constant 0 : index
    %13 = vector.load %arg1[%c0_11, %c32, %c0_12] : memref<1x288x9xbf16, #tpu.memory_space<vmem>>, vector<1x256x9xbf16>
    %14 = vector.shape_cast %13 : vector<1x256x9xbf16> to vector<256x9xbf16>
    %c2 = arith.constant 2 : index
    %c0_13 = arith.constant 0 : index
    %c0_14 = arith.constant 0 : index
    %15 = vector.load %arg2[%c2, %c0_13, %c0_14] : memref<3x9x128xbf16, #tpu.memory_space<vmem>>, vector<1x9x128xbf16>
    %16 = vector.shape_cast %15 : vector<1x9x128xbf16> to vector<9x128xbf16>
    %cst_15 = arith.constant dense<0.000000e+00> : vector<256x128xf32>
    %17 = tpu.matmul %14, %16, %cst_15 {dimension_numbers = #tpu.dot_dimension_numbers<[1], [0], [0], [1], [0, 0, 1, 1], [], []>} : vector<256x9xbf16>, vector<9x128xbf16>, vector<256x128xf32> -> vector<256x128xf32>
    %18 = arith.addf %12, %17 : vector<256x128xf32>
    %c0_16 = arith.constant 0 : index
    %c0_17 = arith.constant 0 : index
    %c0_18 = arith.constant 0 : index
    %19 = vector.load %arg3[%c0_16, %c0_17, %c0_18] : memref<1x256x128xf32, #tpu.memory_space<vmem>>, vector<1x256x128xf32>
    %20 = vector.shape_cast %19 : vector<1x256x128xf32> to vector<256x128xf32>
    %21 = vector.shape_cast %18 : vector<256x128xf32> to vector<1x256x128xf32>
    tpu.vector_store %arg3[%c0_16, %c0_17, %c0_18], %21 {strides = array<i32>} : memref<1x256x128xf32, #tpu.memory_space<vmem>>, vector<1x256x128xf32>,
    %cst_19 = arith.constant dense<0.000000e+00> : vector<128xf32>
    %22 = vector.multi_reduction <add>, %18, %cst_19 [0] : vector<256x128xf32> to vector<128xf32>
    %23 = vector.shape_cast %22 : vector<128xf32> to vector<1x128xf32>
    %c0_20 = arith.constant 0 : index
    %c0_21 = arith.constant 0 : index
    %c0_22 = arith.constant 0 : index
    %24 = vector.load %arg4[%c0_20, %c0_21, %c0_22] : memref<1x2x128xf32, #tpu.memory_space<vmem>>, vector<1x1x128xf32>
    %25 = vector.shape_cast %24 : vector<1x1x128xf32> to vector<1x128xf32>
    %26 = vector.shape_cast %23 : vector<1x128xf32> to vector<1x1x128xf32>
    tpu.vector_store %arg4[%c0_20, %c0_21, %c0_22], %26 {strides = array<i32>} : memref<1x2x128xf32, #tpu.memory_space<vmem>>, vector<1x1x128xf32>,
    %27 = arith.mulf %18, %18 : vector<256x128xf32>
    %cst_23 = arith.constant dense<0.000000e+00> : vector<128xf32>
    %28 = vector.multi_reduction <add>, %27, %cst_23 [0] : vector<256x128xf32> to vector<128xf32>
    %29 = vector.shape_cast %28 : vector<128xf32> to vector<1x128xf32>
    %c0_24 = arith.constant 0 : index
    %c1_25 = arith.constant 1 : index
    %c0_26 = arith.constant 0 : index
    %30 = vector.load %arg4[%c0_24, %c1_25, %c0_26] : memref<1x2x128xf32, #tpu.memory_space<vmem>>, vector<1x1x128xf32>
    %31 = vector.shape_cast %30 : vector<1x1x128xf32> to vector<1x128xf32>
    %32 = vector.shape_cast %29 : vector<1x128xf32> to vector<1x1x128xf32>
    tpu.vector_store %arg4[%c0_24, %c1_25, %c0_26], %32 {strides = array<i32>} : memref<1x2x128xf32, #tpu.memory_space<vmem>>, vector<1x1x128xf32>,
    return
  }
  func.func @transform_0(%arg0: i32) -> (i32, i32, i32) {
    %c0_i32 = arith.constant 0 : i32
    %c0_i32_0 = arith.constant 0 : i32
    %c0_i32_1 = arith.constant 0 : i32
    return %arg0, %c0_i32, %c0_i32_0 : i32, i32, i32
  }
  func.func @transform_1(%arg0: i32) -> (i32, i32, i32) {
    %c0_i32 = arith.constant 0 : i32
    %c0_i32_0 = arith.constant 0 : i32
    %c0_i32_1 = arith.constant 0 : i32
    %c0_i32_2 = arith.constant 0 : i32
    return %c0_i32, %c0_i32_0, %c0_i32_1 : i32, i32, i32
  }
  func.func @transform_2(%arg0: i32) -> (i32, i32, i32) {
    %c0_i32 = arith.constant 0 : i32
    %c0_i32_0 = arith.constant 0 : i32
    %c0_i32_1 = arith.constant 0 : i32
    return %arg0, %c0_i32, %c0_i32_0 : i32, i32, i32
  }
  func.func @transform_3(%arg0: i32) -> (i32, i32, i32) {
    %c0_i32 = arith.constant 0 : i32
    %c0_i32_0 = arith.constant 0 : i32
    %c0_i32_1 = arith.constant 0 : i32
    return %arg0, %c0_i32, %c0_i32_0 : i32, i32, i32
  }
}

module attributes {stable_mosaic.version = 11 : i64} {
  func.func @conv_stats_kernel(%arg0: i32, %arg1: memref<1x80x96xbf16, #tpu.memory_space<vmem>>, %arg2: memref<3x96x128xbf16, #tpu.memory_space<vmem>>, %arg3: memref<1x64x128xf32, #tpu.memory_space<vmem>>, %arg4: memref<1x2x128xf32, #tpu.memory_space<vmem>>) attributes {dimension_semantics = [#tpu.dimension_semantics<parallel>], iteration_bounds = array<i64: 2>, scalar_prefetch = 0 : i64, scratch_operands = 0 : i64, tpu.core_type = #tpu.core_type<tc>, window_params = [{transform_indices = @transform_0, window_bounds = array<i64: 1, 80, 96>}, {pipeline_mode = #tpu.pipeline_mode<synchronous>, transform_indices = @transform_1, window_bounds = array<i64: 3, 96, 128>}, {transform_indices = @transform_2, window_bounds = array<i64: 1, 64, 128>}, {transform_indices = @transform_3, window_bounds = array<i64: 1, 2, 128>}]} {
    %cst = arith.constant 0.000000e+00 : f32
    %0 = vector.broadcast %cst : f32 to vector<64x128xf32>
    %c0 = arith.constant 0 : index
    %c0_0 = arith.constant 0 : index
    %c0_1 = arith.constant 0 : index
    %1 = vector.load %arg1[%c0, %c0_0, %c0_1] : memref<1x80x96xbf16, #tpu.memory_space<vmem>>, vector<1x64x96xbf16>
    %2 = vector.shape_cast %1 : vector<1x64x96xbf16> to vector<64x96xbf16>
    %c0_2 = arith.constant 0 : index
    %c0_3 = arith.constant 0 : index
    %c0_4 = arith.constant 0 : index
    %3 = vector.load %arg2[%c0_2, %c0_3, %c0_4] : memref<3x96x128xbf16, #tpu.memory_space<vmem>>, vector<1x96x128xbf16>
    %4 = vector.shape_cast %3 : vector<1x96x128xbf16> to vector<96x128xbf16>
    %cst_5 = arith.constant dense<0.000000e+00> : vector<64x128xf32>
    %5 = tpu.matmul %2, %4, %cst_5 {dimension_numbers = #tpu.dot_dimension_numbers<[1], [0], [0], [1], [0, 0, 1, 1], [], []>} : vector<64x96xbf16>, vector<96x128xbf16>, vector<64x128xf32> -> vector<64x128xf32>
    %6 = arith.addf %0, %5 : vector<64x128xf32>
    %c0_6 = arith.constant 0 : index
    %c8 = arith.constant 8 : index
    %c0_7 = arith.constant 0 : index
    %7 = vector.load %arg1[%c0_6, %c8, %c0_7] : memref<1x80x96xbf16, #tpu.memory_space<vmem>>, vector<1x64x96xbf16>
    %8 = vector.shape_cast %7 : vector<1x64x96xbf16> to vector<64x96xbf16>
    %c1 = arith.constant 1 : index
    %c0_8 = arith.constant 0 : index
    %c0_9 = arith.constant 0 : index
    %9 = vector.load %arg2[%c1, %c0_8, %c0_9] : memref<3x96x128xbf16, #tpu.memory_space<vmem>>, vector<1x96x128xbf16>
    %10 = vector.shape_cast %9 : vector<1x96x128xbf16> to vector<96x128xbf16>
    %cst_10 = arith.constant dense<0.000000e+00> : vector<64x128xf32>
    %11 = tpu.matmul %8, %10, %cst_10 {dimension_numbers = #tpu.dot_dimension_numbers<[1], [0], [0], [1], [0, 0, 1, 1], [], []>} : vector<64x96xbf16>, vector<96x128xbf16>, vector<64x128xf32> -> vector<64x128xf32>
    %12 = arith.addf %6, %11 : vector<64x128xf32>
    %c0_11 = arith.constant 0 : index
    %c16 = arith.constant 16 : index
    %c0_12 = arith.constant 0 : index
    %13 = vector.load %arg1[%c0_11, %c16, %c0_12] : memref<1x80x96xbf16, #tpu.memory_space<vmem>>, vector<1x64x96xbf16>
    %14 = vector.shape_cast %13 : vector<1x64x96xbf16> to vector<64x96xbf16>
    %c2 = arith.constant 2 : index
    %c0_13 = arith.constant 0 : index
    %c0_14 = arith.constant 0 : index
    %15 = vector.load %arg2[%c2, %c0_13, %c0_14] : memref<3x96x128xbf16, #tpu.memory_space<vmem>>, vector<1x96x128xbf16>
    %16 = vector.shape_cast %15 : vector<1x96x128xbf16> to vector<96x128xbf16>
    %cst_15 = arith.constant dense<0.000000e+00> : vector<64x128xf32>
    %17 = tpu.matmul %14, %16, %cst_15 {dimension_numbers = #tpu.dot_dimension_numbers<[1], [0], [0], [1], [0, 0, 1, 1], [], []>} : vector<64x96xbf16>, vector<96x128xbf16>, vector<64x128xf32> -> vector<64x128xf32>
    %18 = arith.addf %12, %17 : vector<64x128xf32>
    %c0_16 = arith.constant 0 : index
    %c0_17 = arith.constant 0 : index
    %c0_18 = arith.constant 0 : index
    %19 = vector.load %arg3[%c0_16, %c0_17, %c0_18] : memref<1x64x128xf32, #tpu.memory_space<vmem>>, vector<1x64x128xf32>
    %20 = vector.shape_cast %19 : vector<1x64x128xf32> to vector<64x128xf32>
    %21 = vector.shape_cast %18 : vector<64x128xf32> to vector<1x64x128xf32>
    tpu.vector_store %arg3[%c0_16, %c0_17, %c0_18], %21 {strides = array<i32>} : memref<1x64x128xf32, #tpu.memory_space<vmem>>, vector<1x64x128xf32>,
    %cst_19 = arith.constant dense<0.000000e+00> : vector<128xf32>
    %22 = vector.multi_reduction <add>, %18, %cst_19 [0] : vector<64x128xf32> to vector<128xf32>
    %23 = vector.shape_cast %22 : vector<128xf32> to vector<1x128xf32>
    %c0_20 = arith.constant 0 : index
    %c0_21 = arith.constant 0 : index
    %c0_22 = arith.constant 0 : index
    %24 = vector.load %arg4[%c0_20, %c0_21, %c0_22] : memref<1x2x128xf32, #tpu.memory_space<vmem>>, vector<1x1x128xf32>
    %25 = vector.shape_cast %24 : vector<1x1x128xf32> to vector<1x128xf32>
    %26 = vector.shape_cast %23 : vector<1x128xf32> to vector<1x1x128xf32>
    tpu.vector_store %arg4[%c0_20, %c0_21, %c0_22], %26 {strides = array<i32>} : memref<1x2x128xf32, #tpu.memory_space<vmem>>, vector<1x1x128xf32>,
    %27 = arith.mulf %18, %18 : vector<64x128xf32>
    %cst_23 = arith.constant dense<0.000000e+00> : vector<128xf32>
    %28 = vector.multi_reduction <add>, %27, %cst_23 [0] : vector<64x128xf32> to vector<128xf32>
    %29 = vector.shape_cast %28 : vector<128xf32> to vector<1x128xf32>
    %c0_24 = arith.constant 0 : index
    %c1_25 = arith.constant 1 : index
    %c0_26 = arith.constant 0 : index
    %30 = vector.load %arg4[%c0_24, %c1_25, %c0_26] : memref<1x2x128xf32, #tpu.memory_space<vmem>>, vector<1x1x128xf32>
    %31 = vector.shape_cast %30 : vector<1x1x128xf32> to vector<1x128xf32>
    %32 = vector.shape_cast %29 : vector<1x128xf32> to vector<1x1x128xf32>
    tpu.vector_store %arg4[%c0_24, %c1_25, %c0_26], %32 {strides = array<i32>} : memref<1x2x128xf32, #tpu.memory_space<vmem>>, vector<1x1x128xf32>,
    return
  }
  func.func @transform_0(%arg0: i32) -> (i32, i32, i32) {
    %c0_i32 = arith.constant 0 : i32
    %c0_i32_0 = arith.constant 0 : i32
    %c0_i32_1 = arith.constant 0 : i32
    return %arg0, %c0_i32, %c0_i32_0 : i32, i32, i32
  }
  func.func @transform_1(%arg0: i32) -> (i32, i32, i32) {
    %c0_i32 = arith.constant 0 : i32
    %c0_i32_0 = arith.constant 0 : i32
    %c0_i32_1 = arith.constant 0 : i32
    %c0_i32_2 = arith.constant 0 : i32
    return %c0_i32, %c0_i32_0, %c0_i32_1 : i32, i32, i32
  }
  func.func @transform_2(%arg0: i32) -> (i32, i32, i32) {
    %c0_i32 = arith.constant 0 : i32
    %c0_i32_0 = arith.constant 0 : i32
    %c0_i32_1 = arith.constant 0 : i32
    return %arg0, %c0_i32, %c0_i32_0 : i32, i32, i32
  }
  func.func @transform_3(%arg0: i32) -> (i32, i32, i32) {
    %c0_i32 = arith.constant 0 : i32
    %c0_i32_0 = arith.constant 0 : i32
    %c0_i32_1 = arith.constant 0 : i32
    return %arg0, %c0_i32, %c0_i32_0 : i32, i32, i32
  }
}

module attributes {stable_mosaic.version = 11 : i64} {
  func.func @bn_relu_pool_kernel(%arg0: i32, %arg1: memref<4x2x4x256xf32, #tpu.memory_space<vmem>>, %arg2: memref<2x2x128xf32, #tpu.memory_space<vmem>>, %arg3: memref<1x128xf32, #tpu.memory_space<vmem>>, %arg4: memref<1x128xf32, #tpu.memory_space<vmem>>, %arg5: memref<4x4x128xbf16, #tpu.memory_space<vmem>>) attributes {dimension_semantics = [#tpu.dimension_semantics<parallel>], iteration_bounds = array<i64: 2>, scalar_prefetch = 0 : i64, scratch_operands = 0 : i64, tpu.core_type = #tpu.core_type<tc>, window_params = [{transform_indices = @transform_0, window_bounds = array<i64: 4, 2, 4, 256>}, {pipeline_mode = #tpu.pipeline_mode<synchronous>, transform_indices = @transform_1, window_bounds = array<i64: 2, 2, 128>}, {pipeline_mode = #tpu.pipeline_mode<synchronous>, transform_indices = @transform_2, window_bounds = array<i64: 1, 128>}, {pipeline_mode = #tpu.pipeline_mode<synchronous>, transform_indices = @transform_3, window_bounds = array<i64: 1, 128>}, {transform_indices = @transform_4, window_bounds = array<i64: 4, 4, 128>}]} {
    %c0 = arith.constant 0 : index
    %c0_0 = arith.constant 0 : index
    %c0_1 = arith.constant 0 : index
    %0 = vector.load %arg2[%c0, %c0_0, %c0_1] : memref<2x2x128xf32, #tpu.memory_space<vmem>>, vector<2x2x128xf32>
    %cst = arith.constant dense<0.000000e+00> : vector<2x128xf32>
    %1 = vector.multi_reduction <add>, %0, %cst [0] : vector<2x2x128xf32> to vector<2x128xf32>
    %2 = vector.extract_strided_slice %1 {offsets = [0, 0], sizes = [1, 128], strides = [1, 1]} : vector<2x128xf32> to vector<1x128xf32>
    %cst_2 = arith.constant 7.812500e-03 : f32
    %3 = vector.broadcast %cst_2 : f32 to vector<1x128xf32>
    %4 = arith.mulf %2, %3 : vector<1x128xf32>
    %5 = vector.extract_strided_slice %1 {offsets = [1, 0], sizes = [1, 128], strides = [1, 1]} : vector<2x128xf32> to vector<1x128xf32>
    %cst_3 = arith.constant 7.812500e-03 : f32
    %6 = vector.broadcast %cst_3 : f32 to vector<1x128xf32>
    %7 = arith.mulf %5, %6 : vector<1x128xf32>
    %8 = arith.mulf %4, %4 : vector<1x128xf32>
    %9 = arith.subf %7, %8 : vector<1x128xf32>
    %cst_4 = arith.constant 0.000000e+00 : f32
    %10 = vector.broadcast %cst_4 : f32 to vector<1x128xf32>
    %11 = arith.maximumf %9, %10 : vector<1x128xf32>
    %c0_5 = arith.constant 0 : index
    %c0_6 = arith.constant 0 : index
    %12 = vector.load %arg3[%c0_5, %c0_6] : memref<1x128xf32, #tpu.memory_space<vmem>>, vector<1x128xf32>
    %cst_7 = arith.constant 9.99999974E-6 : f32
    %13 = vector.broadcast %cst_7 : f32 to vector<1x128xf32>
    %14 = arith.addf %11, %13 : vector<1x128xf32>
    %15 = math.rsqrt %14 : vector<1x128xf32>
    %16 = arith.mulf %12, %15 : vector<1x128xf32>
    %c0_8 = arith.constant 0 : index
    %c0_9 = arith.constant 0 : index
    %17 = vector.load %arg4[%c0_8, %c0_9] : memref<1x128xf32, #tpu.memory_space<vmem>>, vector<1x128xf32>
    %18 = arith.mulf %4, %16 : vector<1x128xf32>
    %19 = arith.subf %17, %18 : vector<1x128xf32>
    %20 = tpu.concatenate %16, %16 in 1 : vector<1x128xf32>, vector<1x128xf32> -> vector<1x256xf32>
    %21 = tpu.concatenate %19, %19 in 1 : vector<1x128xf32>, vector<1x128xf32> -> vector<1x256xf32>
    %c0_10 = arith.constant 0 : index
    %c0_11 = arith.constant 0 : index
    %c0_12 = arith.constant 0 : index
    %c0_13 = arith.constant 0 : index
    %22 = vector.load %arg1[%c0_10, %c0_11, %c0_12, %c0_13] : memref<4x2x4x256xf32, #tpu.memory_space<vmem>>, vector<4x2x4x256xf32>
    %23 = vector.shape_cast %20 : vector<1x256xf32> to vector<1x1x1x256xf32>
    %24 = vector.broadcast %23 : vector<1x1x1x256xf32> to vector<4x2x4x256xf32>
    %25 = arith.mulf %22, %24 : vector<4x2x4x256xf32>
    %26 = vector.shape_cast %21 : vector<1x256xf32> to vector<1x1x1x256xf32>
    %27 = vector.broadcast %26 : vector<1x1x1x256xf32> to vector<4x2x4x256xf32>
    %28 = arith.addf %25, %27 : vector<4x2x4x256xf32>
    %cst_14 = arith.constant 0.000000e+00 : f32
    %29 = vector.broadcast %cst_14 : f32 to vector<4x2x4x256xf32>
    %30 = arith.maximumf %28, %29 : vector<4x2x4x256xf32>
    %31 = vector.extract_strided_slice %30 {offsets = [0, 0, 0, 0], sizes = [4, 1, 4, 256], strides = [1, 1, 1, 1]} : vector<4x2x4x256xf32> to vector<4x1x4x256xf32>
    %32 = vector.shape_cast %31 : vector<4x1x4x256xf32> to vector<4x4x256xf32>
    %33 = vector.extract_strided_slice %30 {offsets = [0, 1, 0, 0], sizes = [4, 1, 4, 256], strides = [1, 1, 1, 1]} : vector<4x2x4x256xf32> to vector<4x1x4x256xf32>
    %34 = vector.shape_cast %33 : vector<4x1x4x256xf32> to vector<4x4x256xf32>
    %35 = arith.maximumf %32, %34 : vector<4x4x256xf32>
    %36 = vector.extract_strided_slice %35 {offsets = [0, 0, 0], sizes = [4, 4, 128], strides = [1, 1, 1]} : vector<4x4x256xf32> to vector<4x4x128xf32>
    %37 = vector.extract_strided_slice %35 {offsets = [0, 0, 128], sizes = [4, 4, 128], strides = [1, 1, 1]} : vector<4x4x256xf32> to vector<4x4x128xf32>
    %38 = arith.maximumf %36, %37 : vector<4x4x128xf32>
    %39 = arith.truncf %38 : vector<4x4x128xf32> to vector<4x4x128xbf16>
    %c0_15 = arith.constant 0 : index
    %c0_16 = arith.constant 0 : index
    %c0_17 = arith.constant 0 : index
    %40 = vector.load %arg5[%c0_15, %c0_16, %c0_17] : memref<4x4x128xbf16, #tpu.memory_space<vmem>>, vector<4x4x128xbf16>
    tpu.vector_store %arg5[%c0_15, %c0_16, %c0_17], %39 {strides = array<i32>} : memref<4x4x128xbf16, #tpu.memory_space<vmem>>, vector<4x4x128xbf16>,
    return
  }
  func.func @transform_0(%arg0: i32) -> (i32, i32, i32, i32) {
    %c0_i32 = arith.constant 0 : i32
    %c0_i32_0 = arith.constant 0 : i32
    %c0_i32_1 = arith.constant 0 : i32
    %c0_i32_2 = arith.constant 0 : i32
    return %arg0, %c0_i32, %c0_i32_0, %c0_i32_1 : i32, i32, i32, i32
  }
  func.func @transform_1(%arg0: i32) -> (i32, i32, i32) {
    %c0_i32 = arith.constant 0 : i32
    %c0_i32_0 = arith.constant 0 : i32
    %c0_i32_1 = arith.constant 0 : i32
    %c0_i32_2 = arith.constant 0 : i32
    return %c0_i32, %c0_i32_0, %c0_i32_1 : i32, i32, i32
  }
  func.func @transform_2(%arg0: i32) -> (i32, i32) {
    %c0_i32 = arith.constant 0 : i32
    %c0_i32_0 = arith.constant 0 : i32
    %c0_i32_1 = arith.constant 0 : i32
    return %c0_i32, %c0_i32_0 : i32, i32
  }
  func.func @transform_3(%arg0: i32) -> (i32, i32) {
    %c0_i32 = arith.constant 0 : i32
    %c0_i32_0 = arith.constant 0 : i32
    %c0_i32_1 = arith.constant 0 : i32
    return %c0_i32, %c0_i32_0 : i32, i32
  }
  func.func @transform_4(%arg0: i32) -> (i32, i32, i32) {
    %c0_i32 = arith.constant 0 : i32
    %c0_i32_0 = arith.constant 0 : i32
    %c0_i32_1 = arith.constant 0 : i32
    return %arg0, %c0_i32, %c0_i32_0 : i32, i32, i32
  }
}

module attributes {stable_mosaic.version = 11 : i64} {
  func.func @conv_stats_kernel(%arg0: i32, %arg1: memref<1x24x96xbf16, #tpu.memory_space<vmem>>, %arg2: memref<3x96x128xbf16, #tpu.memory_space<vmem>>, %arg3: memref<1x16x128xf32, #tpu.memory_space<vmem>>, %arg4: memref<1x2x128xf32, #tpu.memory_space<vmem>>) attributes {dimension_semantics = [#tpu.dimension_semantics<parallel>], iteration_bounds = array<i64: 2>, scalar_prefetch = 0 : i64, scratch_operands = 0 : i64, tpu.core_type = #tpu.core_type<tc>, window_params = [{transform_indices = @transform_0, window_bounds = array<i64: 1, 24, 96>}, {pipeline_mode = #tpu.pipeline_mode<synchronous>, transform_indices = @transform_1, window_bounds = array<i64: 3, 96, 128>}, {transform_indices = @transform_2, window_bounds = array<i64: 1, 16, 128>}, {transform_indices = @transform_3, window_bounds = array<i64: 1, 2, 128>}]} {
    %cst = arith.constant 0.000000e+00 : f32
    %0 = vector.broadcast %cst : f32 to vector<16x128xf32>
    %c0 = arith.constant 0 : index
    %c0_0 = arith.constant 0 : index
    %c0_1 = arith.constant 0 : index
    %1 = vector.load %arg1[%c0, %c0_0, %c0_1] : memref<1x24x96xbf16, #tpu.memory_space<vmem>>, vector<1x16x96xbf16>
    %2 = vector.shape_cast %1 : vector<1x16x96xbf16> to vector<16x96xbf16>
    %c0_2 = arith.constant 0 : index
    %c0_3 = arith.constant 0 : index
    %c0_4 = arith.constant 0 : index
    %3 = vector.load %arg2[%c0_2, %c0_3, %c0_4] : memref<3x96x128xbf16, #tpu.memory_space<vmem>>, vector<1x96x128xbf16>
    %4 = vector.shape_cast %3 : vector<1x96x128xbf16> to vector<96x128xbf16>
    %cst_5 = arith.constant dense<0.000000e+00> : vector<16x128xf32>
    %5 = tpu.matmul %2, %4, %cst_5 {dimension_numbers = #tpu.dot_dimension_numbers<[1], [0], [0], [1], [0, 0, 1, 1], [], []>} : vector<16x96xbf16>, vector<96x128xbf16>, vector<16x128xf32> -> vector<16x128xf32>
    %6 = arith.addf %0, %5 : vector<16x128xf32>
    %c0_6 = arith.constant 0 : index
    %c4 = arith.constant 4 : index
    %c0_7 = arith.constant 0 : index
    %7 = vector.load %arg1[%c0_6, %c4, %c0_7] : memref<1x24x96xbf16, #tpu.memory_space<vmem>>, vector<1x16x96xbf16>
    %8 = vector.shape_cast %7 : vector<1x16x96xbf16> to vector<16x96xbf16>
    %c1 = arith.constant 1 : index
    %c0_8 = arith.constant 0 : index
    %c0_9 = arith.constant 0 : index
    %9 = vector.load %arg2[%c1, %c0_8, %c0_9] : memref<3x96x128xbf16, #tpu.memory_space<vmem>>, vector<1x96x128xbf16>
    %10 = vector.shape_cast %9 : vector<1x96x128xbf16> to vector<96x128xbf16>
    %cst_10 = arith.constant dense<0.000000e+00> : vector<16x128xf32>
    %11 = tpu.matmul %8, %10, %cst_10 {dimension_numbers = #tpu.dot_dimension_numbers<[1], [0], [0], [1], [0, 0, 1, 1], [], []>} : vector<16x96xbf16>, vector<96x128xbf16>, vector<16x128xf32> -> vector<16x128xf32>
    %12 = arith.addf %6, %11 : vector<16x128xf32>
    %c0_11 = arith.constant 0 : index
    %c8 = arith.constant 8 : index
    %c0_12 = arith.constant 0 : index
    %13 = vector.load %arg1[%c0_11, %c8, %c0_12] : memref<1x24x96xbf16, #tpu.memory_space<vmem>>, vector<1x16x96xbf16>
    %14 = vector.shape_cast %13 : vector<1x16x96xbf16> to vector<16x96xbf16>
    %c2 = arith.constant 2 : index
    %c0_13 = arith.constant 0 : index
    %c0_14 = arith.constant 0 : index
    %15 = vector.load %arg2[%c2, %c0_13, %c0_14] : memref<3x96x128xbf16, #tpu.memory_space<vmem>>, vector<1x96x128xbf16>
    %16 = vector.shape_cast %15 : vector<1x96x128xbf16> to vector<96x128xbf16>
    %cst_15 = arith.constant dense<0.000000e+00> : vector<16x128xf32>
    %17 = tpu.matmul %14, %16, %cst_15 {dimension_numbers = #tpu.dot_dimension_numbers<[1], [0], [0], [1], [0, 0, 1, 1], [], []>} : vector<16x96xbf16>, vector<96x128xbf16>, vector<16x128xf32> -> vector<16x128xf32>
    %18 = arith.addf %12, %17 : vector<16x128xf32>
    %c0_16 = arith.constant 0 : index
    %c0_17 = arith.constant 0 : index
    %c0_18 = arith.constant 0 : index
    %19 = vector.load %arg3[%c0_16, %c0_17, %c0_18] : memref<1x16x128xf32, #tpu.memory_space<vmem>>, vector<1x16x128xf32>
    %20 = vector.shape_cast %19 : vector<1x16x128xf32> to vector<16x128xf32>
    %21 = vector.shape_cast %18 : vector<16x128xf32> to vector<1x16x128xf32>
    tpu.vector_store %arg3[%c0_16, %c0_17, %c0_18], %21 {strides = array<i32>} : memref<1x16x128xf32, #tpu.memory_space<vmem>>, vector<1x16x128xf32>,
    %cst_19 = arith.constant dense<0.000000e+00> : vector<128xf32>
    %22 = vector.multi_reduction <add>, %18, %cst_19 [0] : vector<16x128xf32> to vector<128xf32>
    %23 = vector.shape_cast %22 : vector<128xf32> to vector<1x128xf32>
    %c0_20 = arith.constant 0 : index
    %c0_21 = arith.constant 0 : index
    %c0_22 = arith.constant 0 : index
    %24 = vector.load %arg4[%c0_20, %c0_21, %c0_22] : memref<1x2x128xf32, #tpu.memory_space<vmem>>, vector<1x1x128xf32>
    %25 = vector.shape_cast %24 : vector<1x1x128xf32> to vector<1x128xf32>
    %26 = vector.shape_cast %23 : vector<1x128xf32> to vector<1x1x128xf32>
    tpu.vector_store %arg4[%c0_20, %c0_21, %c0_22], %26 {strides = array<i32>} : memref<1x2x128xf32, #tpu.memory_space<vmem>>, vector<1x1x128xf32>,
    %27 = arith.mulf %18, %18 : vector<16x128xf32>
    %cst_23 = arith.constant dense<0.000000e+00> : vector<128xf32>
    %28 = vector.multi_reduction <add>, %27, %cst_23 [0] : vector<16x128xf32> to vector<128xf32>
    %29 = vector.shape_cast %28 : vector<128xf32> to vector<1x128xf32>
    %c0_24 = arith.constant 0 : index
    %c1_25 = arith.constant 1 : index
    %c0_26 = arith.constant 0 : index
    %30 = vector.load %arg4[%c0_24, %c1_25, %c0_26] : memref<1x2x128xf32, #tpu.memory_space<vmem>>, vector<1x1x128xf32>
    %31 = vector.shape_cast %30 : vector<1x1x128xf32> to vector<1x128xf32>
    %32 = vector.shape_cast %29 : vector<1x128xf32> to vector<1x1x128xf32>
    tpu.vector_store %arg4[%c0_24, %c1_25, %c0_26], %32 {strides = array<i32>} : memref<1x2x128xf32, #tpu.memory_space<vmem>>, vector<1x1x128xf32>,
    return
  }
  func.func @transform_0(%arg0: i32) -> (i32, i32, i32) {
    %c0_i32 = arith.constant 0 : i32
    %c0_i32_0 = arith.constant 0 : i32
    %c0_i32_1 = arith.constant 0 : i32
    return %arg0, %c0_i32, %c0_i32_0 : i32, i32, i32
  }
  func.func @transform_1(%arg0: i32) -> (i32, i32, i32) {
    %c0_i32 = arith.constant 0 : i32
    %c0_i32_0 = arith.constant 0 : i32
    %c0_i32_1 = arith.constant 0 : i32
    %c0_i32_2 = arith.constant 0 : i32
    return %c0_i32, %c0_i32_0, %c0_i32_1 : i32, i32, i32
  }
  func.func @transform_2(%arg0: i32) -> (i32, i32, i32) {
    %c0_i32 = arith.constant 0 : i32
    %c0_i32_0 = arith.constant 0 : i32
    %c0_i32_1 = arith.constant 0 : i32
    return %arg0, %c0_i32, %c0_i32_0 : i32, i32, i32
  }
  func.func @transform_3(%arg0: i32) -> (i32, i32, i32) {
    %c0_i32 = arith.constant 0 : i32
    %c0_i32_0 = arith.constant 0 : i32
    %c0_i32_1 = arith.constant 0 : i32
    return %arg0, %c0_i32, %c0_i32_0 : i32, i32, i32
  }
}

module attributes {stable_mosaic.version = 11 : i64} {
  func.func @bn_relu_pool_kernel(%arg0: i32, %arg1: memref<2x2x2x256xf32, #tpu.memory_space<vmem>>, %arg2: memref<2x2x128xf32, #tpu.memory_space<vmem>>, %arg3: memref<1x128xf32, #tpu.memory_space<vmem>>, %arg4: memref<1x128xf32, #tpu.memory_space<vmem>>, %arg5: memref<2x2x128xbf16, #tpu.memory_space<vmem>>) attributes {dimension_semantics = [#tpu.dimension_semantics<parallel>], iteration_bounds = array<i64: 2>, scalar_prefetch = 0 : i64, scratch_operands = 0 : i64, tpu.core_type = #tpu.core_type<tc>, window_params = [{transform_indices = @transform_0, window_bounds = array<i64: 2, 2, 2, 256>}, {pipeline_mode = #tpu.pipeline_mode<synchronous>, transform_indices = @transform_1, window_bounds = array<i64: 2, 2, 128>}, {pipeline_mode = #tpu.pipeline_mode<synchronous>, transform_indices = @transform_2, window_bounds = array<i64: 1, 128>}, {pipeline_mode = #tpu.pipeline_mode<synchronous>, transform_indices = @transform_3, window_bounds = array<i64: 1, 128>}, {transform_indices = @transform_4, window_bounds = array<i64: 2, 2, 128>}]} {
    %c0 = arith.constant 0 : index
    %c0_0 = arith.constant 0 : index
    %c0_1 = arith.constant 0 : index
    %0 = vector.load %arg2[%c0, %c0_0, %c0_1] : memref<2x2x128xf32, #tpu.memory_space<vmem>>, vector<2x2x128xf32>
    %cst = arith.constant dense<0.000000e+00> : vector<2x128xf32>
    %1 = vector.multi_reduction <add>, %0, %cst [0] : vector<2x2x128xf32> to vector<2x128xf32>
    %2 = vector.extract_strided_slice %1 {offsets = [0, 0], sizes = [1, 128], strides = [1, 1]} : vector<2x128xf32> to vector<1x128xf32>
    %cst_2 = arith.constant 3.125000e-02 : f32
    %3 = vector.broadcast %cst_2 : f32 to vector<1x128xf32>
    %4 = arith.mulf %2, %3 : vector<1x128xf32>
    %5 = vector.extract_strided_slice %1 {offsets = [1, 0], sizes = [1, 128], strides = [1, 1]} : vector<2x128xf32> to vector<1x128xf32>
    %cst_3 = arith.constant 3.125000e-02 : f32
    %6 = vector.broadcast %cst_3 : f32 to vector<1x128xf32>
    %7 = arith.mulf %5, %6 : vector<1x128xf32>
    %8 = arith.mulf %4, %4 : vector<1x128xf32>
    %9 = arith.subf %7, %8 : vector<1x128xf32>
    %cst_4 = arith.constant 0.000000e+00 : f32
    %10 = vector.broadcast %cst_4 : f32 to vector<1x128xf32>
    %11 = arith.maximumf %9, %10 : vector<1x128xf32>
    %c0_5 = arith.constant 0 : index
    %c0_6 = arith.constant 0 : index
    %12 = vector.load %arg3[%c0_5, %c0_6] : memref<1x128xf32, #tpu.memory_space<vmem>>, vector<1x128xf32>
    %cst_7 = arith.constant 9.99999974E-6 : f32
    %13 = vector.broadcast %cst_7 : f32 to vector<1x128xf32>
    %14 = arith.addf %11, %13 : vector<1x128xf32>
    %15 = math.rsqrt %14 : vector<1x128xf32>
    %16 = arith.mulf %12, %15 : vector<1x128xf32>
    %c0_8 = arith.constant 0 : index
    %c0_9 = arith.constant 0 : index
    %17 = vector.load %arg4[%c0_8, %c0_9] : memref<1x128xf32, #tpu.memory_space<vmem>>, vector<1x128xf32>
    %18 = arith.mulf %4, %16 : vector<1x128xf32>
    %19 = arith.subf %17, %18 : vector<1x128xf32>
    %20 = tpu.concatenate %16, %16 in 1 : vector<1x128xf32>, vector<1x128xf32> -> vector<1x256xf32>
    %21 = tpu.concatenate %19, %19 in 1 : vector<1x128xf32>, vector<1x128xf32> -> vector<1x256xf32>
    %c0_10 = arith.constant 0 : index
    %c0_11 = arith.constant 0 : index
    %c0_12 = arith.constant 0 : index
    %c0_13 = arith.constant 0 : index
    %22 = vector.load %arg1[%c0_10, %c0_11, %c0_12, %c0_13] : memref<2x2x2x256xf32, #tpu.memory_space<vmem>>, vector<2x2x2x256xf32>
    %23 = vector.shape_cast %20 : vector<1x256xf32> to vector<1x1x1x256xf32>
    %24 = vector.broadcast %23 : vector<1x1x1x256xf32> to vector<2x2x2x256xf32>
    %25 = arith.mulf %22, %24 : vector<2x2x2x256xf32>
    %26 = vector.shape_cast %21 : vector<1x256xf32> to vector<1x1x1x256xf32>
    %27 = vector.broadcast %26 : vector<1x1x1x256xf32> to vector<2x2x2x256xf32>
    %28 = arith.addf %25, %27 : vector<2x2x2x256xf32>
    %cst_14 = arith.constant 0.000000e+00 : f32
    %29 = vector.broadcast %cst_14 : f32 to vector<2x2x2x256xf32>
    %30 = arith.maximumf %28, %29 : vector<2x2x2x256xf32>
    %31 = vector.extract_strided_slice %30 {offsets = [0, 0, 0, 0], sizes = [2, 1, 2, 256], strides = [1, 1, 1, 1]} : vector<2x2x2x256xf32> to vector<2x1x2x256xf32>
    %32 = vector.shape_cast %31 : vector<2x1x2x256xf32> to vector<2x2x256xf32>
    %33 = vector.extract_strided_slice %30 {offsets = [0, 1, 0, 0], sizes = [2, 1, 2, 256], strides = [1, 1, 1, 1]} : vector<2x2x2x256xf32> to vector<2x1x2x256xf32>
    %34 = vector.shape_cast %33 : vector<2x1x2x256xf32> to vector<2x2x256xf32>
    %35 = arith.maximumf %32, %34 : vector<2x2x256xf32>
    %36 = vector.extract_strided_slice %35 {offsets = [0, 0, 0], sizes = [2, 2, 128], strides = [1, 1, 1]} : vector<2x2x256xf32> to vector<2x2x128xf32>
    %37 = vector.extract_strided_slice %35 {offsets = [0, 0, 128], sizes = [2, 2, 128], strides = [1, 1, 1]} : vector<2x2x256xf32> to vector<2x2x128xf32>
    %38 = arith.maximumf %36, %37 : vector<2x2x128xf32>
    %39 = arith.truncf %38 : vector<2x2x128xf32> to vector<2x2x128xbf16>
    %c0_15 = arith.constant 0 : index
    %c0_16 = arith.constant 0 : index
    %c0_17 = arith.constant 0 : index
    %40 = vector.load %arg5[%c0_15, %c0_16, %c0_17] : memref<2x2x128xbf16, #tpu.memory_space<vmem>>, vector<2x2x128xbf16>
    tpu.vector_store %arg5[%c0_15, %c0_16, %c0_17], %39 {strides = array<i32>} : memref<2x2x128xbf16, #tpu.memory_space<vmem>>, vector<2x2x128xbf16>,
    return
  }
  func.func @transform_0(%arg0: i32) -> (i32, i32, i32, i32) {
    %c0_i32 = arith.constant 0 : i32
    %c0_i32_0 = arith.constant 0 : i32
    %c0_i32_1 = arith.constant 0 : i32
    %c0_i32_2 = arith.constant 0 : i32
    return %arg0, %c0_i32, %c0_i32_0, %c0_i32_1 : i32, i32, i32, i32
  }
  func.func @transform_1(%arg0: i32) -> (i32, i32, i32) {
    %c0_i32 = arith.constant 0 : i32
    %c0_i32_0 = arith.constant 0 : i32
    %c0_i32_1 = arith.constant 0 : i32
    %c0_i32_2 = arith.constant 0 : i32
    return %c0_i32, %c0_i32_0, %c0_i32_1 : i32, i32, i32
  }
  func.func @transform_2(%arg0: i32) -> (i32, i32) {
    %c0_i32 = arith.constant 0 : i32
    %c0_i32_0 = arith.constant 0 : i32
    %c0_i32_1 = arith.constant 0 : i32
    return %c0_i32, %c0_i32_0 : i32, i32
  }
  func.func @transform_3(%arg0: i32) -> (i32, i32) {
    %c0_i32 = arith.constant 0 : i32
    %c0_i32_0 = arith.constant 0 : i32
    %c0_i32_1 = arith.constant 0 : i32
    return %c0_i32, %c0_i32_0 : i32, i32
  }
  func.func @transform_4(%arg0: i32) -> (i32, i32, i32) {
    %c0_i32 = arith.constant 0 : i32
    %c0_i32_0 = arith.constant 0 : i32
    %c0_i32_1 = arith.constant 0 : i32
    return %arg0, %c0_i32, %c0_i32_0 : i32, i32, i32
  }
}

module attributes {stable_mosaic.version = 11 : i64} {
  func.func @conv_stats_kernel(%arg0: i32, %arg1: memref<1x8x96xbf16, #tpu.memory_space<vmem>>, %arg2: memref<3x96x128xbf16, #tpu.memory_space<vmem>>, %arg3: memref<1x4x128xf32, #tpu.memory_space<vmem>>, %arg4: memref<1x2x128xf32, #tpu.memory_space<vmem>>) attributes {dimension_semantics = [#tpu.dimension_semantics<parallel>], iteration_bounds = array<i64: 2>, scalar_prefetch = 0 : i64, scratch_operands = 0 : i64, tpu.core_type = #tpu.core_type<tc>, window_params = [{transform_indices = @transform_0, window_bounds = array<i64: 1, 8, 96>}, {pipeline_mode = #tpu.pipeline_mode<synchronous>, transform_indices = @transform_1, window_bounds = array<i64: 3, 96, 128>}, {transform_indices = @transform_2, window_bounds = array<i64: 1, 4, 128>}, {transform_indices = @transform_3, window_bounds = array<i64: 1, 2, 128>}]} {
    %cst = arith.constant 0.000000e+00 : f32
    %0 = vector.broadcast %cst : f32 to vector<4x128xf32>
    %c0 = arith.constant 0 : index
    %c0_0 = arith.constant 0 : index
    %c0_1 = arith.constant 0 : index
    %1 = vector.load %arg1[%c0, %c0_0, %c0_1] : memref<1x8x96xbf16, #tpu.memory_space<vmem>>, vector<1x4x96xbf16>
    %2 = vector.shape_cast %1 : vector<1x4x96xbf16> to vector<4x96xbf16>
    %c0_2 = arith.constant 0 : index
    %c0_3 = arith.constant 0 : index
    %c0_4 = arith.constant 0 : index
    %3 = vector.load %arg2[%c0_2, %c0_3, %c0_4] : memref<3x96x128xbf16, #tpu.memory_space<vmem>>, vector<1x96x128xbf16>
    %4 = vector.shape_cast %3 : vector<1x96x128xbf16> to vector<96x128xbf16>
    %cst_5 = arith.constant dense<0.000000e+00> : vector<4x128xf32>
    %5 = tpu.matmul %2, %4, %cst_5 {dimension_numbers = #tpu.dot_dimension_numbers<[1], [0], [0], [1], [0, 0, 1, 1], [], []>} : vector<4x96xbf16>, vector<96x128xbf16>, vector<4x128xf32> -> vector<4x128xf32>
    %6 = arith.addf %0, %5 : vector<4x128xf32>
    %c0_6 = arith.constant 0 : index
    %c2 = arith.constant 2 : index
    %c0_7 = arith.constant 0 : index
    %7 = vector.load %arg1[%c0_6, %c2, %c0_7] : memref<1x8x96xbf16, #tpu.memory_space<vmem>>, vector<1x4x96xbf16>
    %8 = vector.shape_cast %7 : vector<1x4x96xbf16> to vector<4x96xbf16>
    %c1 = arith.constant 1 : index
    %c0_8 = arith.constant 0 : index
    %c0_9 = arith.constant 0 : index
    %9 = vector.load %arg2[%c1, %c0_8, %c0_9] : memref<3x96x128xbf16, #tpu.memory_space<vmem>>, vector<1x96x128xbf16>
    %10 = vector.shape_cast %9 : vector<1x96x128xbf16> to vector<96x128xbf16>
    %cst_10 = arith.constant dense<0.000000e+00> : vector<4x128xf32>
    %11 = tpu.matmul %8, %10, %cst_10 {dimension_numbers = #tpu.dot_dimension_numbers<[1], [0], [0], [1], [0, 0, 1, 1], [], []>} : vector<4x96xbf16>, vector<96x128xbf16>, vector<4x128xf32> -> vector<4x128xf32>
    %12 = arith.addf %6, %11 : vector<4x128xf32>
    %c0_11 = arith.constant 0 : index
    %c4 = arith.constant 4 : index
    %c0_12 = arith.constant 0 : index
    %13 = vector.load %arg1[%c0_11, %c4, %c0_12] : memref<1x8x96xbf16, #tpu.memory_space<vmem>>, vector<1x4x96xbf16>
    %14 = vector.shape_cast %13 : vector<1x4x96xbf16> to vector<4x96xbf16>
    %c2_13 = arith.constant 2 : index
    %c0_14 = arith.constant 0 : index
    %c0_15 = arith.constant 0 : index
    %15 = vector.load %arg2[%c2_13, %c0_14, %c0_15] : memref<3x96x128xbf16, #tpu.memory_space<vmem>>, vector<1x96x128xbf16>
    %16 = vector.shape_cast %15 : vector<1x96x128xbf16> to vector<96x128xbf16>
    %cst_16 = arith.constant dense<0.000000e+00> : vector<4x128xf32>
    %17 = tpu.matmul %14, %16, %cst_16 {dimension_numbers = #tpu.dot_dimension_numbers<[1], [0], [0], [1], [0, 0, 1, 1], [], []>} : vector<4x96xbf16>, vector<96x128xbf16>, vector<4x128xf32> -> vector<4x128xf32>
    %18 = arith.addf %12, %17 : vector<4x128xf32>
    %c0_17 = arith.constant 0 : index
    %c0_18 = arith.constant 0 : index
    %c0_19 = arith.constant 0 : index
    %19 = vector.load %arg3[%c0_17, %c0_18, %c0_19] : memref<1x4x128xf32, #tpu.memory_space<vmem>>, vector<1x4x128xf32>
    %20 = vector.shape_cast %19 : vector<1x4x128xf32> to vector<4x128xf32>
    %21 = vector.shape_cast %18 : vector<4x128xf32> to vector<1x4x128xf32>
    tpu.vector_store %arg3[%c0_17, %c0_18, %c0_19], %21 {strides = array<i32>} : memref<1x4x128xf32, #tpu.memory_space<vmem>>, vector<1x4x128xf32>,
    %cst_20 = arith.constant dense<0.000000e+00> : vector<128xf32>
    %22 = vector.multi_reduction <add>, %18, %cst_20 [0] : vector<4x128xf32> to vector<128xf32>
    %23 = vector.shape_cast %22 : vector<128xf32> to vector<1x128xf32>
    %c0_21 = arith.constant 0 : index
    %c0_22 = arith.constant 0 : index
    %c0_23 = arith.constant 0 : index
    %24 = vector.load %arg4[%c0_21, %c0_22, %c0_23] : memref<1x2x128xf32, #tpu.memory_space<vmem>>, vector<1x1x128xf32>
    %25 = vector.shape_cast %24 : vector<1x1x128xf32> to vector<1x128xf32>
    %26 = vector.shape_cast %23 : vector<1x128xf32> to vector<1x1x128xf32>
    tpu.vector_store %arg4[%c0_21, %c0_22, %c0_23], %26 {strides = array<i32>} : memref<1x2x128xf32, #tpu.memory_space<vmem>>, vector<1x1x128xf32>,
    %27 = arith.mulf %18, %18 : vector<4x128xf32>
    %cst_24 = arith.constant dense<0.000000e+00> : vector<128xf32>
    %28 = vector.multi_reduction <add>, %27, %cst_24 [0] : vector<4x128xf32> to vector<128xf32>
    %29 = vector.shape_cast %28 : vector<128xf32> to vector<1x128xf32>
    %c0_25 = arith.constant 0 : index
    %c1_26 = arith.constant 1 : index
    %c0_27 = arith.constant 0 : index
    %30 = vector.load %arg4[%c0_25, %c1_26, %c0_27] : memref<1x2x128xf32, #tpu.memory_space<vmem>>, vector<1x1x128xf32>
    %31 = vector.shape_cast %30 : vector<1x1x128xf32> to vector<1x128xf32>
    %32 = vector.shape_cast %29 : vector<1x128xf32> to vector<1x1x128xf32>
    tpu.vector_store %arg4[%c0_25, %c1_26, %c0_27], %32 {strides = array<i32>} : memref<1x2x128xf32, #tpu.memory_space<vmem>>, vector<1x1x128xf32>,
    return
  }
  func.func @transform_0(%arg0: i32) -> (i32, i32, i32) {
    %c0_i32 = arith.constant 0 : i32
    %c0_i32_0 = arith.constant 0 : i32
    %c0_i32_1 = arith.constant 0 : i32
    return %arg0, %c0_i32, %c0_i32_0 : i32, i32, i32
  }
  func.func @transform_1(%arg0: i32) -> (i32, i32, i32) {
    %c0_i32 = arith.constant 0 : i32
    %c0_i32_0 = arith.constant 0 : i32
    %c0_i32_1 = arith.constant 0 : i32
    %c0_i32_2 = arith.constant 0 : i32
    return %c0_i32, %c0_i32_0, %c0_i32_1 : i32, i32, i32
  }
  func.func @transform_2(%arg0: i32) -> (i32, i32, i32) {
    %c0_i32 = arith.constant 0 : i32
    %c0_i32_0 = arith.constant 0 : i32
    %c0_i32_1 = arith.constant 0 : i32
    return %arg0, %c0_i32, %c0_i32_0 : i32, i32, i32
  }
  func.func @transform_3(%arg0: i32) -> (i32, i32, i32) {
    %c0_i32 = arith.constant 0 : i32
    %c0_i32_0 = arith.constant 0 : i32
    %c0_i32_1 = arith.constant 0 : i32
    return %arg0, %c0_i32, %c0_i32_0 : i32, i32, i32
  }
}

module attributes {stable_mosaic.version = 11 : i64} {
  func.func @bn_relu_pool_kernel(%arg0: i32, %arg1: memref<1x2x1x256xf32, #tpu.memory_space<vmem>>, %arg2: memref<2x2x128xf32, #tpu.memory_space<vmem>>, %arg3: memref<1x128xf32, #tpu.memory_space<vmem>>, %arg4: memref<1x128xf32, #tpu.memory_space<vmem>>, %arg5: memref<1x1x128xf32, #tpu.memory_space<vmem>>) attributes {dimension_semantics = [#tpu.dimension_semantics<parallel>], iteration_bounds = array<i64: 2>, scalar_prefetch = 0 : i64, scratch_operands = 0 : i64, tpu.core_type = #tpu.core_type<tc>, window_params = [{transform_indices = @transform_0, window_bounds = array<i64: 1, 2, 1, 256>}, {pipeline_mode = #tpu.pipeline_mode<synchronous>, transform_indices = @transform_1, window_bounds = array<i64: 2, 2, 128>}, {pipeline_mode = #tpu.pipeline_mode<synchronous>, transform_indices = @transform_2, window_bounds = array<i64: 1, 128>}, {pipeline_mode = #tpu.pipeline_mode<synchronous>, transform_indices = @transform_3, window_bounds = array<i64: 1, 128>}, {transform_indices = @transform_4, window_bounds = array<i64: 1, 1, 128>}]} {
    %c0 = arith.constant 0 : index
    %c0_0 = arith.constant 0 : index
    %c0_1 = arith.constant 0 : index
    %0 = vector.load %arg2[%c0, %c0_0, %c0_1] : memref<2x2x128xf32, #tpu.memory_space<vmem>>, vector<2x2x128xf32>
    %cst = arith.constant dense<0.000000e+00> : vector<2x128xf32>
    %1 = vector.multi_reduction <add>, %0, %cst [0] : vector<2x2x128xf32> to vector<2x128xf32>
    %2 = vector.extract_strided_slice %1 {offsets = [0, 0], sizes = [1, 128], strides = [1, 1]} : vector<2x128xf32> to vector<1x128xf32>
    %cst_2 = arith.constant 1.250000e-01 : f32
    %3 = vector.broadcast %cst_2 : f32 to vector<1x128xf32>
    %4 = arith.mulf %2, %3 : vector<1x128xf32>
    %5 = vector.extract_strided_slice %1 {offsets = [1, 0], sizes = [1, 128], strides = [1, 1]} : vector<2x128xf32> to vector<1x128xf32>
    %cst_3 = arith.constant 1.250000e-01 : f32
    %6 = vector.broadcast %cst_3 : f32 to vector<1x128xf32>
    %7 = arith.mulf %5, %6 : vector<1x128xf32>
    %8 = arith.mulf %4, %4 : vector<1x128xf32>
    %9 = arith.subf %7, %8 : vector<1x128xf32>
    %cst_4 = arith.constant 0.000000e+00 : f32
    %10 = vector.broadcast %cst_4 : f32 to vector<1x128xf32>
    %11 = arith.maximumf %9, %10 : vector<1x128xf32>
    %c0_5 = arith.constant 0 : index
    %c0_6 = arith.constant 0 : index
    %12 = vector.load %arg3[%c0_5, %c0_6] : memref<1x128xf32, #tpu.memory_space<vmem>>, vector<1x128xf32>
    %cst_7 = arith.constant 9.99999974E-6 : f32
    %13 = vector.broadcast %cst_7 : f32 to vector<1x128xf32>
    %14 = arith.addf %11, %13 : vector<1x128xf32>
    %15 = math.rsqrt %14 : vector<1x128xf32>
    %16 = arith.mulf %12, %15 : vector<1x128xf32>
    %c0_8 = arith.constant 0 : index
    %c0_9 = arith.constant 0 : index
    %17 = vector.load %arg4[%c0_8, %c0_9] : memref<1x128xf32, #tpu.memory_space<vmem>>, vector<1x128xf32>
    %18 = arith.mulf %4, %16 : vector<1x128xf32>
    %19 = arith.subf %17, %18 : vector<1x128xf32>
    %20 = tpu.concatenate %16, %16 in 1 : vector<1x128xf32>, vector<1x128xf32> -> vector<1x256xf32>
    %21 = tpu.concatenate %19, %19 in 1 : vector<1x128xf32>, vector<1x128xf32> -> vector<1x256xf32>
    %c0_10 = arith.constant 0 : index
    %c0_11 = arith.constant 0 : index
    %c0_12 = arith.constant 0 : index
    %c0_13 = arith.constant 0 : index
    %22 = vector.load %arg1[%c0_10, %c0_11, %c0_12, %c0_13] : memref<1x2x1x256xf32, #tpu.memory_space<vmem>>, vector<1x2x1x256xf32>
    %23 = vector.shape_cast %20 : vector<1x256xf32> to vector<1x1x1x256xf32>
    %24 = vector.broadcast %23 : vector<1x1x1x256xf32> to vector<1x2x1x256xf32>
    %25 = arith.mulf %22, %24 : vector<1x2x1x256xf32>
    %26 = vector.shape_cast %21 : vector<1x256xf32> to vector<1x1x1x256xf32>
    %27 = vector.broadcast %26 : vector<1x1x1x256xf32> to vector<1x2x1x256xf32>
    %28 = arith.addf %25, %27 : vector<1x2x1x256xf32>
    %cst_14 = arith.constant 0.000000e+00 : f32
    %29 = vector.broadcast %cst_14 : f32 to vector<1x2x1x256xf32>
    %30 = arith.maximumf %28, %29 : vector<1x2x1x256xf32>
    %31 = vector.extract_strided_slice %30 {offsets = [0, 0, 0, 0], sizes = [1, 1, 1, 256], strides = [1, 1, 1, 1]} : vector<1x2x1x256xf32> to vector<1x1x1x256xf32>
    %32 = vector.shape_cast %31 : vector<1x1x1x256xf32> to vector<1x1x256xf32>
    %33 = vector.extract_strided_slice %30 {offsets = [0, 1, 0, 0], sizes = [1, 1, 1, 256], strides = [1, 1, 1, 1]} : vector<1x2x1x256xf32> to vector<1x1x1x256xf32>
    %34 = vector.shape_cast %33 : vector<1x1x1x256xf32> to vector<1x1x256xf32>
    %35 = arith.maximumf %32, %34 : vector<1x1x256xf32>
    %36 = vector.extract_strided_slice %35 {offsets = [0, 0, 0], sizes = [1, 1, 128], strides = [1, 1, 1]} : vector<1x1x256xf32> to vector<1x1x128xf32>
    %37 = vector.extract_strided_slice %35 {offsets = [0, 0, 128], sizes = [1, 1, 128], strides = [1, 1, 1]} : vector<1x1x256xf32> to vector<1x1x128xf32>
    %38 = arith.maximumf %36, %37 : vector<1x1x128xf32>
    %c0_15 = arith.constant 0 : index
    %c0_16 = arith.constant 0 : index
    %c0_17 = arith.constant 0 : index
    %39 = vector.load %arg5[%c0_15, %c0_16, %c0_17] : memref<1x1x128xf32, #tpu.memory_space<vmem>>, vector<1x1x128xf32>
    tpu.vector_store %arg5[%c0_15, %c0_16, %c0_17], %38 {strides = array<i32>} : memref<1x1x128xf32, #tpu.memory_space<vmem>>, vector<1x1x128xf32>,
    return
  }
  func.func @transform_0(%arg0: i32) -> (i32, i32, i32, i32) {
    %c0_i32 = arith.constant 0 : i32
    %c0_i32_0 = arith.constant 0 : i32
    %c0_i32_1 = arith.constant 0 : i32
    %c0_i32_2 = arith.constant 0 : i32
    return %arg0, %c0_i32, %c0_i32_0, %c0_i32_1 : i32, i32, i32, i32
  }
  func.func @transform_1(%arg0: i32) -> (i32, i32, i32) {
    %c0_i32 = arith.constant 0 : i32
    %c0_i32_0 = arith.constant 0 : i32
    %c0_i32_1 = arith.constant 0 : i32
    %c0_i32_2 = arith.constant 0 : i32
    return %c0_i32, %c0_i32_0, %c0_i32_1 : i32, i32, i32
  }
  func.func @transform_2(%arg0: i32) -> (i32, i32) {
    %c0_i32 = arith.constant 0 : i32
    %c0_i32_0 = arith.constant 0 : i32
    %c0_i32_1 = arith.constant 0 : i32
    return %c0_i32, %c0_i32_0 : i32, i32
  }
  func.func @transform_3(%arg0: i32) -> (i32, i32) {
    %c0_i32 = arith.constant 0 : i32
    %c0_i32_0 = arith.constant 0 : i32
    %c0_i32_1 = arith.constant 0 : i32
    return %c0_i32, %c0_i32_0 : i32, i32
  }
  func.func @transform_4(%arg0: i32) -> (i32, i32, i32) {
    %c0_i32 = arith.constant 0 : i32
    %c0_i32_0 = arith.constant 0 : i32
    %c0_i32_1 = arith.constant 0 : i32
    return %arg0, %c0_i32, %c0_i32_0 : i32, i32, i32
  }
}

module attributes {stable_mosaic.version = 11 : i64} {
  func.func @linear_kernel(%arg0: memref<2x32xf32, #tpu.memory_space<vmem>>, %arg1: memref<32x256xf32, #tpu.memory_space<vmem>>, %arg2: memref<1x256xf32, #tpu.memory_space<vmem>>, %arg3: memref<2x256xf32, #tpu.memory_space<vmem>>) attributes {dimension_semantics = [], scalar_prefetch = 0 : i64, scratch_operands = 0 : i64, tpu.core_type = #tpu.core_type<tc>} {
    %c0 = arith.constant 0 : index
    %c0_0 = arith.constant 0 : index
    %0 = vector.load %arg0[%c0, %c0_0] : memref<2x32xf32, #tpu.memory_space<vmem>>, vector<2x32xf32>
    %c0_1 = arith.constant 0 : index
    %c0_2 = arith.constant 0 : index
    %1 = vector.load %arg1[%c0_1, %c0_2] : memref<32x256xf32, #tpu.memory_space<vmem>>, vector<32x256xf32>
    %cst = arith.constant dense<0.000000e+00> : vector<2x256xf32>
    %2 = tpu.matmul %0, %1, %cst {dimension_numbers = #tpu.dot_dimension_numbers<[1], [0], [0], [1], [0, 0, 1, 1], [], []>} : vector<2x32xf32>, vector<32x256xf32>, vector<2x256xf32> -> vector<2x256xf32>
    %c0_3 = arith.constant 0 : index
    %c0_4 = arith.constant 0 : index
    %3 = vector.load %arg2[%c0_3, %c0_4] : memref<1x256xf32, #tpu.memory_space<vmem>>, vector<1x256xf32>
    %4 = vector.broadcast %3 : vector<1x256xf32> to vector<2x256xf32>
    %5 = arith.addf %2, %4 : vector<2x256xf32>
    %c0_5 = arith.constant 0 : index
    %c0_6 = arith.constant 0 : index
    %6 = vector.load %arg3[%c0_5, %c0_6] : memref<2x256xf32, #tpu.memory_space<vmem>>, vector<2x256xf32>
    tpu.vector_store %arg3[%c0_5, %c0_6], %5 {strides = array<i32>} : memref<2x256xf32, #tpu.memory_space<vmem>>, vector<2x256xf32>,
    return
  }
}

</mosaic_0001>

<bundles_post_ra>
// kernel: gconvnet_forward.10
= control target key start
LH: loop header
LB: loop body
LE: loop exit
PB: predicated region body
PF: predicated region fallthrough
CT: control target
= control target key end

     0   :  { %s543_s15 = smov 0   ;;  %s684_s0 = inlined_call_operand.vmem [shape: f32[16,2,8,256], index: 0, kind: input, shape index: {}]   ;;  %s685_s1 = inlined_call_operand.vmem [shape: f32[2,2,128], index: 1, kind: input, shape index: {}]   ;;  %s686_s2 = inlined_call_operand.vmem [shape: f32[1,128], index: 2, kind: input, shape index: {}]   ;;  %s687_s3 = inlined_call_operand.vmem [shape: f32[1,128], index: 3, kind: input, shape index: {}]   ;;  %s688_s4 = inlined_call_operand.vmem [shape: bf16[16,8,128], index: 4, kind: output, shape index: {}]  }
   0x1 LB: > { %s464_s16 = sadd.s32 4294967295, %s516_s15   ;;  %p468_p0 = scmp.ge.s32.totalorder %s516_s15, 1  ;;  %s516_s15 = sphi %s543_s15, %s14_s15  }
   0x2   : > { %p164_p1 = scmp.lt.s32.totalorder %s516_s15, 3 }
   0x4   : > { %p165_p2 = pnand %p468_p0, %p164_p1 }
   0x5   : > { %s469_s21 = sshll.u32 (!%p165_p2), %s464_s16, 3 }
   0x6   : > { %168 = sbr.rel (%p165_p2) target bundleno = 95 (0x5f), region = 36  ;;  %p192_p3 = scmp.lt.s32.totalorder (!%p165_p2), %s469_s21, 15 }
   0xb   : > { %v204_v0 = vld [vmem:[%s685_s1] sm:$0x3]  ;;  %v205_v1 = vld [vmem:[%s685_s1 + $0x2] sm:$0x3]  ;;  %vm206_vm0 = vcmask 1041408   ;;  %s690_s21 = smov (!%p192_p3, %s469_s21), 15 }
   0xc   : > { %v207_v2 = vsel %vm206_vm0, %v204_v0, 0.0  ;;  %v208_v3 = vsel %vm206_vm0, %v205_v1, 0.0  ;;  %s476_s22 = sshll.u32 %s690_s21, 5  ;;  %v217_v18 = vld [vmem:[%s686_s2] sm:$0x1]  ;;  %s473_s30 = sshll.u32 %s690_s21, 2 }
   0xd   : > { %v209_v4 = vadd.f32 %v208_v3, %v207_v2  ;;  %s566_s27 = scalar_lea.vmem %s684_s0, %s476_s22  ;;  %v235_v21 = vld [vmem:[%s687_s3] sm:$0x1]  ;;  %s629_s7 = scalar_lea.vmem %s688_s4, %s473_s30 }
   0xe   : > { %v238_v22 = vld [vmem:[%s566_s27] sm:$0xff]  ;;  %v239_v23 = vld [vmem:[%s566_s27 + $0x8] sm:$0xff]  ;;  %v240_v24 = vld [vmem:[%s566_s27 + $0x10] sm:$0xff] }
   0xf   : > { %v210_v5 = vmul.f32 0.001953125, %v209_v4  ;;  %v241_v25 = vld [vmem:[%s566_s27 + $0x18] sm:$0xff]  ;;  %v242_v26 = vld [vmem:[%s566_s27 + $0x20] sm:$0xff]  ;;  %v243_v29 = vld [vmem:[%s566_s27 + $0x28] sm:$0xff] }
  0x10   : > { %v244_v30 = vld [vmem:[%s566_s27 + $0x30] sm:$0xff]  ;;  %v245_v31 = vld [vmem:[%s566_s27 + $0x38] sm:$0xff]  ;;  %v246_v32 = vld [vmem:[%s566_s27 + $0x40] sm:$0xff] }
  0x11   : > { %v211_v6 = vmul.f32 %v210_v5, %v210_v5  ;;  %v247_v33 = vld [vmem:[%s566_s27 + $0x48] sm:$0xff]  ;;  %v248_v34 = vld [vmem:[%s566_s27 + $0x50] sm:$0xff]  ;;  %v249_v39 = vld [vmem:[%s566_s27 + $0x58] sm:$0xff] }
  0x12   : > { %v250_v40 = vld [vmem:[%s566_s27 + $0x60] sm:$0xff]  ;;  %v251_v41 = vld [vmem:[%s566_s27 + $0x68] sm:$0xff]  ;;  %v252_v62 = vld [vmem:[%s566_s27 + $0x70] sm:$0xff] }
  0x13   : > { %v213_v7 = vrot.slane %v211_v6, 7  ;;  %v253_v63 = vld [vmem:[%s566_s27 + $0x78] sm:$0xff] }
  0x15   : > { %v215_v8 = vsub.f32 %v210_v5, %v213_v7 }
  0x17   : > { %v216_v9 = vmax.f32 %v215_v8, 0.0 }
  0x19   : > { %v218_v10 = vadd.f32 1e-05, %v216_v9 }
  0x1b   : > { %508 = vrsqrt.f32 %v218_v10  ;;  %vm225_vm1 = vweird.f32 %v218_v10 }
  0x21   : > { %v509_v11 = vpop.eup %508 }
  0x22   : > { %v220_v12 = vmul.f32 %v509_v11, %v218_v10  ;;  %vm226_vm2 = vweird.f32 %v509_v11 }
  0x23   : > { %vm227_vm3 = vmor %vm225_vm1, %vm226_vm2 }
  0x24   : > { %v221_v13 = vmul.f32 %v509_v11, %v220_v12 }
  0x26   : > { %v222_v14 = vmul.f32 0.5, %v221_v13 }
  0x28   : > { %v223_v15 = vsub.f32 1.5, %v222_v14 }
  0x2a   : > { %v224_v16 = vmul.f32 %v509_v11, %v223_v15 }
  0x2c   : > { %v228_v17 = vsel %vm227_vm3, %v509_v11, %v224_v16 }
  0x2d   : > { %230 = vst [vmem:[#allocation1] sm:$0xff] %v228_v17 }
  0x34   : > { %v232_v19 = vld [vmem:[#allocation1 + $0x1] ss:$9 sm:$0xff] }
  0x35   : > { %v234_v20 = vmul.f32 %v232_v19, %v217_v18 }
  0x37   : > { %v236_v27 = vmul.f32 %v234_v20, %v210_v5  ;;  %v576_v28 = vperm.slane %v234_v20, 0 }
  0x39   : > { %v237_v35 = vsub.f32 %v235_v21, %v236_v27  ;;  %v271_v36 = vmul.f32 %v576_v28, %v238_v22  ;;  %v272_v37 = vmul.f32 %v576_v28, %v239_v23  ;;  %v273_v38 = vmul.f32 %v576_v28, %v240_v24  ;;  %v254_v24 = vld [vmem:[%s566_s27 + $0x80] sm:$0xff] }
  0x3a   : > { %v274_v42 = vmul.f32 %v576_v28, %v241_v25  ;;  %v275_v43 = vmul.f32 %v576_v28, %v242_v26  ;;  %v276_v44 = vmul.f32 %v576_v28, %v243_v29  ;;  %v277_v45 = vmul.f32 %v576_v28, %v244_v30  ;;  %v255_v25 = vld [vmem:[%s566_s27 + $0x88] sm:$0xff] }
  0x3b   : > { %v594_v46 = vperm.slane %v237_v35, 0  ;;  %v278_v47 = vmul.f32 %v576_v28, %v245_v31  ;;  %v279_v48 = vmul.f32 %v576_v28, %v246_v32  ;;  %v280_v49 = vmul.f32 %v576_v28, %v247_v33  ;;  %v256_v31 = vld [vmem:[%s566_s27 + $0x90] sm:$0xff]  ;;  %v257_v32 = vld [vmem:[%s566_s27 + $0x98] sm:$0xff] }
  0x3c   : > { %v281_v50 = vmul.f32 %v576_v28, %v248_v34  ;;  %v282_v51 = vmul.f32 %v576_v28, %v249_v39  ;;  %v283_v52 = vmul.f32 %v576_v28, %v250_v40  ;;  %v284_v53 = vmul.f32 %v576_v28, %v251_v41 }
  0x3d   : > { %v304_v54 = vadd.f32 %v594_v46, %v271_v36  ;;  %v305_v55 = vadd.f32 %v594_v46, %v272_v37  ;;  %v306_v56 = vadd.f32 %v594_v46, %v273_v38  ;;  %v307_v57 = vadd.f32 %v594_v46, %v274_v42  ;;  %v258_v37 = vld [vmem:[%s566_s27 + $0xa0] sm:$0xff]  ;;  %v259_v38 = vld [vmem:[%s566_s27 + $0xa8] sm:$0xff]  ;;  %v260_v42 = vld [vmem:[%s566_s27 + $0xb0] sm:$0xff] }
  0x3e   : > { %v308_v58 = vadd.f32 %v594_v46, %v275_v43  ;;  %v309_v59 = vadd.f32 %v594_v46, %v276_v44  ;;  %v310_v60 = vadd.f32 %v594_v46, %v277_v45  ;;  %v311_v61 = vadd.f32 %v594_v46, %v278_v47  ;;  %v261_v43 = vld [vmem:[%s566_s27 + $0xb8] sm:$0xff] }
  0x3f   : > { %v336_v0 = vmax.f32 %v304_v54, 0.0  ;;  %v337_v1 = vmax.f32 %v305_v55, 0.0  ;;  %v338_v2 = vmax.f32 %v306_v56, 0.0  ;;  %v339_v3 = vmax.f32 %v307_v57, 0.0 }
  0x40   : > { %v340_v4 = vmax.f32 %v308_v58, 0.0  ;;  %v341_v5 = vmax.f32 %v309_v59, 0.0  ;;  %v342_v6 = vmax.f32 %v310_v60, 0.0  ;;  %v343_v7 = vmax.f32 %v311_v61, 0.0 }
  0x41   : > { %v368_v8 = vmax.f32 %v336_v0, %v338_v2  ;;  %v369_v9 = vmax.f32 %v337_v1, %v339_v3  ;;  %v285_v10 = vmul.f32 %v576_v28, %v252_v62  ;;  %v286_v11 = vmul.f32 %v576_v28, %v253_v63  ;;  %v262_v2 = vld [vmem:[%s566_s27 + $0xc0] sm:$0xff]  ;;  %v263_v3 = vld [vmem:[%s566_s27 + $0xc8] sm:$0xff] }
  0x42   : > { %v370_v12 = vmax.f32 %v340_v4, %v342_v6  ;;  %v371_v13 = vmax.f32 %v341_v5, %v343_v7  ;;  %v312_v14 = vadd.f32 %v594_v46, %v279_v48  ;;  %v313_v15 = vadd.f32 %v594_v46, %v280_v49 }
  0x43   : > { %v384_v16 = vmax.f32 %v368_v8, %v369_v9  ;;  %v314_v17 = vadd.f32 %v594_v46, %v281_v50  ;;  %v315_v18 = vadd.f32 %v594_v46, %v282_v51  ;;  %v316_v19 = vadd.f32 %v594_v46, %v283_v52  ;;  %v264_v8 = vld [vmem:[%s566_s27 + $0xd0] sm:$0xff]  ;;  %v265_v9 = vld [vmem:[%s566_s27 + $0xd8] sm:$0xff] }
  0x44   : > { %v385_v20 = vmax.f32 %v370_v12, %v371_v13  ;;  %v317_v21 = vadd.f32 %v594_v46, %v284_v53  ;;  %v318_v22 = vadd.f32 %v594_v46, %v285_v10  ;;  %v319_v23 = vadd.f32 %v594_v46, %v286_v11  ;;  %v266_v10 = vld [vmem:[%s566_s27 + $0xe0] sm:$0xff] }
  0x45   : > { %v344_v26 = vmax.f32 %v312_v14, 0.0  ;;  %v345_v27 = vmax.f32 %v313_v15, 0.0  ;;  %v346_v29 = vmax.f32 %v314_v17, 0.0  ;;  %v347_v30 = vmax.f32 %v315_v18, 0.0  ;;  %v267_v15 = vld [vmem:[%s566_s27 + $0xe8] sm:$0xff] }
  0x46   : > { %v480_v33 = vpack.c.bf16 %v385_v20, %v384_v16  ;;  %v348_v34 = vmax.f32 %v316_v19, 0.0  ;;  %v349_v35 = vmax.f32 %v317_v21, 0.0  ;;  %v350_v36 = vmax.f32 %v318_v22, 0.0  ;;  %v268_v16 = vld [vmem:[%s566_s27 + $0xf0] sm:$0xff]  ;;  %v269_v19 = vld [vmem:[%s566_s27 + $0xf8] sm:$0xff] }
  0x47   : > { %v351_v39 = vmax.f32 %v319_v23, 0.0  ;;  %v372_v40 = vmax.f32 %v344_v26, %v346_v29  ;;  %v373_v41 = vmax.f32 %v345_v27, %v347_v30  ;;  %v287_v44 = vmul.f32 %v576_v28, %v254_v24 }
  0x48   : > { %481 = vst [vmem:[%s629_s7] sm:$0xff] %v480_v33   ;;  %v374_v45 = vmax.f32 %v348_v34, %v350_v36  ;;  %v288_v47 = vmul.f32 %v576_v28, %v255_v25  ;;  %v289_v48 = vmul.f32 %v576_v28, %v256_v31  ;;  %v290_v49 = vmul.f32 %v576_v28, %v257_v32 }
  0x49   : > { %v375_v50 = vmax.f32 %v349_v35, %v351_v39  ;;  %v386_v51 = vmax.f32 %v372_v40, %v373_v41  ;;  %v291_v52 = vmul.f32 %v576_v28, %v258_v37  ;;  %v292_v53 = vmul.f32 %v576_v28, %v259_v38 }
  0x4a   : > { %v293_v54 = vmul.f32 %v576_v28, %v260_v42  ;;  %v294_v55 = vmul.f32 %v576_v28, %v261_v43  ;;  %v320_v56 = vadd.f32 %v594_v46, %v287_v44  ;;  %v321_v57 = vadd.f32 %v594_v46, %v288_v47 }
  0x4b   : > { %v387_v58 = vmax.f32 %v374_v45, %v375_v50  ;;  %v322_v59 = vadd.f32 %v594_v46, %v289_v48  ;;  %v323_v60 = vadd.f32 %v594_v46, %v290_v49  ;;  %v324_v61 = vadd.f32 %v594_v46, %v291_v52 }
  0x4c   : > { %v325_v62 = vadd.f32 %v594_v46, %v292_v53  ;;  %v326_v63 = vadd.f32 %v594_v46, %v293_v54  ;;  %v327_v0 = vadd.f32 %v594_v46, %v294_v55  ;;  %v352_v1 = vmax.f32 %v320_v56, 0.0 }
  0x4d   : > { %v485_v4 = vpack.c.bf16 %v387_v58, %v386_v51  ;;  %v353_v5 = vmax.f32 %v321_v57, 0.0  ;;  %v354_v6 = vmax.f32 %v322_v59, 0.0  ;;  %v355_v7 = vmax.f32 %v323_v60, 0.0 }
  0x4e   : > { %v356_v11 = vmax.f32 %v324_v61, 0.0  ;;  %v357_v12 = vmax.f32 %v325_v62, 0.0  ;;  %v358_v13 = vmax.f32 %v326_v63, 0.0  ;;  %v359_v14 = vmax.f32 %v327_v0, 0.0 }
  0x4f   : > { %497 = vst [vmem:[%s629_s7 + $0x8] sm:$0xff] %v485_v4   ;;  %v376_v17 = vmax.f32 %v352_v1, %v354_v6  ;;  %v377_v18 = vmax.f32 %v353_v5, %v355_v7  ;;  %v295_v20 = vmul.f32 %v576_v28, %v262_v2  ;;  %v296_v21 = vmul.f32 %v576_v28, %v263_v3 }
  0x50   : > { %v378_v22 = vmax.f32 %v356_v11, %v358_v13  ;;  %v379_v23 = vmax.f32 %v357_v12, %v359_v14  ;;  %v297_v24 = vmul.f32 %v576_v28, %v264_v8  ;;  %v298_v25 = vmul.f32 %v576_v28, %v265_v9 }
  0x51   : > { %v388_v26 = vmax.f32 %v376_v17, %v377_v18  ;;  %v299_v27 = vmul.f32 %v576_v28, %v266_v10  ;;  %v300_v29 = vmul.f32 %v576_v28, %v267_v15  ;;  %v301_v30 = vmul.f32 %v576_v28, %v268_v16 }
  0x52   : > { %v389_v31 = vmax.f32 %v378_v22, %v379_v23  ;;  %v302_v32 = vmul.f32 %v576_v28, %v269_v19  ;;  %v328_v33 = vadd.f32 %v594_v46, %v295_v20  ;;  %v329_v34 = vadd.f32 %v594_v46, %v296_v21 }
  0x53   : > { %v330_v35 = vadd.f32 %v594_v46, %v297_v24  ;;  %v331_v36 = vadd.f32 %v594_v46, %v298_v25  ;;  %v332_v37 = vadd.f32 %v594_v46, %v299_v27  ;;  %v333_v38 = vadd.f32 %v594_v46, %v300_v29 }
  0x54   : > { %v490_v39 = vpack.c.bf16 %v389_v31, %v388_v26  ;;  %v334_v40 = vadd.f32 %v594_v46, %v301_v30  ;;  %v335_v41 = vadd.f32 %v594_v46, %v302_v32  ;;  %v360_v42 = vmax.f32 %v328_v33, 0.0 }
  0x55   : > { %v361_v28 = vmax.f32 %v329_v34, 0.0  ;;  %v362_v43 = vmax.f32 %v330_v35, 0.0  ;;  %v363_v44 = vmax.f32 %v331_v36, 0.0  ;;  %v364_v45 = vmax.f32 %v332_v37, 0.0 }
  0x56   : > { %498 = vst [vmem:[%s629_s7 + $0x10] sm:$0xff] %v490_v39   ;;  %v365_v47 = vmax.f32 %v333_v38, 0.0  ;;  %v366_v48 = vmax.f32 %v334_v40, 0.0  ;;  %v367_v49 = vmax.f32 %v335_v41, 0.0 }
  0x57   : > { %v380_v50 = vmax.f32 %v360_v42, %v362_v43  ;;  %v381_v51 = vmax.f32 %v361_v28, %v363_v44 }
  0x58   : > { %v382_v52 = vmax.f32 %v364_v45, %v366_v48  ;;  %v383_v53 = vmax.f32 %v365_v47, %v367_v49 }
  0x59   : > { %v390_v54 = vmax.f32 %v380_v50, %v381_v51 }
  0x5a   : > { %v391_v55 = vmax.f32 %v382_v52, %v383_v53 }
  0x5c   : > { %v495_v56 = vpack.c.bf16 %v391_v55, %v390_v54 }
  0x5e   : > { %499 = vst [vmem:[%s629_s7 + $0x18] sm:$0xff] %v495_v56  }
  0x5f PF: > { %s14_s15 = sadd.s32 1, %s516_s15  }
  0x60   : > { %p11_p4 = scmp.ge.s32.totalorder %s14_s15, 4  }
  0x62   :  { %13 = sbr.rel (!%p11_p4) target bundleno = 1 (0x1), region = 67 }

// kernel: gconvnet_forward.9
= control target key start
LH: loop header
LB: loop body
LE: loop exit
PB: predicated region body
PF: predicated region fallthrough
CT: control target
= control target key end

     0   :  { %s1361_s12 = smov 0   ;;  %s1639_s0 = inlined_call_operand.vmem [shape: bf16[2,288,9], index: 0, kind: input, shape index: {}]   ;;  %s1640_s1 = inlined_call_operand.vmem [shape: bf16[3,9,128], index: 1, kind: input, shape index: {}]   ;;  %s1641_s2 = inlined_call_operand.vmem [shape: f32[2,256,128], index: 2, kind: output, shape index: {0}]   ;;  %s1642_s3 = inlined_call_operand.vmem [shape: f32[2,2,128], index: 3, kind: output, shape index: {1}]  }
   0x1 LB: > { %s1075_s13 = sadd.s32 4294967295, %s1338_s12   ;;  %p1079_p0 = scmp.ge.s32.totalorder %s1338_s12, 1  ;;  %s1338_s12 = sphi %s1361_s12, %s14_s12  }
   0x2   : > { %p140_p1 = scmp.lt.s32.totalorder %s1338_s12, 3 }
   0x4   : > { %p141_p2 = pnand %p1079_p0, %p140_p1 }
   0x5   : > { %p168_p3 = scmp.lt.s32.totalorder (!%p141_p2), %s1075_s13, 1 }
   0x6   : > { %144 = sbr.rel (%p141_p2) target bundleno = 373 (0x175), region = 28 }
   0xb   : > { %v1152_v0 = vld [vmem:[%s1640_s1 + $0x8] sm:$0xf]  ;;  %v1301_v1 = vld [vmem:[%s1640_s1 + $0x8] sm:$0x10]  ;;  %vm356_vm0 = vcmask 1043456   ;;  %vm357_vm1 = vcmask 1044480  }
   0xc   : > { %v1153_v2 = vor.u32 %v1301_v1, %v1152_v0  ;;  %v1176_v3 = vld [vmem:[%s1640_s1] sm:$0xf]  ;;  %v1299_v4 = vld [vmem:[%s1640_s1] sm:$0x10]  ;;  %v1340_v5 = vmov 65535   ;;  %s1644_s13 = smov (!%p168_p3, %s1075_s13), 1 }
   0xd   : > { %v358_v6 = vsel %vm356_vm0, 4294967295, %v1340_v5  ;;  %v1177_v7 = vor.u32 %v1299_v4, %v1176_v3  ;;  %v1262_v8 = vld [vmem:[%s1640_s1 + $0x10] sm:$0xf]  ;;  %v1318_v9 = vld [vmem:[%s1640_s1 + $0x10] sm:$0x10]  ;;  %s1322_s26 = smul.u32 144, %s1644_s13 }
   0xe   : > { %v359_v10 = vsel %vm357_vm1, %v358_v6, 0  ;;  %v1263_v11 = vor.u32 %v1318_v9, %v1262_v8  ;;  %vm307_vm2 = vcmask 72704   ;;  %s1282_s30 = sshll.u32 %s1644_s13, 8  ;;  %s1083_s7 = sshll.u32 %s1644_s13, 1 }
   0xf   : > { %v361_v12 = vand.u32 %v1153_v2, %v359_v10  ;;  %v466_v13 = vand.u32 %v1177_v7, %v359_v10  ;;  %s1393_s29 = scalar_lea.vmem %s1639_s0, %s1322_s26  ;;  %s1465_s6 = scalar_lea.vmem %s1641_s2, %s1282_s30 }
  0x10   : > { %v726_v14 = vand.u32 %v1263_v11, %v359_v10  ;;  %v1284_v15 = vld [vmem:[%s1393_s29 + $0x8] sm:$0xff]  ;;  %v1283_v17 = vld [vmem:[%s1393_s29] sm:$0xff]  ;;  %v1302_v18 = vld [vmem:[%s1393_s29 + $0x10] sm:$0xff]  ;;  %s181_s10 = scalar_lea.vmem %s1642_s3, %s1083_s7 }
  0x11   : > { %370 = vmatpush.bf16.msra.mxu0 %v361_v12  ;;  %1319 = vmatpush.bf16.msra.mxu3 %v361_v12  ;;  %v1296_v16 = vld [vmem:[%s1393_s29 + $0x68] sm:$0xff]  ;;  %v1285_v19 = vld [vmem:[%s1393_s29 + $0x10] sm:$0xff]  ;;  %v1303_v21 = vld [vmem:[%s1393_s29 + $0x18] sm:$0xff] }
  0x12   : > { %475 = vmatpush.bf16.msra.mxu1 %v466_v13  ;;  %735 = vmatpush.bf16.msra.mxu2 %v726_v14  ;;  %v1297_v20 = vld [vmem:[%s1393_s29 + $0x70] sm:$0xff]  ;;  %v1286_v22 = vld [vmem:[%s1393_s29 + $0x18] sm:$0xff]  ;;  %v1304_v24 = vld [vmem:[%s1393_s29 + $0x20] sm:$0xff] }
  0x13   : > { %v1298_v23 = vld [vmem:[%s1393_s29 + $0x78] sm:$0xff]  ;;  %v1287_v25 = vld [vmem:[%s1393_s29 + $0x20] sm:$0xff]  ;;  %v1305_v27 = vld [vmem:[%s1393_s29 + $0x28] sm:$0xff] }
  0x14   : > { %1154 = vmatmul.msk.bf16.vlgmr.msra.gmra.mxu0 %vm307_vm2, %v1284_v15  ;;  %1166 = vmatmul.msk.bf16.vlgmr.msra.gmra.mxu3 %vm307_vm2, %v1296_v16  ;;  %v1300_v26 = vld [vmem:[%s1393_s29 + $0x80] sm:$0xff]  ;;  %v1288_v28 = vld [vmem:[%s1393_s29 + $0x28] sm:$0xff]  ;;  %v1306_v30 = vld [vmem:[%s1393_s29 + $0x30] sm:$0xff] }
  0x15   : > { %1320 = vmatpush.bf16.msrb.mxu3 %v466_v13  ;;  %1178 = vmatmul.msk.bf16.vlgmr.msra.gmra.mxu1 %vm307_vm2, %v1283_v17  ;;  %v1426_v29 = vld [vmem:[%s1393_s29 + $0x60] sm:$0xff]  ;;  %v1289_v31 = vld [vmem:[%s1393_s29 + $0x30] sm:$0xff]  ;;  %v1307_v32 = vld [vmem:[%s1393_s29 + $0x38] sm:$0xff] }
  0x16   : > { %1264 = vmatmul.msk.bf16.vlgmr.msra.gmra.mxu2 %vm307_vm2, %v1302_v18  ;;  %v1290_v33 = vld [vmem:[%s1393_s29 + $0x38] sm:$0xff]  ;;  %v1308_v34 = vld [vmem:[%s1393_s29 + $0x40] sm:$0xff]  ;;  %v1309_v36 = vld [vmem:[%s1393_s29 + $0x48] sm:$0xff] }
  0x17   : > { %v1291_v35 = vld [vmem:[%s1393_s29 + $0x40] sm:$0xff]  ;;  %v1292_v37 = vld [vmem:[%s1393_s29 + $0x48] sm:$0xff]  ;;  %v1314_v38 = vld [vmem:[%s1393_s29 + $0x70] sm:$0xff] }
  0x18   : > { %v1310_v40 = vld [vmem:[%s1393_s29 + $0x50] sm:$0xff]  ;;  %v1315_v52 = vld [vmem:[%s1393_s29 + $0x78] sm:$0xff]  ;;  %v1316_v10 = vld [vmem:[%s1393_s29 + $0x80] sm:$0xff] }
  0x19   : > { %1321 = vmatpush.bf16.msra.mxu3 %v726_v14  ;;  %v1293_v51 = vld [vmem:[%s1393_s29 + $0x50] sm:$0xff]  ;;  %v1311_v55 = vld [vmem:[%s1393_s29 + $0x58] sm:$0xff]  ;;  %v1312_v13 = vld [vmem:[%s1393_s29 + $0x60] sm:$0xff] }
  0x1a   : > { %v1294_v9 = vld [vmem:[%s1393_s29 + $0x58] sm:$0xff] }
  0x24   : > { %1155 = vmatmul.msk.bf16.gmra.mxu0 %vm307_vm2, %v1285_v19  ;;  %1167 = vmatmul.msk.bf16.gmra.mxu3 %vm307_vm2, %v1297_v20 }
  0x25   : > { %1179 = vmatmul.msk.bf16.gmra.mxu1 %vm307_vm2, %v1284_v15 }
  0x26   : > { %1265 = vmatmul.msk.bf16.gmra.mxu2 %vm307_vm2, %v1303_v21 }
  0x34   : > { %1156 = vmatmul.msk.bf16.gmra.mxu0 %vm307_vm2, %v1286_v22  ;;  %1168 = vmatmul.msk.bf16.gmra.mxu3 %vm307_vm2, %v1298_v23 }
  0x35   : > { %1180 = vmatmul.msk.bf16.gmra.mxu1 %vm307_vm2, %v1285_v19 }
  0x36   : > { %1266 = vmatmul.msk.bf16.gmra.mxu2 %vm307_vm2, %v1304_v24 }
  0x44   : > { %1157 = vmatmul.msk.bf16.gmra.mxu0 %vm307_vm2, %v1287_v25  ;;  %1169 = vmatmul.msk.bf16.gmra.mxu3 %vm307_vm2, %v1300_v26 }
  0x45   : > { %1181 = vmatmul.msk.bf16.gmra.mxu1 %vm307_vm2, %v1286_v22 }
  0x46   : > { %1267 = vmatmul.msk.bf16.gmra.mxu2 %vm307_vm2, %v1305_v27 }
  0x54   : > { %1158 = vmatmul.msk.bf16.gmra.mxu0 %vm307_vm2, %v1288_v28  ;;  %1190 = vmatmul.msk.bf16.vlgmr.msrb.gmra.mxu3 %vm307_vm2, %v1426_v29 }
  0x55   : > { %1182 = vmatmul.msk.bf16.gmra.mxu1 %vm307_vm2, %v1287_v25 }
  0x56   : > { %1268 = vmatmul.msk.bf16.gmra.mxu2 %vm307_vm2, %v1306_v30 }
  0x64   : > { %1159 = vmatmul.msk.bf16.gmra.mxu0 %vm307_vm2, %v1289_v31  ;;  %1191 = vmatmul.msk.bf16.gmra.mxu3 %vm307_vm2, %v1296_v16 }
  0x65   : > { %1183 = vmatmul.msk.bf16.gmra.mxu1 %vm307_vm2, %v1288_v28 }
  0x66   : > { %1269 = vmatmul.msk.bf16.gmra.mxu2 %vm307_vm2, %v1307_v32 }
  0x74   : > { %1160 = vmatmul.msk.bf16.gmra.mxu0 %vm307_vm2, %v1290_v33  ;;  %1192 = vmatmul.msk.bf16.gmra.mxu3 %vm307_vm2, %v1297_v20 }
  0x75   : > { %1184 = vmatmul.msk.bf16.gmra.mxu1 %vm307_vm2, %v1289_v31  ;;  %v1317_v31 = vld [vmem:[%s1393_s29 + $0x88] sm:$0xff] }
  0x76   : > { %1270 = vmatmul.msk.bf16.gmra.mxu2 %vm307_vm2, %v1308_v34  ;;  %v1313_v34 = vld [vmem:[%s1393_s29 + $0x68] sm:$0xff] }
  0x84   : > { %1161 = vmatmul.msk.bf16.gmra.mxu0 %vm307_vm2, %v1291_v35  ;;  %1193 = vmatmul.msk.bf16.gmra.mxu3 %vm307_vm2, %v1298_v23 }
  0x85   : > { %1185 = vmatmul.msk.bf16.gmra.mxu1 %vm307_vm2, %v1290_v33 }
  0x86   : > { %1271 = vmatmul.msk.bf16.gmra.mxu2 %vm307_vm2, %v1309_v36 }
  0x91   : > { %v372_v39 = vpop.f32.mrf.mxu0 }
  0x92   : > { %v477_v41 = vpop.f32.mrf.mxu1 }
  0x93   : > { %v478_v42 = vadd.f32 %v477_v41, %v372_v39 }
  0x94   : > { %1162 = vmatmul.msk.bf16.gmra.mxu0 %vm307_vm2, %v1292_v37  ;;  %1276 = vmatmul.msk.bf16.vlgmr.msra.gmra.mxu3 %vm307_vm2, %v1314_v38 }
  0x95   : > { %1186 = vmatmul.msk.bf16.gmra.mxu1 %vm307_vm2, %v1291_v35 }
  0x96   : > { %1272 = vmatmul.msk.bf16.gmra.mxu2 %vm307_vm2, %v1310_v40 }
  0x97   : > { %v1460_v43 = vpop.f32.mrf.mxu3 }
  0x99   : > { %v737_v44 = vpop.f32.mrf.mxu2  ;;  %v374_v46 = vpop.f32.mrf.mxu0 }
  0x9a   : > { %v817_v45 = vadd.f32 %v737_v44, %v478_v42  ;;  %v479_v47 = vpop.f32.mrf.mxu1 }
  0x9b   : > { %v480_v48 = vadd.f32 %v479_v47, %v374_v46 }
  0x9c   : > { %849 = vst [vmem:[%s1465_s6] sm:$0xff] %v817_v45  ;;  %v919_v57 = vmul.f32 %v817_v45, %v817_v45 }
  0x9f   : > { %v1468_v49 = vpop.f32.mrf.mxu3 }
  0xa1   : > { %v739_v50 = vpop.f32.mrf.mxu2  ;;  %v377_v54 = vpop.f32.mrf.mxu0 }
  0xa2   : > { %v818_v53 = vadd.f32 %v739_v50, %v480_v48  ;;  %v482_v56 = vpop.f32.mrf.mxu1 }
  0xa3   : > { %v483_v61 = vadd.f32 %v482_v56, %v377_v54 }
  0xa4   : > { %850 = vst [vmem:[%s1465_s6 + $0x8] sm:$0xff] %v818_v53  ;;  %v881_v58 = vadd.f32 %v818_v53, %v817_v45  ;;  %v920_v59 = vmul.f32 %v818_v53, %v818_v53  ;;  %1163 = vmatmul.msk.bf16.gmra.mxu0 %vm307_vm2, %v1293_v51  ;;  %1277 = vmatmul.msk.bf16.gmra.mxu3 %vm307_vm2, %v1315_v52 }
  0xa5   : > { %1187 = vmatmul.msk.bf16.gmra.mxu1 %vm307_vm2, %v1292_v37 }
  0xa6   : > { %v951_v60 = vadd.f32 %v920_v59, %v919_v57  ;;  %1273 = vmatmul.msk.bf16.gmra.mxu2 %vm307_vm2, %v1311_v55 }
  0xa7   : > { %v1478_v62 = vpop.f32.mrf.mxu3 }
  0xa9   : > { %v742_v63 = vpop.f32.mrf.mxu2  ;;  %v379_v1 = vpop.f32.mrf.mxu0 }
  0xaa   : > { %v819_v0 = vadd.f32 %v742_v63, %v483_v61  ;;  %v484_v2 = vpop.f32.mrf.mxu1 }
  0xab   : > { %v485_v6 = vadd.f32 %v484_v2, %v379_v1 }
  0xac   : > { %851 = vst [vmem:[%s1465_s6 + $0x10] sm:$0xff] %v819_v0  ;;  %v882_v3 = vadd.f32 %v881_v58, %v819_v0  ;;  %v921_v4 = vmul.f32 %v819_v0, %v819_v0 }
  0xae   : > { %v952_v5 = vadd.f32 %v951_v60, %v921_v4 }
  0xaf   : > { %v1481_v7 = vpop.f32.mrf.mxu3 }
  0xb1   : > { %v744_v8 = vpop.f32.mrf.mxu2  ;;  %v382_v12 = vpop.f32.mrf.mxu0 }
  0xb2   : > { %v820_v11 = vadd.f32 %v744_v8, %v485_v6  ;;  %v487_v14 = vpop.f32.mrf.mxu1 }
  0xb3   : > { %v488_v18 = vadd.f32 %v487_v14, %v382_v12 }
  0xb4   : > { %852 = vst [vmem:[%s1465_s6 + $0x18] sm:$0xff] %v820_v11  ;;  %v883_v15 = vadd.f32 %v882_v3, %v820_v11  ;;  %v922_v16 = vmul.f32 %v820_v11, %v820_v11  ;;  %1164 = vmatmul.msk.bf16.gmra.mxu0 %vm307_vm2, %v1294_v9  ;;  %1278 = vmatmul.msk.bf16.gmra.mxu3 %vm307_vm2, %v1316_v10 }
  0xb5   : > { %1188 = vmatmul.msk.bf16.gmra.mxu1 %vm307_vm2, %v1293_v51 }
  0xb6   : > { %v953_v17 = vadd.f32 %v952_v5, %v922_v16  ;;  %1274 = vmatmul.msk.bf16.gmra.mxu2 %vm307_vm2, %v1312_v13 }
  0xb7   : > { %v1491_v19 = vpop.f32.mrf.mxu3 }
  0xb9   : > { %v747_v20 = vpop.f32.mrf.mxu2  ;;  %v384_v22 = vpop.f32.mrf.mxu0 }
  0xba   : > { %v821_v21 = vadd.f32 %v747_v20, %v488_v18  ;;  %v489_v23 = vpop.f32.mrf.mxu1 }
  0xbb   : > { %v490_v27 = vadd.f32 %v489_v23, %v384_v22 }
  0xbc   : > { %853 = vst [vmem:[%s1465_s6 + $0x20] sm:$0xff] %v821_v21  ;;  %v884_v24 = vadd.f32 %v883_v15, %v821_v21  ;;  %v923_v25 = vmul.f32 %v821_v21, %v821_v21 }
  0xbe   : > { %v954_v26 = vadd.f32 %v953_v17, %v923_v25 }
  0xbf   : > { %v1494_v28 = vpop.f32.mrf.mxu3 }
  0xc1   : > { %v749_v30 = vpop.f32.mrf.mxu2  ;;  %v387_v33 = vpop.f32.mrf.mxu0 }
  0xc2   : > { %v822_v32 = vadd.f32 %v749_v30, %v490_v27  ;;  %v492_v35 = vpop.f32.mrf.mxu1 }
  0xc3   : > { %v493_v39 = vadd.f32 %v492_v35, %v387_v33 }
  0xc4   : > { %854 = vst [vmem:[%s1465_s6 + $0x28] sm:$0xff] %v822_v32  ;;  %v885_v36 = vadd.f32 %v884_v24, %v822_v32  ;;  %v924_v37 = vmul.f32 %v822_v32, %v822_v32  ;;  %1165 = vmatmul.msk.bf16.gmra.mxu0 %vm307_vm2, %v1426_v29  ;;  %1279 = vmatmul.msk.bf16.gmra.mxu3 %vm307_vm2, %v1317_v31 }
  0xc5   : > { %1189 = vmatmul.msk.bf16.gmra.mxu1 %vm307_vm2, %v1294_v9 }
  0xc6   : > { %v955_v38 = vadd.f32 %v954_v26, %v924_v37  ;;  %1275 = vmatmul.msk.bf16.gmra.mxu2 %vm307_vm2, %v1313_v34 }
  0xc7   : > { %v1504_v40 = vpop.f32.mrf.mxu3 }
  0xc9   : > { %v752_v41 = vpop.f32.mrf.mxu2  ;;  %v389_v44 = vpop.f32.mrf.mxu0 }
  0xca   : > { %v823_v42 = vadd.f32 %v752_v41, %v493_v39  ;;  %v494_v45 = vpop.f32.mrf.mxu1 }
  0xcb   : > { %v495_v29 = vadd.f32 %v494_v45, %v389_v44 }
  0xcc   : > { %855 = vst [vmem:[%s1465_s6 + $0x30] sm:$0xff] %v823_v42  ;;  %v886_v46 = vadd.f32 %v885_v36, %v823_v42  ;;  %v925_v47 = vmul.f32 %v823_v42, %v823_v42 }
  0xce   : > { %v956_v48 = vadd.f32 %v955_v38, %v925_v47 }
  0xcf   : > { %v1507_v50 = vpop.f32.mrf.mxu3 }
  0xd1   : > { %v754_v51 = vpop.f32.mrf.mxu2  ;;  %v392_v53 = vpop.f32.mrf.mxu0 }
  0xd2   : > { %v824_v52 = vadd.f32 %v754_v51, %v495_v29  ;;  %v497_v54 = vpop.f32.mrf.mxu1 }
  0xd3   : > { %v498_v58 = vadd.f32 %v497_v54, %v392_v53 }
  0xd4   : > { %856 = vst [vmem:[%s1465_s6 + $0x38] sm:$0xff] %v824_v52  ;;  %v887_v55 = vadd.f32 %v886_v46, %v824_v52  ;;  %v926_v56 = vmul.f32 %v824_v52, %v824_v52 }
  0xd6   : > { %v957_v57 = vadd.f32 %v956_v48, %v926_v56 }
  0xd7   : > { %v1510_v59 = vpop.f32.mrf.mxu3 }
  0xd9   : > { %v757_v60 = vpop.f32.mrf.mxu2  ;;  %v394_v63 = vpop.f32.mrf.mxu0 }
  0xda   : > { %v825_v61 = vadd.f32 %v757_v60, %v498_v58  ;;  %v499_v0 = vpop.f32.mrf.mxu1 }
  0xdb   : > { %v500_v4 = vadd.f32 %v499_v0, %v394_v63 }
  0xdc   : > { %857 = vst [vmem:[%s1465_s6 + $0x40] sm:$0xff] %v825_v61  ;;  %v888_v1 = vadd.f32 %v887_v55, %v825_v61  ;;  %v927_v2 = vmul.f32 %v825_v61, %v825_v61 }
  0xde   : > { %v958_v3 = vadd.f32 %v957_v57, %v927_v2 }
  0xdf   : > { %v1513_v5 = vpop.f32.mrf.mxu3 }
  0xe1   : > { %v759_v6 = vpop.f32.mrf.mxu2  ;;  %v397_v9 = vpop.f32.mrf.mxu0 }
  0xe2   : > { %v826_v8 = vadd.f32 %v759_v6, %v500_v4  ;;  %v502_v10 = vpop.f32.mrf.mxu1  ;;  %v538_v4 = vadd.f32 %v1510_v59, %v1460_v43 }
  0xe3   : > { %v503_v14 = vadd.f32 %v502_v10, %v397_v9 }
  0xe4   : > { %858 = vst [vmem:[%s1465_s6 + $0x48] sm:$0xff] %v826_v8  ;;  %v889_v11 = vadd.f32 %v888_v1, %v826_v8  ;;  %v928_v12 = vmul.f32 %v826_v8, %v826_v8 }
  0xe6   : > { %v959_v13 = vadd.f32 %v958_v3, %v928_v12 }
  0xe7   : > { %v1516_v15 = vpop.f32.mrf.mxu3 }
  0xe9   : > { %v762_v16 = vpop.f32.mrf.mxu2  ;;  %v399_v18 = vpop.f32.mrf.mxu0 }
  0xea   : > { %v827_v17 = vadd.f32 %v762_v16, %v503_v14  ;;  %v504_v20 = vpop.f32.mrf.mxu1 }
  0xeb   : > { %v505_v24 = vadd.f32 %v504_v20, %v399_v18 }
  0xec   : > { %859 = vst [vmem:[%s1465_s6 + $0x50] sm:$0xff] %v827_v17  ;;  %v890_v21 = vadd.f32 %v889_v11, %v827_v17  ;;  %v929_v22 = vmul.f32 %v827_v17, %v827_v17 }
  0xee   : > { %v960_v23 = vadd.f32 %v959_v13, %v929_v22  ;;  %v540_v13 = vadd.f32 %v1513_v5, %v1468_v49  ;;  %v543_v22 = vadd.f32 %v1516_v15, %v1478_v62 }
  0xef   : > { %v1519_v25 = vpop.f32.mrf.mxu3 }
  0xf1   : > { %v764_v26 = vpop.f32.mrf.mxu2  ;;  %v402_v30 = vpop.f32.mrf.mxu0 }
  0xf2   : > { %v828_v27 = vadd.f32 %v764_v26, %v505_v24  ;;  %v507_v31 = vpop.f32.mrf.mxu1 }
  0xf3   : > { %v508_v35 = vadd.f32 %v507_v31, %v402_v30  ;;  %v545_v30 = vadd.f32 %v1519_v25, %v1481_v7 }
  0xf4   : > { %860 = vst [vmem:[%s1465_s6 + $0x58] sm:$0xff] %v828_v27  ;;  %v891_v32 = vadd.f32 %v890_v21, %v828_v27  ;;  %v930_v33 = vmul.f32 %v828_v27, %v828_v27 }
  0xf6   : > { %v961_v34 = vadd.f32 %v960_v23, %v930_v33 }
  0xf7   : > { %v1522_v36 = vpop.f32.mrf.mxu3 }
  0xf9   : > { %v767_v37 = vpop.f32.mrf.mxu2  ;;  %v404_v39 = vpop.f32.mrf.mxu0 }
  0xfa   : > { %v829_v38 = vadd.f32 %v767_v37, %v508_v35  ;;  %v509_v41 = vpop.f32.mrf.mxu1 }
  0xfb   : > { %v510_v46 = vadd.f32 %v509_v41, %v404_v39 }
  0xfc   : > { %861 = vst [vmem:[%s1465_s6 + $0x60] sm:$0xff] %v829_v38  ;;  %v1525_v42 = vadd.f32 %v891_v32, %v829_v38  ;;  %v931_v44 = vmul.f32 %v829_v38, %v829_v38  ;;  %v548_v38 = vadd.f32 %v1522_v36, %v1491_v19 }
  0xfe   : > { %v1527_v45 = vadd.f32 %v961_v34, %v931_v44 }
  0xff   : > { %v1529_v47 = vpop.f32.mrf.mxu3 }
 0x101   : > { %v769_v48 = vpop.f32.mrf.mxu2  ;;  %v407_v51 = vpop.f32.mrf.mxu0 }
 0x102   : > { %v1531_v29 = vadd.f32 %v769_v48, %v510_v46  ;;  %v512_v52 = vpop.f32.mrf.mxu1 }
 0x103   : > { %v513_v53 = vadd.f32 %v512_v52, %v407_v51  ;;  %v550_v51 = vadd.f32 %v1529_v47, %v1494_v28 }
 0x104   : > { %862 = vst [vmem:[%s1465_s6 + $0x68] sm:$0xff] %v1531_v29  ;;  %v932_v48 = vmul.f32 %v1531_v29, %v1531_v29  ;;  %v893_v19 = vadd.f32 %v1525_v42, %v1531_v29 }
 0x107   : > { %v1535_v54 = vpop.f32.mrf.mxu3 }
 0x109   : > { %v772_v55 = vpop.f32.mrf.mxu2  ;;  %v409_v57 = vpop.f32.mrf.mxu0 }
 0x10a   : > { %v1537_v56 = vadd.f32 %v772_v55, %v513_v53  ;;  %v514_v58 = vpop.f32.mrf.mxu1 }
 0x10b   : > { %v515_v60 = vadd.f32 %v514_v58, %v409_v57  ;;  %v963_v58 = vadd.f32 %v1527_v45, %v932_v48 }
 0x10c   : > { %863 = vst [vmem:[%s1465_s6 + $0x70] sm:$0xff] %v1537_v56  ;;  %v933_v36 = vmul.f32 %v1537_v56, %v1537_v56 }
 0x10e   : > { %v964_v29 = vadd.f32 %v963_v58, %v933_v36 }
 0x10f   : > { %v1541_v61 = vpop.f32.mrf.mxu3 }
 0x111   : > { %v774_v63 = vpop.f32.mrf.mxu2  ;;  %v412_v1 = vpop.f32.mrf.mxu0 }
 0x112   : > { %v1543_v0 = vadd.f32 %v774_v63, %v515_v60  ;;  %v517_v2 = vpop.f32.mrf.mxu1  ;;  %v894_v60 = vadd.f32 %v893_v19, %v1537_v56 }
 0x113   : > { %v518_v3 = vadd.f32 %v517_v2, %v412_v1 }
 0x114   : > { %864 = vst [vmem:[%s1465_s6 + $0x78] sm:$0xff] %v1543_v0  ;;  %v934_v63 = vmul.f32 %v1543_v0, %v1543_v0  ;;  %v895_v1 = vadd.f32 %v894_v60, %v1543_v0 }
 0x117   : > { %v797_v6 = vpop.f32.mrf.mxu3 }
 0x118   : > { %v1549_v9 = vadd.f32 %v797_v6, %v538_v4  ;;  %v553_v6 = vadd.f32 %v1535_v54, %v1504_v40 }
 0x119   : > { %v777_v8 = vpop.f32.mrf.mxu2  ;;  %v414_v11 = vpop.f32.mrf.mxu0 }
 0x11a   : > { %v1551_v10 = vadd.f32 %v777_v8, %v518_v3  ;;  %873 = vst [vmem:[%s1465_s6 + $0xc0] sm:$0xff] %v1549_v9  ;;  %v519_v12 = vpop.f32.mrf.mxu1  ;;  %v965_v3 = vadd.f32 %v964_v29, %v934_v63 }
 0x11b   : > { %v520_v14 = vadd.f32 %v519_v12, %v414_v11 }
 0x11c   : > { %865 = vst [vmem:[%s1465_s6 + $0x80] sm:$0xff] %v1551_v10  ;;  %v935_v2 = vmul.f32 %v1551_v10, %v1551_v10  ;;  %v896_v45 = vadd.f32 %v895_v1, %v1551_v10 }
 0x11e   : > { %v966_v8 = vadd.f32 %v965_v3, %v935_v2 }
 0x11f   : > { %v799_v43 = vpop.f32.mrf.mxu3 }
 0x120   : > { %v1559_v16 = vadd.f32 %v799_v43, %v540_v13 }
 0x121   : > { %v779_v59 = vpop.f32.mrf.mxu2  ;;  %v417_v18 = vpop.f32.mrf.mxu0 }
 0x122   : > { %v834_v17 = vadd.f32 %v779_v59, %v520_v14  ;;  %874 = vst [vmem:[%s1465_s6 + $0xc8] sm:$0xff] %v1559_v16  ;;  %v522_v20 = vpop.f32.mrf.mxu1 }
 0x123   : > { %v523_v21 = vadd.f32 %v522_v20, %v417_v18 }
 0x124   : > { %866 = vst [vmem:[%s1465_s6 + $0x88] sm:$0xff] %v834_v17  ;;  %v936_v56 = vmul.f32 %v834_v17, %v834_v17  ;;  %v897_v11 = vadd.f32 %v896_v45, %v834_v17  ;;  %v555_v17 = vadd.f32 %v1541_v61, %v1507_v50 }
 0x126   : > { %v967_v43 = vadd.f32 %v966_v8, %v936_v56 }
 0x127   : > { %v802_v23 = vpop.f32.mrf.mxu3 }
 0x128   : > { %v1566_v5 = vadd.f32 %v802_v23, %v543_v22 }
 0x129   : > { %v782_v49 = vpop.f32.mrf.mxu2  ;;  %v419_v26 = vpop.f32.mrf.mxu0 }
 0x12a   : > { %v835_v24 = vadd.f32 %v782_v49, %v523_v21  ;;  %875 = vst [vmem:[%s1465_s6 + $0xd0] sm:$0xff] %v1566_v5  ;;  %v524_v27 = vpop.f32.mrf.mxu1 }
 0x12b   : > { %v525_v31 = vadd.f32 %v524_v27, %v419_v26 }
 0x12c   : > { %867 = vst [vmem:[%s1465_s6 + $0x90] sm:$0xff] %v835_v24  ;;  %v937_v12 = vmul.f32 %v835_v24, %v835_v24  ;;  %v898_v59 = vadd.f32 %v897_v11, %v835_v24 }
 0x12e   : > { %v968_v21 = vadd.f32 %v967_v43, %v937_v12 }
 0x12f   : > { %v804_v32 = vpop.f32.mrf.mxu3 }
 0x130   : > { %v1573_v62 = vadd.f32 %v804_v32, %v545_v30 }
 0x131   : > { %v784_v33 = vpop.f32.mrf.mxu2  ;;  %v422_v34 = vpop.f32.mrf.mxu0 }
 0x132   : > { %v836_v15 = vadd.f32 %v784_v33, %v525_v31  ;;  %876 = vst [vmem:[%s1465_s6 + $0xd8] sm:$0xff] %v1573_v62  ;;  %v527_v35 = vpop.f32.mrf.mxu1 }
 0x133   : > { %v528_v37 = vadd.f32 %v527_v35, %v422_v34 }
 0x134   : > { %868 = vst [vmem:[%s1465_s6 + $0x98] sm:$0xff] %v836_v15  ;;  %v938_v18 = vmul.f32 %v836_v15, %v836_v15  ;;  %v899_v22 = vadd.f32 %v898_v59, %v836_v15 }
 0x136   : > { %v969_v26 = vadd.f32 %v968_v21, %v938_v18 }
 0x137   : > { %v807_v39 = vpop.f32.mrf.mxu3 }
 0x138   : > { %v1580_v7 = vadd.f32 %v807_v39, %v548_v38 }
 0x139   : > { %v787_v41 = vpop.f32.mrf.mxu2  ;;  %v424_v44 = vpop.f32.mrf.mxu0 }
 0x13a   : > { %v837_v25 = vadd.f32 %v787_v41, %v528_v37  ;;  %877 = vst [vmem:[%s1465_s6 + $0xe0] sm:$0xff] %v1580_v7  ;;  %v529_v46 = vpop.f32.mrf.mxu1 }
 0x13b   : > { %v530_v52 = vadd.f32 %v529_v46, %v424_v44  ;;  %v944_v44 = vmul.f32 %v1559_v16, %v1559_v16 }
 0x13c   : > { %869 = vst [vmem:[%s1465_s6 + $0xa0] sm:$0xff] %v837_v25  ;;  %v939_v10 = vmul.f32 %v837_v25, %v837_v25  ;;  %v900_v40 = vadd.f32 %v899_v22, %v837_v25  ;;  %v943_v25 = vmul.f32 %v1549_v9, %v1549_v9 }
 0x13e   : > { %v970_v27 = vadd.f32 %v969_v26, %v939_v10 }
 0x13f   : > { %v809_v53 = vpop.f32.mrf.mxu3 }
 0x140   : > { %v1593_v57 = vadd.f32 %v809_v53, %v550_v51  ;;  %v945_v51 = vmul.f32 %v1566_v5, %v1566_v5 }
 0x141   : > { %v789_v55 = vpop.f32.mrf.mxu2  ;;  %v427_v42 = vpop.f32.mrf.mxu0 }
 0x142   : > { %v838_v28 = vadd.f32 %v789_v55, %v530_v52  ;;  %878 = vst [vmem:[%s1465_s6 + $0xe8] sm:$0xff] %v1593_v57  ;;  %v532_v47 = vpop.f32.mrf.mxu1  ;;  %v946_v52 = vmul.f32 %v1573_v62, %v1573_v62 }
 0x143   : > { %v533_v4 = vadd.f32 %v532_v47, %v427_v42 }
 0x144   : > { %870 = vst [vmem:[%s1465_s6 + $0xa8] sm:$0xff] %v838_v28  ;;  %v940_v54 = vmul.f32 %v838_v28, %v838_v28  ;;  %v901_v30 = vadd.f32 %v900_v40, %v838_v28 }
 0x146   : > { %v971_v15 = vadd.f32 %v970_v27, %v940_v54 }
 0x147   : > { %v812_v13 = vpop.f32.mrf.mxu3 }
 0x148   : > { %v847_v0 = vadd.f32 %v812_v13, %v553_v6 }
 0x149   : > { %v792_v14 = vpop.f32.mrf.mxu2  ;;  %v429_v23 = vpop.f32.mrf.mxu0 }
 0x14a   : > { %v839_v20 = vadd.f32 %v792_v14, %v533_v4  ;;  %879 = vst [vmem:[%s1465_s6 + $0xf0] sm:$0xff] %v847_v0  ;;  %v534_v49 = vpop.f32.mrf.mxu1  ;;  %v949_v28 = vmul.f32 %v847_v0, %v847_v0 }
 0x14b   : > { %v535_v31 = vadd.f32 %v534_v49, %v429_v23 }
 0x14c   : > { %871 = vst [vmem:[%s1465_s6 + $0xb0] sm:$0xff] %v839_v20  ;;  %v941_v24 = vmul.f32 %v839_v20, %v839_v20  ;;  %v902_v35 = vadd.f32 %v901_v30, %v839_v20 }
 0x14e   : > { %v972_v38 = vadd.f32 %v971_v15, %v941_v24 }
 0x14f   : > { %v814_v32 = vpop.f32.mrf.mxu3 }
 0x150   : > { %v848_v34 = vadd.f32 %v814_v32, %v555_v17 }
 0x151   : > { %v794_v33 = vpop.f32.mrf.mxu2 }
 0x152   : > { %v840_v37 = vadd.f32 %v794_v33, %v535_v31  ;;  %880 = vst [vmem:[%s1465_s6 + $0xf8] sm:$0xff] %v848_v34  ;;  %v950_v1 = vmul.f32 %v848_v34, %v848_v34 }
 0x154   : > { %872 = vst [vmem:[%s1465_s6 + $0xb8] sm:$0xff] %v840_v37  ;;  %v903_v39 = vadd.f32 %v902_v35, %v840_v37  ;;  %v942_v41 = vmul.f32 %v840_v37, %v840_v37 }
 0x156   : > { %v904_v50 = vadd.f32 %v903_v39, %v1549_v9  ;;  %v973_v61 = vadd.f32 %v972_v38, %v942_v41  ;;  %v947_v9 = vmul.f32 %v1580_v7, %v1580_v7 }
 0x158   : > { %v905_v46 = vadd.f32 %v904_v50, %v1559_v16  ;;  %v974_v48 = vadd.f32 %v973_v61, %v943_v25  ;;  %v948_v16 = vmul.f32 %v1593_v57, %v1593_v57 }
 0x15a   : > { %v906_v19 = vadd.f32 %v905_v46, %v1566_v5  ;;  %v975_v36 = vadd.f32 %v974_v48, %v944_v44 }
 0x15c   : > { %v976_v53 = vadd.f32 %v975_v36, %v945_v51  ;;  %v907_v55 = vadd.f32 %v906_v19, %v1573_v62 }
 0x15e   : > { %v908_v58 = vadd.f32 %v907_v55, %v1580_v7  ;;  %v977_v60 = vadd.f32 %v976_v53, %v946_v52 }
 0x160   : > { %v909_v63 = vadd.f32 %v908_v58, %v1593_v57  ;;  %v978_v5 = vadd.f32 %v977_v60, %v947_v9 }
 0x162   : > { %v910_v42 = vadd.f32 %v909_v63, %v847_v0  ;;  %v979_v47 = vadd.f32 %v978_v5, %v948_v16 }
 0x164   : > { %v911_v29 = vadd.f32 %v910_v42, %v848_v34  ;;  %v980_v2 = vadd.f32 %v979_v47, %v949_v28 }
 0x166   : > { %v912_v62 = vrot.slane %v911_v29, 4  ;;  %v981_v3 = vadd.f32 %v980_v2, %v950_v1 }
 0x168   : > { %v913_v45 = vadd.f32 %v912_v62, %v911_v29  ;;  %v982_v56 = vrot.slane %v981_v3, 4 }
 0x16a   : > { %v914_v4 = vrot.slane %v913_v45, 2  ;;  %v983_v7 = vadd.f32 %v982_v56, %v981_v3 }
 0x16c   : > { %v915_v6 = vadd.f32 %v914_v4, %v913_v45  ;;  %v984_v8 = vrot.slane %v983_v7, 2 }
 0x16e   : > { %v916_v11 = vrot.slane %v915_v6, 1  ;;  %v985_v12 = vadd.f32 %v984_v8, %v983_v7 }
 0x170   : > { %v917_v57 = vadd.f32 %v916_v11, %v915_v6  ;;  %v986_v13 = vrot.slane %v985_v12, 1 }
 0x172   : > { %918 = vst [vmem:[%s181_s10] sm:$0x1] %v917_v57  ;;  %v987_v14 = vadd.f32 %v986_v13, %v985_v12 }
 0x174   : > { %988 = vst [vmem:[%s181_s10 + $0x1] sm:$0x1] %v987_v14 }
 0x175 PF: > { %s14_s12 = sadd.s32 1, %s1338_s12  }
 0x176   : > { %p11_p4 = scmp.ge.s32.totalorder %s14_s12, 4  }
 0x178   :  { %13 = sbr.rel (!%p11_p4) target bundleno = 1 (0x1), region = 72 }

// kernel: gconvnet_forward.11
= control target key start
LH: loop header
LB: loop body
LE: loop exit
PB: predicated region body
PF: predicated region fallthrough
CT: control target
= control target key end

     0   :  { %s902_s12 = smov 0   ;;  %s1003_s0 = inlined_call_operand.vmem [shape: bf16[2,80,96], index: 0, kind: input, shape index: {}]   ;;  %s1004_s1 = inlined_call_operand.vmem [shape: bf16[3,96,128], index: 1, kind: input, shape index: {}]   ;;  %s1005_s2 = inlined_call_operand.vmem [shape: f32[2,64,128], index: 2, kind: output, shape index: {0}]   ;;  %s1006_s3 = inlined_call_operand.vmem [shape: f32[2,2,128], index: 3, kind: output, shape index: {1}]  }
   0x1 LB: > { %s654_s13 = sadd.s32 4294967295, %s880_s12   ;;  %p658_p0 = scmp.ge.s32.totalorder %s880_s12, 1  ;;  %s880_s12 = sphi %s902_s12, %s14_s12  }
   0x2   : > { %p140_p1 = scmp.lt.s32.totalorder %s880_s12, 3 }
   0x4   : > { %p141_p2 = pnand %p658_p0, %p140_p1 }
   0x5   : > { %p168_p3 = scmp.lt.s32.totalorder (!%p141_p2), %s654_s13, 1 }
   0x6   : > { %144 = sbr.rel (%p141_p2) target bundleno = 243 (0xf3), region = 28 }
   0xb   : > { %v801_v0 = vld [vmem:[%s1004_s1 + $0x58] sm:$0xff]  ;;  %v795_v1 = vld [vmem:[%s1004_s1 + $0x28] sm:$0xff]  ;;  %v800_v3 = vld [vmem:[%s1004_s1 + $0x50] sm:$0xff]  ;;  %s1008_s13 = smov (!%p168_p3, %s654_s13), 1  ;;  %vm273_vm0 = vcmask 785408  }
   0xc   : > { %v811_v2 = vld [vmem:[%s1004_s1 + $0x88] sm:$0xff]  ;;  %288 = vmatpush.bf16.msra.mxu0 %v801_v0  ;;  %371 = vmatpush.bf16.msra.mxu1 %v795_v1  ;;  %v794_v4 = vld [vmem:[%s1004_s1 + $0x20] sm:$0xff]  ;;  %v793_v7 = vld [vmem:[%s1004_s1 + $0x18] sm:$0xff]  ;;  %s865_s17 = smul.u32 40, %s1008_s13  ;;  %s789_s29 = sshll.u32 %s1008_s13, 6 }
   0xd   : > { %489 = vmatpush.bf16.msra.mxu2 %v811_v2  ;;  %v810_v5 = vld [vmem:[%s1004_s1 + $0x80] sm:$0xff]  ;;  %851 = vmatpush.bf16.msra.mxu3 %v801_v0  ;;  %v799_v6 = vld [vmem:[%s1004_s1 + $0x48] sm:$0xff]  ;;  %v809_v8 = vld [vmem:[%s1004_s1 + $0x78] sm:$0xff]  ;;  %s986_s5 = scalar_lea.vmem %s1005_s2, %s789_s29  ;;  %s662_s6 = sshll.u32 %s1008_s13, 1 }
   0xe   : > { %v798_v9 = vld [vmem:[%s1004_s1 + $0x40] sm:$0xff]  ;;  %v792_v10 = vld [vmem:[%s1004_s1 + $0x10] sm:$0xff]  ;;  %v797_v12 = vld [vmem:[%s1004_s1 + $0x38] sm:$0xff]  ;;  %s172_s26 = scalar_lea.vmem %s1003_s0, %s865_s17  ;;  %s181_s9 = scalar_lea.vmem %s1006_s3, %s662_s6 }
   0xf   : > { %v808_v11 = vld [vmem:[%s1004_s1 + $0x70] sm:$0xff]  ;;  %v791_v13 = vld [vmem:[%s1004_s1 + $0x8] sm:$0xff]  ;;  %v790_v16 = vld [vmem:[%s1004_s1] sm:$0xff] }
  0x10   : > { %289 = vmatpush.bf16.msra.mxu0 %v800_v3  ;;  %372 = vmatpush.bf16.msra.mxu1 %v794_v4  ;;  %v807_v14 = vld [vmem:[%s1004_s1 + $0x68] sm:$0xff]  ;;  %v796_v15 = vld [vmem:[%s1004_s1 + $0x30] sm:$0xff]  ;;  %v806_v17 = vld [vmem:[%s1004_s1 + $0x60] sm:$0xff] }
  0x11   : > { %490 = vmatpush.bf16.msra.mxu2 %v810_v5  ;;  %852 = vmatpush.bf16.msra.mxu3 %v800_v3  ;;  %v859_v18 = vld [vmem:[%s172_s26 + $0x4] sm:$0xff]   ;;  %v861_v21 = vld [vmem:[%s172_s26 + $0xc] sm:$0xff]   ;;  %v863_v24 = vld [vmem:[%s172_s26 + $0x14] sm:$0xff]  }
  0x12   : > { %v813_v19 = vld [vmem:[%s172_s26] sm:$0xff]   ;;  %v802_v20 = vld [vmem:[%s172_s26 + $0x8] sm:$0xff]  ;;  %v803_v23 = vld [vmem:[%s172_s26 + $0x10] sm:$0xff] }
  0x13   : > { %v828_v22 = vld [vmem:[%s172_s26 + $0x8] sm:$0xff]   ;;  %v829_v25 = vld [vmem:[%s172_s26 + $0x10] sm:$0xff]   ;;  %v804_v26 = vld [vmem:[%s172_s26 + $0x18] sm:$0xff] }
  0x14   : > { %290 = vmatpush.bf16.msra.mxu0 %v799_v6  ;;  %373 = vmatpush.bf16.msra.mxu1 %v793_v7  ;;  %v864_v27 = vld [vmem:[%s172_s26 + $0x1c] sm:$0xff] }
  0x15   : > { %491 = vmatpush.bf16.msra.mxu2 %v809_v8  ;;  %853 = vmatpush.bf16.msra.mxu3 %v799_v6  ;;  %v830_v28 = vld [vmem:[%s172_s26 + $0x18] sm:$0xff]   ;;  %v805_v29 = vld [vmem:[%s172_s26 + $0x20] sm:$0xff] }
  0x18   : > { %291 = vmatpush.bf16.msra.mxu0 %v798_v9  ;;  %374 = vmatpush.bf16.msra.mxu1 %v792_v10 }
  0x19   : > { %492 = vmatpush.bf16.msra.mxu2 %v808_v11  ;;  %854 = vmatpush.bf16.msra.mxu3 %v798_v9 }
  0x1c   : > { %292 = vmatpush.bf16.msra.mxu0 %v797_v12  ;;  %375 = vmatpush.bf16.msra.mxu1 %v791_v13 }
  0x1d   : > { %493 = vmatpush.bf16.msra.mxu2 %v807_v14  ;;  %855 = vmatpush.bf16.msra.mxu3 %v797_v12 }
  0x20   : > { %293 = vmatpush.bf16.msra.mxu0 %v796_v15  ;;  %376 = vmatpush.bf16.msra.mxu1 %v790_v16 }
  0x21   : > { %494 = vmatpush.bf16.msra.mxu2 %v806_v17  ;;  %856 = vmatpush.bf16.msra.mxu3 %v796_v15 }
  0x23   : > { %699 = vmatmul.msk.bf16.vlgmr.msra.gmra.mxu0 %vm273_vm0, %v859_v18  ;;  %727 = vmatmul.msk.bf16.vlgmr.msra.gmra.mxu1 %vm273_vm0, %v813_v19 }
  0x24   : > { %783 = vmatmul.msk.bf16.vlgmr.msra.gmra.mxu2 %vm273_vm0, %v802_v20  ;;  %700 = vmatmul.msk.bf16.vlgmr.msra.gmra.mxu3 %vm273_vm0, %v861_v21 }
  0x33   : > { %728 = vmatmul.msk.bf16.gmra.mxu1 %vm273_vm0, %v828_v22 }
  0x34   : > { %784 = vmatmul.msk.bf16.gmra.mxu2 %vm273_vm0, %v803_v23  ;;  %701 = vmatmul.msk.bf16.gmra.mxu3 %vm273_vm0, %v863_v24 }
  0x43   : > { %729 = vmatmul.msk.bf16.gmra.mxu1 %vm273_vm0, %v829_v25 }
  0x44   : > { %785 = vmatmul.msk.bf16.gmra.mxu2 %vm273_vm0, %v804_v26  ;;  %702 = vmatmul.msk.bf16.gmra.mxu3 %vm273_vm0, %v864_v27 }
  0x53   : > { %730 = vmatmul.msk.bf16.gmra.mxu1 %vm273_vm0, %v830_v28 }
  0x54   : > { %786 = vmatmul.msk.bf16.gmra.mxu2 %vm273_vm0, %v805_v29 }
  0xa0   : > { %v378_v30 = vpop.f32.mrf.mxu1  ;;  %v295_v31 = vpop.f32.mrf.mxu0 }
  0xa1   : > { %v379_v32 = vadd.f32 %v378_v30, %v295_v31 }
  0xa7   : > { %v496_v33 = vpop.f32.mrf.mxu2  ;;  %v300_v37 = vpop.f32.mrf.mxu3 }
  0xa8   : > { %v516_v34 = vadd.f32 %v496_v33, %v379_v32  ;;  %v380_v35 = vpop.f32.mrf.mxu1  ;;  %v297_v36 = vpop.f32.mrf.mxu0 }
  0xa9   : > { %v381_v38 = vadd.f32 %v380_v35, %v297_v36 }
  0xaa   : > { %524 = vst [vmem:[%s986_s5] sm:$0xff] %v516_v34  ;;  %v546_v0 = vmul.f32 %v516_v34, %v516_v34 }
  0xaf   : > { %v498_v39 = vpop.f32.mrf.mxu2  ;;  %v302_v43 = vpop.f32.mrf.mxu3 }
  0xb0   : > { %v517_v40 = vadd.f32 %v498_v39, %v381_v38  ;;  %v383_v41 = vpop.f32.mrf.mxu1 }
  0xb1   : > { %v384_v42 = vadd.f32 %v383_v41, %v300_v37 }
  0xb2   : > { %525 = vst [vmem:[%s986_s5 + $0x8] sm:$0xff] %v517_v40  ;;  %v547_v62 = vmul.f32 %v517_v40, %v517_v40  ;;  %v532_v1 = vadd.f32 %v517_v40, %v516_v34 }
  0xb4   : > { %v554_v4 = vadd.f32 %v547_v62, %v546_v0 }
  0xb7   : > { %v501_v44 = vpop.f32.mrf.mxu2  ;;  %v305_v48 = vpop.f32.mrf.mxu3 }
  0xb8   : > { %v518_v45 = vadd.f32 %v501_v44, %v384_v42  ;;  %v385_v46 = vpop.f32.mrf.mxu1 }
  0xb9   : > { %v386_v47 = vadd.f32 %v385_v46, %v302_v43 }
  0xba   : > { %526 = vst [vmem:[%s986_s5 + $0x10] sm:$0xff] %v518_v45  ;;  %v548_v2 = vmul.f32 %v518_v45, %v518_v45  ;;  %v533_v5 = vadd.f32 %v532_v1, %v518_v45 }
  0xbc   : > { %v555_v8 = vadd.f32 %v554_v4, %v548_v2 }
  0xbf   : > { %v503_v49 = vpop.f32.mrf.mxu2  ;;  %v307_v56 = vpop.f32.mrf.mxu3 }
  0xc0   : > { %v519_v50 = vadd.f32 %v503_v49, %v386_v47  ;;  %v388_v51 = vpop.f32.mrf.mxu1 }
  0xc1   : > { %v389_v52 = vadd.f32 %v388_v51, %v305_v48 }
  0xc2   : > { %527 = vst [vmem:[%s986_s5 + $0x18] sm:$0xff] %v519_v50  ;;  %v549_v6 = vmul.f32 %v519_v50, %v519_v50  ;;  %v534_v9 = vadd.f32 %v533_v5, %v519_v50 }
  0xc4   : > { %v556_v12 = vadd.f32 %v555_v8, %v549_v6 }
  0xc7   : > { %v506_v53 = vpop.f32.mrf.mxu2  ;;  %v310_v61 = vpop.f32.mrf.mxu3 }
  0xc8   : > { %v520_v54 = vadd.f32 %v506_v53, %v389_v52  ;;  %v390_v55 = vpop.f32.mrf.mxu1 }
  0xc9   : > { %v391_v57 = vadd.f32 %v390_v55, %v307_v56 }
  0xca   : > { %528 = vst [vmem:[%s986_s5 + $0x20] sm:$0xff] %v520_v54  ;;  %v550_v10 = vmul.f32 %v520_v54, %v520_v54  ;;  %v535_v13 = vadd.f32 %v534_v9, %v520_v54 }
  0xcc   : > { %v557_v16 = vadd.f32 %v556_v12, %v550_v10 }
  0xcf   : > { %v508_v58 = vpop.f32.mrf.mxu2  ;;  %v312_v15 = vpop.f32.mrf.mxu3 }
  0xd0   : > { %v521_v59 = vadd.f32 %v508_v58, %v391_v57  ;;  %v393_v60 = vpop.f32.mrf.mxu1 }
  0xd1   : > { %v394_v63 = vadd.f32 %v393_v60, %v310_v61 }
  0xd2   : > { %529 = vst [vmem:[%s986_s5 + $0x28] sm:$0xff] %v521_v59  ;;  %v551_v14 = vmul.f32 %v521_v59, %v521_v59  ;;  %v536_v17 = vadd.f32 %v535_v13, %v521_v59 }
  0xd4   : > { %v558_v21 = vadd.f32 %v557_v16, %v551_v14 }
  0xd7   : > { %v511_v3 = vpop.f32.mrf.mxu2 }
  0xd8   : > { %v522_v7 = vadd.f32 %v511_v3, %v394_v63  ;;  %v395_v11 = vpop.f32.mrf.mxu1 }
  0xd9   : > { %v396_v19 = vadd.f32 %v395_v11, %v312_v15 }
  0xda   : > { %530 = vst [vmem:[%s986_s5 + $0x30] sm:$0xff] %v522_v7  ;;  %v552_v18 = vmul.f32 %v522_v7, %v522_v7  ;;  %v537_v22 = vadd.f32 %v536_v17, %v522_v7 }
  0xdc   : > { %v559_v24 = vadd.f32 %v558_v21, %v552_v18 }
  0xdf   : > { %v513_v20 = vpop.f32.mrf.mxu2 }
  0xe0   : > { %v523_v23 = vadd.f32 %v513_v20, %v396_v19 }
  0xe2   : > { %531 = vst [vmem:[%s986_s5 + $0x38] sm:$0xff] %v523_v23  ;;  %v538_v25 = vadd.f32 %v537_v22, %v523_v23  ;;  %v553_v26 = vmul.f32 %v523_v23, %v523_v23 }
  0xe4   : > { %v539_v27 = vrot.slane %v538_v25, 4  ;;  %v560_v28 = vadd.f32 %v559_v24, %v553_v26 }
  0xe6   : > { %v540_v29 = vadd.f32 %v539_v27, %v538_v25  ;;  %v561_v30 = vrot.slane %v560_v28, 4 }
  0xe8   : > { %v541_v31 = vrot.slane %v540_v29, 2  ;;  %v562_v32 = vadd.f32 %v561_v30, %v560_v28 }
  0xea   : > { %v542_v33 = vadd.f32 %v541_v31, %v540_v29  ;;  %v563_v34 = vrot.slane %v562_v32, 2 }
  0xec   : > { %v543_v35 = vrot.slane %v542_v33, 1  ;;  %v564_v36 = vadd.f32 %v563_v34, %v562_v32 }
  0xee   : > { %v544_v37 = vadd.f32 %v543_v35, %v542_v33  ;;  %v565_v38 = vrot.slane %v564_v36, 1 }
  0xf0   : > { %545 = vst [vmem:[%s181_s9] sm:$0x1] %v544_v37  ;;  %v566_v39 = vadd.f32 %v565_v38, %v564_v36 }
  0xf2   : > { %567 = vst [vmem:[%s181_s9 + $0x1] sm:$0x1] %v566_v39 }
  0xf3 PF: > { %s14_s12 = sadd.s32 1, %s880_s12  }
  0xf4   : > { %p11_p4 = scmp.ge.s32.totalorder %s14_s12, 4  }
  0xf6   :  { %13 = sbr.rel (!%p11_p4) target bundleno = 1 (0x1), region = 72 }

// kernel: gconvnet_forward.12
= control target key start
LH: loop header
LB: loop body
LE: loop exit
PB: predicated region body
PF: predicated region fallthrough
CT: control target
= control target key end

     0   :  { %s421_s15 = smov 0   ;;  %s456_s0 = inlined_call_operand.vmem [shape: f32[8,2,4,256], index: 0, kind: input, shape index: {}]   ;;  %s457_s1 = inlined_call_operand.vmem [shape: f32[2,2,128], index: 1, kind: input, shape index: {}]   ;;  %s458_s2 = inlined_call_operand.vmem [shape: f32[1,128], index: 2, kind: input, shape index: {}]   ;;  %s459_s3 = inlined_call_operand.vmem [shape: f32[1,128], index: 3, kind: input, shape index: {}]   ;;  %s460_s4 = inlined_call_operand.vmem [shape: bf16[8,4,128], index: 4, kind: output, shape index: {}]  }
   0x1 LB: > { %s365_s16 = sadd.s32 4294967295, %s394_s15   ;;  %p369_p0 = scmp.ge.s32.totalorder %s394_s15, 1  ;;  %s394_s15 = sphi %s421_s15, %s14_s15  }
   0x2   : > { %p164_p1 = scmp.lt.s32.totalorder %s394_s15, 3 }
   0x4   : > { %p165_p2 = pnand %p369_p0, %p164_p1 }
   0x5   : > { %s370_s21 = sshll.u32 (!%p165_p2), %s365_s16, 2 }
   0x6   : > { %168 = sbr.rel (%p165_p2) target bundleno = 80 (0x50), region = 36  ;;  %p192_p3 = scmp.lt.s32.totalorder (!%p165_p2), %s370_s21, 7 }
   0xb   : > { %v204_v0 = vld [vmem:[%s457_s1] sm:$0x3]  ;;  %v205_v1 = vld [vmem:[%s457_s1 + $0x2] sm:$0x3]  ;;  %vm206_vm0 = vcmask 1041408   ;;  %s462_s21 = smov (!%p192_p3, %s370_s21), 7 }
   0xc   : > { %v207_v2 = vsel %vm206_vm0, %v204_v0, 0.0  ;;  %v208_v3 = vsel %vm206_vm0, %v205_v1, 0.0  ;;  %v217_v18 = vld [vmem:[%s458_s2] sm:$0x1]  ;;  %s377_s24 = sshll.u32 %s462_s21, 4  ;;  %vm249_vm4 = vcmask 1043456  }
   0xd   : > { %v209_v4 = vadd.f32 %v208_v3, %v207_v2  ;;  %v235_v21 = vld [vmem:[%s459_s3] sm:$0x1]  ;;  %s196_s29 = scalar_lea.vmem %s456_s0, %s377_s24  ;;  %s374_s30 = sshll.u32 %s462_s21, 1 }
   0xe   : > { %v238_v26 = vld [vmem:[%s196_s29] sm:$0xff]  ;;  %v239_v27 = vld [vmem:[%s196_s29 + $0x8] sm:$0xff]  ;;  %v240_v30 = vld [vmem:[%s196_s29 + $0x10] sm:$0xff]  ;;  %s202_s7 = scalar_lea.vmem %s460_s4, %s374_s30 }
   0xf   : > { %v210_v5 = vmul.f32 0.0078125, %v209_v4  ;;  %v241_v31 = vld [vmem:[%s196_s29 + $0x18] sm:$0xff]  ;;  %v242_v32 = vld [vmem:[%s196_s29 + $0x20] sm:$0xff]  ;;  %v243_v33 = vld [vmem:[%s196_s29 + $0x28] sm:$0xff] }
  0x10   : > { %v244_v34 = vld [vmem:[%s196_s29 + $0x30] sm:$0xff]  ;;  %v245_v35 = vld [vmem:[%s196_s29 + $0x38] sm:$0xff] }
  0x11   : > { %v211_v6 = vmul.f32 %v210_v5, %v210_v5 }
  0x13   : > { %v213_v7 = vrot.slane %v211_v6, 7 }
  0x15   : > { %v215_v8 = vsub.f32 %v210_v5, %v213_v7 }
  0x17   : > { %v216_v9 = vmax.f32 %v215_v8, 0.0 }
  0x19   : > { %v218_v10 = vadd.f32 1e-05, %v216_v9 }
  0x1b   : > { %386 = vrsqrt.f32 %v218_v10  ;;  %vm225_vm1 = vweird.f32 %v218_v10 }
  0x21   : > { %v387_v11 = vpop.eup %386 }
  0x22   : > { %v220_v12 = vmul.f32 %v387_v11, %v218_v10  ;;  %vm226_vm2 = vweird.f32 %v387_v11 }
  0x23   : > { %vm227_vm3 = vmor %vm225_vm1, %vm226_vm2 }
  0x24   : > { %v221_v13 = vmul.f32 %v387_v11, %v220_v12 }
  0x26   : > { %v222_v14 = vmul.f32 0.5, %v221_v13 }
  0x28   : > { %v223_v15 = vsub.f32 1.5, %v222_v14 }
  0x2a   : > { %v224_v16 = vmul.f32 %v387_v11, %v223_v15 }
  0x2c   : > { %v228_v17 = vsel %vm227_vm3, %v387_v11, %v224_v16 }
  0x2d   : > { %230 = vst [vmem:[#allocation1] sm:$0xff] %v228_v17 }
  0x34   : > { %v232_v19 = vld [vmem:[#allocation1 + $0x1] ss:$9 sm:$0xff] }
  0x35   : > { %v234_v20 = vmul.f32 %v232_v19, %v217_v18 }
  0x37   : > { %v236_v22 = vmul.f32 %v234_v20, %v210_v5  ;;  %v246_v23 = vperm.slane %v234_v20, 0 }
  0x39   : > { %v237_v24 = vsub.f32 %v235_v21, %v236_v22  ;;  %v248_v25 = vrot.slane %v246_v23, 4 }
  0x3b   : > { %v260_v28 = vperm.slane %v237_v24, 0  ;;  %v250_v29 = vsel %vm249_vm4, %v246_v23, %v248_v25 }
  0x3c   : > { %v252_v37 = vmul.f32 %v250_v29, %v238_v26  ;;  %v253_v38 = vmul.f32 %v250_v29, %v239_v27  ;;  %v254_v39 = vmul.f32 %v250_v29, %v240_v30  ;;  %v255_v40 = vmul.f32 %v250_v29, %v241_v31 }
  0x3d   : > { %v262_v36 = vrot.slane %v260_v28, 4  ;;  %v256_v41 = vmul.f32 %v250_v29, %v242_v32  ;;  %v257_v43 = vmul.f32 %v250_v29, %v243_v33  ;;  %v258_v44 = vmul.f32 %v250_v29, %v244_v34 }
  0x3e   : > { %v259_v45 = vmul.f32 %v250_v29, %v245_v35 }
  0x3f   : > { %v263_v42 = vsel %vm249_vm4, %v260_v28, %v262_v36 }
  0x40   : > { %v265_v46 = vadd.f32 %v263_v42, %v252_v37  ;;  %v266_v47 = vadd.f32 %v263_v42, %v253_v38  ;;  %v267_v48 = vadd.f32 %v263_v42, %v254_v39  ;;  %v268_v49 = vadd.f32 %v263_v42, %v255_v40 }
  0x41   : > { %v269_v50 = vadd.f32 %v263_v42, %v256_v41  ;;  %v270_v51 = vadd.f32 %v263_v42, %v257_v43  ;;  %v271_v52 = vadd.f32 %v263_v42, %v258_v44  ;;  %v272_v53 = vadd.f32 %v263_v42, %v259_v45 }
  0x42   : > { %v273_v54 = vmax.f32 %v265_v46, 0.0  ;;  %v274_v55 = vmax.f32 %v266_v47, 0.0  ;;  %v275_v56 = vmax.f32 %v267_v48, 0.0  ;;  %v276_v57 = vmax.f32 %v268_v49, 0.0 }
  0x43   : > { %v277_v58 = vmax.f32 %v269_v50, 0.0  ;;  %v278_v59 = vmax.f32 %v270_v51, 0.0  ;;  %v279_v60 = vmax.f32 %v271_v52, 0.0  ;;  %v280_v61 = vmax.f32 %v272_v53, 0.0 }
  0x44   : > { %v281_v62 = vmax.f32 %v273_v54, %v274_v55  ;;  %v282_v63 = vmax.f32 %v275_v56, %v276_v57 }
  0x45   : > { %v283_v0 = vmax.f32 %v277_v58, %v278_v59  ;;  %v284_v1 = vmax.f32 %v279_v60, %v280_v61 }
  0x46   : > { %v289_v2 = vrot.slane %v281_v62, 4  ;;  %v290_v3 = vrot.slane %v282_v63, 4 }
  0x47   : > { %v291_v4 = vrot.slane %v283_v0, 4  ;;  %v292_v5 = vrot.slane %v284_v1, 4 }
  0x48   : > { %v297_v6 = vmax.f32 %v281_v62, %v289_v2  ;;  %v298_v7 = vmax.f32 %v282_v63, %v290_v3 }
  0x49   : > { %v299_v8 = vmax.f32 %v283_v0, %v291_v4  ;;  %v300_v9 = vmax.f32 %v284_v1, %v292_v5 }
  0x4a   : > { %v301_v10 = vpack.c.bf16 %v297_v6, %v297_v6  ;;  %v302_v11 = vpack.c.bf16 %v298_v7, %v298_v7 }
  0x4b   : > { %v303_v12 = vpack.c.bf16 %v299_v8, %v299_v8  ;;  %v304_v13 = vpack.c.bf16 %v300_v9, %v300_v9 }
  0x4c   : > { %305 = vst [vmem:[%s202_s7] sm:$0x3] %v301_v10 }
  0x4d   : > { %306 = vst [vmem:[%s202_s7 + $0x2] sm:$0x3] %v302_v11 }
  0x4e   : > { %307 = vst [vmem:[%s202_s7 + $0x4] sm:$0x3] %v303_v12 }
  0x4f   : > { %308 = vst [vmem:[%s202_s7 + $0x6] sm:$0x3] %v304_v13 }
  0x50 PF: > { %s14_s15 = sadd.s32 1, %s394_s15  }
  0x51   : > { %p11_p4 = scmp.ge.s32.totalorder %s14_s15, 4  }
  0x53   :  { %13 = sbr.rel (!%p11_p4) target bundleno = 1 (0x1), region = 67 }

// kernel: gconvnet_forward.13
= control target key start
LH: loop header
LB: loop body
LE: loop exit
PB: predicated region body
PF: predicated region fallthrough
CT: control target
= control target key end

     0   :  { %s682_s12 = smov 0   ;;  %s761_s0 = inlined_call_operand.vmem [shape: bf16[2,24,96], index: 0, kind: input, shape index: {}]   ;;  %s762_s1 = inlined_call_operand.vmem [shape: bf16[3,96,128], index: 1, kind: input, shape index: {}]   ;;  %s763_s2 = inlined_call_operand.vmem [shape: f32[2,16,128], index: 2, kind: output, shape index: {0}]   ;;  %s764_s3 = inlined_call_operand.vmem [shape: f32[2,2,128], index: 3, kind: output, shape index: {1}]  }
   0x1 LB: > { %s512_s13 = sadd.s32 4294967295, %s660_s12   ;;  %p516_p0 = scmp.ge.s32.totalorder %s660_s12, 1  ;;  %s660_s12 = sphi %s682_s12, %s14_s12  }
   0x2   : > { %p140_p1 = scmp.lt.s32.totalorder %s660_s12, 3 }
   0x4   : > { %p141_p2 = pnand %p516_p0, %p140_p1 }
   0x5   : > { %p168_p3 = scmp.lt.s32.totalorder (!%p141_p2), %s512_s13, 1 }
   0x6   : > { %144 = sbr.rel (%p141_p2) target bundleno = 195 (0xc3), region = 28 }
   0xb   : > { %v634_v0 = vld [vmem:[%s762_s1 + $0x58] sm:$0xff]  ;;  %v628_v1 = vld [vmem:[%s762_s1 + $0x28] sm:$0xff]  ;;  %v633_v3 = vld [vmem:[%s762_s1 + $0x50] sm:$0xff]  ;;  %s766_s13 = smov (!%p168_p3, %s512_s13), 1  ;;  %vm220_vm0 = vcmask 1045504   ;;  %vm260_vm1 = vcmask 785408  }
   0xc   : > { %v640_v2 = vld [vmem:[%s762_s1 + $0x88] sm:$0xff]  ;;  %266 = vmatpush.bf16.msra.mxu0 %v634_v0  ;;  %322 = vmatpush.bf16.msra.mxu1 %v628_v1  ;;  %v627_v4 = vld [vmem:[%s762_s1 + $0x20] sm:$0xff]  ;;  %s645_s26 = smul.u32 12, %s766_s13  ;;  %v626_v7 = vld [vmem:[%s762_s1 + $0x18] sm:$0xff]  ;;  %s622_s29 = sshll.u32 %s766_s13, 4 }
   0xd   : > { %392 = vmatpush.bf16.msra.mxu2 %v640_v2  ;;  %v639_v5 = vld [vmem:[%s762_s1 + $0x80] sm:$0xff]  ;;  %v632_v6 = vld [vmem:[%s762_s1 + $0x48] sm:$0xff]  ;;  %v638_v8 = vld [vmem:[%s762_s1 + $0x78] sm:$0xff]  ;;  %s177_s5 = scalar_lea.vmem %s763_s2, %s622_s29  ;;  %s520_s6 = sshll.u32 %s766_s13, 1 }
   0xe   : > { %s172_s8 = scalar_lea.vmem %s761_s0, %s645_s26  ;;  %v631_v12 = vld [vmem:[%s762_s1 + $0x40] sm:$0xff]  ;;  %v625_v13 = vld [vmem:[%s762_s1 + $0x10] sm:$0xff]  ;;  %v630_v18 = vld [vmem:[%s762_s1 + $0x38] sm:$0xff]  ;;  %s181_s9 = scalar_lea.vmem %s764_s3, %s520_s6 }
   0xf   : > { %v642_v9 = vld [vmem:[%s172_s8] sm:$0xff]   ;;  %v198_v11 = vld [vmem:[%s172_s8 + $0x8] sm:$0x3]  ;;  %v637_v17 = vld [vmem:[%s762_s1 + $0x70] sm:$0xff] }
  0x10   : > { %267 = vmatpush.bf16.msra.mxu0 %v633_v3  ;;  %323 = vmatpush.bf16.msra.mxu1 %v627_v4  ;;  %v197_v10 = vld [vmem:[%s172_s8] sm:$0xc]  ;;  %v644_v14 = vunpack.c.h.b16 %v642_v9  ;;  %v217_v16 = vunpack.c.l.b16 %v198_v11  ;;  %v624_v19 = vld [vmem:[%s762_s1 + $0x8] sm:$0xff]  ;;  %v629_v24 = vld [vmem:[%s762_s1 + $0x30] sm:$0xff] }
  0x11   : > { %393 = vmatpush.bf16.msra.mxu2 %v639_v5  ;;  %v215_v15 = vunpack.c.l.b16 %v197_v10  ;;  %v636_v22 = vld [vmem:[%s762_s1 + $0x68] sm:$0xff]  ;;  %v623_v25 = vld [vmem:[%s762_s1] sm:$0xff] }
  0x12   : > { %v219_v21 = vpack.c.b16 %v217_v16, %v217_v16  ;;  %v334_v23 = vld [vmem:[%s172_s8 + $0x8] sm:$0xf]  ;;  %v635_v29 = vld [vmem:[%s762_s1 + $0x60] sm:$0xff] }
  0x13   : > { %v218_v20 = vpack.c.b16 %v644_v14, %v215_v15  ;;  %v349_v28 = vunpack.c.l.b16 %v334_v23 }
  0x14   : > { %268 = vmatpush.bf16.msra.mxu0 %v632_v6  ;;  %324 = vmatpush.bf16.msra.mxu1 %v626_v7  ;;  %v222_v27 = vrot.slane %v219_v21, 2 }
  0x15   : > { %394 = vmatpush.bf16.msra.mxu2 %v638_v8  ;;  %v221_v26 = vrot.slane %v218_v20, 2  ;;  %v350_v31 = vpack.c.b16 %v349_v28, %v644_v14 }
  0x17   : > { %v223_v30 = vsel %vm220_vm0, %v221_v26, %v222_v27 }
  0x18   : > { %269 = vmatpush.bf16.msra.mxu0 %v631_v12  ;;  %325 = vmatpush.bf16.msra.mxu1 %v625_v13 }
  0x19   : > { %395 = vmatpush.bf16.msra.mxu2 %v637_v17 }
  0x1c   : > { %270 = vmatpush.bf16.msra.mxu0 %v630_v18  ;;  %326 = vmatpush.bf16.msra.mxu1 %v624_v19 }
  0x1d   : > { %396 = vmatpush.bf16.msra.mxu2 %v636_v22 }
  0x20   : > { %271 = vmatpush.bf16.msra.mxu0 %v629_v24  ;;  %327 = vmatpush.bf16.msra.mxu1 %v623_v25 }
  0x21   : > { %397 = vmatpush.bf16.msra.mxu2 %v635_v29 }
  0x23   : > { %557 = vmatmul.msk.bf16.vlgmr.msra.gmra.mxu0 %vm260_vm1, %v223_v30  ;;  %582 = vmatmul.msk.bf16.vlgmr.msra.gmra.mxu1 %vm260_vm1, %v642_v9 }
  0x24   : > { %619 = vmatmul.msk.bf16.vlgmr.msra.gmra.mxu2 %vm260_vm1, %v350_v31 }
  0xa0   : > { %v273_v32 = vpop.f32.mrf.mxu0  ;;  %v329_v33 = vpop.f32.mrf.mxu1 }
  0xa1   : > { %v330_v34 = vadd.f32 %v329_v33, %v273_v32 }
  0xa7   : > { %v399_v35 = vpop.f32.mrf.mxu2 }
  0xa8   : > { %v404_v36 = vadd.f32 %v399_v35, %v330_v34  ;;  %v275_v37 = vpop.f32.mrf.mxu0  ;;  %v331_v38 = vpop.f32.mrf.mxu1 }
  0xa9   : > { %v332_v39 = vadd.f32 %v331_v38, %v275_v37 }
  0xaa   : > { %406 = vst [vmem:[%s177_s5] sm:$0xff] %v404_v36  ;;  %v416_v42 = vmul.f32 %v404_v36, %v404_v36 }
  0xaf   : > { %v401_v40 = vpop.f32.mrf.mxu2 }
  0xb0   : > { %v405_v41 = vadd.f32 %v401_v40, %v332_v39 }
  0xb2   : > { %407 = vst [vmem:[%s177_s5 + $0x8] sm:$0xff] %v405_v41  ;;  %v408_v43 = vadd.f32 %v405_v41, %v404_v36  ;;  %v417_v44 = vmul.f32 %v405_v41, %v405_v41 }
  0xb4   : > { %v409_v45 = vrot.slane %v408_v43, 4  ;;  %v418_v46 = vadd.f32 %v417_v44, %v416_v42 }
  0xb6   : > { %v410_v47 = vadd.f32 %v409_v45, %v408_v43  ;;  %v419_v48 = vrot.slane %v418_v46, 4 }
  0xb8   : > { %v411_v49 = vrot.slane %v410_v47, 2  ;;  %v420_v50 = vadd.f32 %v419_v48, %v418_v46 }
  0xba   : > { %v412_v51 = vadd.f32 %v411_v49, %v410_v47  ;;  %v421_v52 = vrot.slane %v420_v50, 2 }
  0xbc   : > { %v413_v53 = vrot.slane %v412_v51, 1  ;;  %v422_v54 = vadd.f32 %v421_v52, %v420_v50 }
  0xbe   : > { %v414_v55 = vadd.f32 %v413_v53, %v412_v51  ;;  %v423_v56 = vrot.slane %v422_v54, 1 }
  0xc0   : > { %415 = vst [vmem:[%s181_s9] sm:$0x1] %v414_v55  ;;  %v424_v57 = vadd.f32 %v423_v56, %v422_v54 }
  0xc2   : > { %425 = vst [vmem:[%s181_s9 + $0x1] sm:$0x1] %v424_v57 }
  0xc3 PF: > { %s14_s12 = sadd.s32 1, %s660_s12  }
  0xc4   : > { %p11_p4 = scmp.ge.s32.totalorder %s14_s12, 4  }
  0xc6   :  { %13 = sbr.rel (!%p11_p4) target bundleno = 1 (0x1), region = 72 }

// kernel: gconvnet_forward.14
= control target key start
LH: loop header
LB: loop body
LE: loop exit
PB: predicated region body
PF: predicated region fallthrough
CT: control target
= control target key end

     0   :  { %s381_s15 = smov 0   ;;  %s418_s0 = inlined_call_operand.vmem [shape: f32[4,2,2,256], index: 0, kind: input, shape index: {}]   ;;  %s419_s1 = inlined_call_operand.vmem [shape: f32[2,2,128], index: 1, kind: input, shape index: {}]   ;;  %s420_s2 = inlined_call_operand.vmem [shape: f32[1,128], index: 2, kind: input, shape index: {}]   ;;  %s421_s3 = inlined_call_operand.vmem [shape: f32[1,128], index: 3, kind: input, shape index: {}]   ;;  %s422_s4 = inlined_call_operand.vmem [shape: bf16[4,2,128], index: 4, kind: output, shape index: {}]  }
   0x1 LB: > { %s326_s16 = sadd.s32 4294967295, %s354_s15   ;;  %p330_p0 = scmp.ge.s32.totalorder %s354_s15, 1  ;;  %s354_s15 = sphi %s381_s15, %s14_s15  }
   0x2   : > { %p164_p1 = scmp.lt.s32.totalorder %s354_s15, 3 }
   0x4   : > { %p165_p2 = pnand %p330_p0, %p164_p1 }
   0x5   : > { %s331_s21 = sshll.u32 (!%p165_p2), %s326_s16, 1 }
   0x6   : > { %168 = sbr.rel (%p165_p2) target bundleno = 78 (0x4e), region = 36  ;;  %p191_p3 = scmp.lt.s32.totalorder (!%p165_p2), %s331_s21, 3 }
   0xb   : > { %v202_v0 = vld [vmem:[%s419_s1] sm:$0x3]  ;;  %v203_v1 = vld [vmem:[%s419_s1 + $0x2] sm:$0x3]  ;;  %vm204_vm0 = vcmask 1041408   ;;  %s424_s21 = smov (!%p191_p3, %s331_s21), 3 }
   0xc   : > { %v205_v2 = vsel %vm204_vm0, %v202_v0, 0.0  ;;  %v206_v3 = vsel %vm204_vm0, %v203_v1, 0.0  ;;  %v215_v18 = vld [vmem:[%s420_s2] sm:$0x1]  ;;  %s337_s24 = sshll.u32 %s424_s21, 3  ;;  %s200_s6 = scalar_lea.vmem %s422_s4, %s424_s21 }
   0xd   : > { %v207_v4 = vadd.f32 %v206_v3, %v205_v2  ;;  %v233_v21 = vld [vmem:[%s421_s3] sm:$0x1]  ;;  %s195_s29 = scalar_lea.vmem %s418_s0, %s337_s24 }
   0xe   : > { %v236_v26 = vld [vmem:[%s195_s29] sm:$0xf]  ;;  %v237_v27 = vld [vmem:[%s195_s29 + $0x4] sm:$0xf]  ;;  %v238_v28 = vld [vmem:[%s195_s29 + $0x8] sm:$0xf] }
   0xf   : > { %v208_v5 = vmul.f32 0.03125, %v207_v4  ;;  %v239_v29 = vld [vmem:[%s195_s29 + $0xc] sm:$0xf] }
  0x11   : > { %v209_v6 = vmul.f32 %v208_v5, %v208_v5 }
  0x13   : > { %v211_v7 = vrot.slane %v209_v6, 7 }
  0x15   : > { %v213_v8 = vsub.f32 %v208_v5, %v211_v7 }
  0x17   : > { %v214_v9 = vmax.f32 %v213_v8, 0.0 }
  0x19   : > { %v216_v10 = vadd.f32 1e-05, %v214_v9 }
  0x1b   : > { %346 = vrsqrt.f32 %v216_v10  ;;  %vm223_vm1 = vweird.f32 %v216_v10 }
  0x21   : > { %v347_v11 = vpop.eup %346 }
  0x22   : > { %v218_v12 = vmul.f32 %v347_v11, %v216_v10  ;;  %vm224_vm2 = vweird.f32 %v347_v11 }
  0x23   : > { %vm225_vm3 = vmor %vm223_vm1, %vm224_vm2 }
  0x24   : > { %v219_v13 = vmul.f32 %v347_v11, %v218_v12 }
  0x26   : > { %v220_v14 = vmul.f32 0.5, %v219_v13 }
  0x28   : > { %v221_v15 = vsub.f32 1.5, %v220_v14 }
  0x2a   : > { %v222_v16 = vmul.f32 %v347_v11, %v221_v15 }
  0x2c   : > { %v226_v17 = vsel %vm225_vm3, %v347_v11, %v222_v16 }
  0x2d   : > { %228 = vst [vmem:[#allocation1] sm:$0xff] %v226_v17 }
  0x34   : > { %v230_v19 = vld [vmem:[#allocation1 + $0x1] ss:$9 sm:$0xff] }
  0x35   : > { %v232_v20 = vmul.f32 %v230_v19, %v215_v18 }
  0x37   : > { %v234_v22 = vmul.f32 %v232_v20, %v208_v5  ;;  %v240_v23 = vperm.slane %v232_v20, 0 }
  0x39   : > { %v235_v24 = vsub.f32 %v233_v21, %v234_v22  ;;  %v242_v25 = vrot.slane %v240_v23, 6 }
  0x3b   : > { %v243_v30 = vsel %vm204_vm0, %v240_v23, %v242_v25  ;;  %v249_v31 = vperm.slane %v235_v24, 0 }
  0x3c   : > { %v245_v33 = vmul.f32 %v243_v30, %v236_v26  ;;  %v246_v34 = vmul.f32 %v243_v30, %v237_v27  ;;  %v247_v35 = vmul.f32 %v243_v30, %v238_v28  ;;  %v248_v36 = vmul.f32 %v243_v30, %v239_v29 }
  0x3d   : > { %v251_v32 = vrot.slane %v249_v31, 6 }
  0x3f   : > { %v252_v37 = vsel %vm204_vm0, %v249_v31, %v251_v32 }
  0x40   : > { %v254_v38 = vadd.f32 %v252_v37, %v245_v33  ;;  %v255_v39 = vadd.f32 %v252_v37, %v246_v34  ;;  %v256_v40 = vadd.f32 %v252_v37, %v247_v35  ;;  %v257_v41 = vadd.f32 %v252_v37, %v248_v36 }
  0x42   : > { %v258_v42 = vmax.f32 %v254_v38, 0.0  ;;  %v259_v43 = vmax.f32 %v255_v39, 0.0  ;;  %v260_v44 = vmax.f32 %v256_v40, 0.0  ;;  %v261_v45 = vmax.f32 %v257_v41, 0.0 }
  0x44   : > { %v262_v46 = vmax.f32 %v258_v42, %v259_v43  ;;  %v263_v47 = vmax.f32 %v260_v44, %v261_v45 }
  0x46   : > { %v266_v48 = vrot.slane %v262_v46, 2  ;;  %v267_v49 = vrot.slane %v263_v47, 2 }
  0x48   : > { %v270_v50 = vmax.f32 %v262_v46, %v266_v48  ;;  %v271_v51 = vmax.f32 %v263_v47, %v267_v49 }
  0x4a   : > { %v272_v52 = vpack.c.bf16 %v270_v50, %v270_v50  ;;  %v273_v53 = vpack.c.bf16 %v271_v51, %v271_v51 }
  0x4c   : > { %274 = vst [vmem:[%s200_s6] sm:$0x1] %v272_v52 }
  0x4d   : > { %275 = vst [vmem:[%s200_s6 + $0x1] sm:$0x1] %v273_v53 }
  0x4e PF: > { %s14_s15 = sadd.s32 1, %s354_s15  }
  0x4f   : > { %p11_p4 = scmp.ge.s32.totalorder %s14_s15, 4  }
  0x51   :  { %13 = sbr.rel (!%p11_p4) target bundleno = 1 (0x1), region = 67 }

// kernel: gconvnet_forward.15
= control target key start
LH: loop header
LB: loop body
LE: loop exit
PB: predicated region body
PF: predicated region fallthrough
CT: control target
= control target key end

     0   :  { %s651_s12 = smov 0   ;;  %s733_s0 = inlined_call_operand.vmem [shape: bf16[2,8,96], index: 0, kind: input, shape index: {}]   ;;  %s734_s1 = inlined_call_operand.vmem [shape: bf16[3,96,128], index: 1, kind: input, shape index: {}]   ;;  %s735_s2 = inlined_call_operand.vmem [shape: f32[2,4,128], index: 2, kind: output, shape index: {0}]   ;;  %s736_s3 = inlined_call_operand.vmem [shape: f32[2,2,128], index: 3, kind: output, shape index: {1}]  }
   0x1 LB: > { %s488_s13 = sadd.s32 4294967295, %s629_s12   ;;  %p492_p0 = scmp.ge.s32.totalorder %s629_s12, 1  ;;  %s629_s12 = sphi %s651_s12, %s14_s12  }
   0x2   : > { %p139_p1 = scmp.lt.s32.totalorder %s629_s12, 3 }
   0x4   : > { %p140_p2 = pnand %p492_p0, %p139_p1 }
   0x5   : > { %p165_p3 = scmp.lt.s32.totalorder (!%p140_p2), %s488_s13, 1 }
   0x6   : > { %143 = sbr.rel (%p140_p2) target bundleno = 186 (0xba), region = 28 }
   0xb   : > { %v608_v0 = vld [vmem:[%s734_s1 + $0x58] sm:$0xff]  ;;  %v602_v1 = vld [vmem:[%s734_s1 + $0x28] sm:$0xff]  ;;  %v607_v3 = vld [vmem:[%s734_s1 + $0x50] sm:$0xff]  ;;  %s738_s13 = smov (!%p165_p3, %s488_s13), 1  ;;  %vm245_vm0 = vcmask 785408   ;;  %vm386_vm1 = vcmask 1043456  }
   0xc   : > { %v614_v2 = vld [vmem:[%s734_s1 + $0x88] sm:$0xff]  ;;  %251 = vmatpush.bf16.msra.mxu0 %v608_v0  ;;  %303 = vmatpush.bf16.msra.mxu1 %v602_v1  ;;  %v601_v4 = vld [vmem:[%s734_s1 + $0x20] sm:$0xff]  ;;  %s493_s26 = sshll.u32 %s738_s13, 2  ;;  %v600_v7 = vld [vmem:[%s734_s1 + $0x18] sm:$0xff]  ;;  %s495_s6 = sshll.u32 %s738_s13, 1 }
   0xd   : > { %373 = vmatpush.bf16.msra.mxu2 %v614_v2  ;;  %v613_v5 = vld [vmem:[%s734_s1 + $0x80] sm:$0xff]  ;;  %v606_v6 = vld [vmem:[%s734_s1 + $0x48] sm:$0xff]  ;;  %v612_v8 = vld [vmem:[%s734_s1 + $0x78] sm:$0xff]  ;;  %s168_s8 = scalar_lea.vmem %s733_s0, %s493_s26  ;;  %s172_s5 = scalar_lea.vmem %s735_s2, %s493_s26 }
   0xe   : > { %v605_v9 = vld [vmem:[%s734_s1 + $0x40] sm:$0xff]  ;;  %v599_v10 = vld [vmem:[%s734_s1 + $0x10] sm:$0xff]  ;;  %v604_v15 = vld [vmem:[%s734_s1 + $0x38] sm:$0xff] }
   0xf   : > { %v191_v11 = vld [vmem:[%s168_s8] sm:$0x6]  ;;  %v611_v12 = vld [vmem:[%s734_s1 + $0x70] sm:$0xff]  ;;  %v598_v16 = vld [vmem:[%s734_s1 + $0x8] sm:$0xff] }
  0x10   : > { %252 = vmatpush.bf16.msra.mxu0 %v607_v3  ;;  %304 = vmatpush.bf16.msra.mxu1 %v601_v4  ;;  %v314_v13 = vld [vmem:[%s168_s8] sm:$0xc]  ;;  %v206_v14 = vunpack.c.l.b16 %v191_v11  ;;  %v610_v18 = vld [vmem:[%s734_s1 + $0x68] sm:$0xff]  ;;  %v603_v20 = vld [vmem:[%s734_s1 + $0x30] sm:$0xff] }
  0x11   : > { %374 = vmatpush.bf16.msra.mxu2 %v613_v5  ;;  %v329_v17 = vunpack.c.l.b16 %v314_v13  ;;  %v597_v21 = vld [vmem:[%s734_s1] sm:$0xff] }
  0x12   : > { %v207_v19 = vpack.c.b16 %v206_v14, %v206_v14  ;;  %v609_v23 = vld [vmem:[%s734_s1 + $0x60] sm:$0xff] }
  0x13   : > { %v330_v22 = vpack.c.b16 %v329_v17, %v329_v17  ;;  %v178_v25 = vld [vmem:[%s168_s8] sm:$0x3]  ;;  %s176_s8 = scalar_lea.vmem %s736_s3, %s495_s6 }
  0x14   : > { %253 = vmatpush.bf16.msra.mxu0 %v606_v6  ;;  %305 = vmatpush.bf16.msra.mxu1 %v600_v7  ;;  %v208_v24 = vrot.slane %v207_v19, 1 }
  0x15   : > { %375 = vmatpush.bf16.msra.mxu2 %v612_v8  ;;  %v331_v26 = vrot.slane %v330_v22, 2 }
  0x18   : > { %254 = vmatpush.bf16.msra.mxu0 %v605_v9  ;;  %306 = vmatpush.bf16.msra.mxu1 %v599_v10 }
  0x19   : > { %376 = vmatpush.bf16.msra.mxu2 %v611_v12 }
  0x1c   : > { %255 = vmatpush.bf16.msra.mxu0 %v604_v15  ;;  %307 = vmatpush.bf16.msra.mxu1 %v598_v16 }
  0x1d   : > { %377 = vmatpush.bf16.msra.mxu2 %v610_v18 }
  0x20   : > { %256 = vmatpush.bf16.msra.mxu0 %v603_v20  ;;  %308 = vmatpush.bf16.msra.mxu1 %v597_v21 }
  0x21   : > { %378 = vmatpush.bf16.msra.mxu2 %v609_v23 }
  0x23   : > { %532 = vmatmul.msk.bf16.vlgmr.msra.gmra.mxu0 %vm245_vm0, %v208_v24  ;;  %557 = vmatmul.msk.bf16.vlgmr.msra.gmra.mxu1 %vm245_vm0, %v178_v25 }
  0x24   : > { %594 = vmatmul.msk.bf16.vlgmr.msra.gmra.mxu2 %vm245_vm0, %v331_v26 }
  0xa0   : > { %v258_v27 = vpop.f32.mrf.mxu0  ;;  %v310_v28 = vpop.f32.mrf.mxu1 }
  0xa1   : > { %v311_v29 = vadd.f32 %v310_v28, %v258_v27 }
  0xa7   : > { %v380_v30 = vpop.f32.mrf.mxu2 }
  0xa8   : > { %v384_v31 = vadd.f32 %v380_v30, %v311_v29  ;;  %v260_v32 = vpop.f32.mrf.mxu0  ;;  %v312_v33 = vpop.f32.mrf.mxu1 }
  0xaa   : > { %385 = vst [vmem:[%s172_s5] sm:$0xf] %v384_v31  ;;  %v387_v34 = vsel %vm386_vm1, %v384_v31, 0.0  ;;  %v395_v35 = vmul.f32 %v384_v31, %v384_v31 }
  0xab   : > { %v388_v36 = vrot.slane %v387_v34, 4 }
  0xac   : > { %v396_v37 = vsel %vm386_vm1, %v395_v35, 0.0 }
  0xad   : > { %v389_v38 = vadd.f32 %v388_v36, %v387_v34  ;;  %v397_v39 = vrot.slane %v396_v37, 4 }
  0xaf   : > { %v390_v40 = vrot.slane %v389_v38, 2  ;;  %v398_v41 = vadd.f32 %v397_v39, %v396_v37  ;;  %v382_v42 = vpop.f32.mrf.mxu2 }
  0xb1   : > { %v391_v43 = vadd.f32 %v390_v40, %v389_v38  ;;  %v399_v44 = vrot.slane %v398_v41, 2 }
  0xb3   : > { %v392_v45 = vrot.slane %v391_v43, 1  ;;  %v400_v46 = vadd.f32 %v399_v44, %v398_v41 }
  0xb5   : > { %v393_v47 = vadd.f32 %v392_v45, %v391_v43  ;;  %v401_v48 = vrot.slane %v400_v46, 1 }
  0xb7   : > { %394 = vst [vmem:[%s176_s8] sm:$0x1] %v393_v47  ;;  %v402_v49 = vadd.f32 %v401_v48, %v400_v46 }
  0xb9   : > { %403 = vst [vmem:[%s176_s8 + $0x1] sm:$0x1] %v402_v49 }
  0xba PF: > { %s14_s12 = sadd.s32 1, %s629_s12  }
  0xbb   : > { %p11_p4 = scmp.ge.s32.totalorder %s14_s12, 4  }
  0xbd   :  { %13 = sbr.rel (!%p11_p4) target bundleno = 1 (0x1), region = 72 }

// kernel: gconvnet_forward.16
= control target key start
LH: loop header
LB: loop body
LE: loop exit
PB: predicated region body
PF: predicated region fallthrough
CT: control target
= control target key end

     0   :  { %s346_s15 = smov 0   ;;  %s379_s0 = inlined_call_operand.vmem [shape: f32[2,2,1,256], index: 0, kind: input, shape index: {}]   ;;  %s380_s1 = inlined_call_operand.vmem [shape: f32[2,2,128], index: 1, kind: input, shape index: {}]   ;;  %s381_s2 = inlined_call_operand.vmem [shape: f32[1,128], index: 2, kind: input, shape index: {}]   ;;  %s382_s3 = inlined_call_operand.vmem [shape: f32[1,128], index: 3, kind: input, shape index: {}]   ;;  %s383_s4 = inlined_call_operand.vmem [shape: f32[2,1,128], index: 4, kind: output, shape index: {}]  }
   0x1 LB: > { %s295_s16 = sadd.s32 4294967295, %s319_s15   ;;  %p299_p0 = scmp.ge.s32.totalorder %s319_s15, 1  ;;  %s319_s15 = sphi %s346_s15, %s14_s15  }
   0x2   : > { %p161_p1 = scmp.lt.s32.totalorder %s319_s15, 3 }
   0x4   : > { %p162_p2 = pnand %p299_p0, %p161_p1 }
   0x5   : > { %p184_p3 = scmp.lt.s32.totalorder (!%p162_p2), %s295_s16, 1 }
   0x6   : > { %165 = sbr.rel (%p162_p2) target bundleno = 73 (0x49), region = 36 }
   0xb   : > { %v191_v0 = vld [vmem:[%s380_s1] sm:$0x3]  ;;  %v192_v1 = vld [vmem:[%s380_s1 + $0x2] sm:$0x3]  ;;  %vm193_vm0 = vcmask 1041408   ;;  %s385_s16 = smov (!%p184_p3, %s295_s16), 1 }
   0xc   : > { %v194_v2 = vsel %vm193_vm0, %v191_v0, 0.0  ;;  %v195_v3 = vsel %vm193_vm0, %v192_v1, 0.0  ;;  %v204_v18 = vld [vmem:[%s381_s2] sm:$0x1]  ;;  %s300_s23 = sshll.u32 %s385_s16, 2  ;;  %vm229_vm4 = vcmask 1040384   ;;  %s190_s5 = scalar_lea.vmem %s383_s4, %s385_s16 }
   0xd   : > { %v196_v4 = vadd.f32 %v195_v3, %v194_v2  ;;  %s187_s26 = scalar_lea.vmem %s379_s0, %s300_s23  ;;  %v222_v21 = vld [vmem:[%s382_s3] sm:$0x1] }
   0xe   : > { %v225_v25 = vld [vmem:[%s187_s26] sm:$0x3]  ;;  %v226_v26 = vld [vmem:[%s187_s26 + $0x2] sm:$0x3] }
   0xf   : > { %v197_v5 = vmul.f32 0.125, %v196_v4 }
  0x11   : > { %v198_v6 = vmul.f32 %v197_v5, %v197_v5 }
  0x13   : > { %v200_v7 = vrot.slane %v198_v6, 7 }
  0x15   : > { %v202_v8 = vsub.f32 %v197_v5, %v200_v7 }
  0x17   : > { %v203_v9 = vmax.f32 %v202_v8, 0.0 }
  0x19   : > { %v205_v10 = vadd.f32 1e-05, %v203_v9 }
  0x1b   : > { %311 = vrsqrt.f32 %v205_v10  ;;  %vm212_vm1 = vweird.f32 %v205_v10 }
  0x21   : > { %v312_v11 = vpop.eup %311 }
  0x22   : > { %v207_v12 = vmul.f32 %v312_v11, %v205_v10  ;;  %vm213_vm2 = vweird.f32 %v312_v11 }
  0x23   : > { %vm214_vm3 = vmor %vm212_vm1, %vm213_vm2 }
  0x24   : > { %v208_v13 = vmul.f32 %v312_v11, %v207_v12 }
  0x26   : > { %v209_v14 = vmul.f32 0.5, %v208_v13 }
  0x28   : > { %v210_v15 = vsub.f32 1.5, %v209_v14 }
  0x2a   : > { %v211_v16 = vmul.f32 %v312_v11, %v210_v15 }
  0x2c   : > { %v215_v17 = vsel %vm214_vm3, %v312_v11, %v211_v16 }
  0x2d   : > { %217 = vst [vmem:[#allocation1] sm:$0xff] %v215_v17 }
  0x34   : > { %v219_v19 = vld [vmem:[#allocation1 + $0x1] ss:$9 sm:$0xff] }
  0x35   : > { %v221_v20 = vmul.f32 %v219_v19, %v204_v18 }
  0x37   : > { %v223_v22 = vmul.f32 %v221_v20, %v197_v5  ;;  %v228_v23 = vrot.slane %v221_v20, 7 }
  0x39   : > { %v224_v24 = vsub.f32 %v222_v21, %v223_v22  ;;  %v230_v27 = vsel %vm229_vm4, %v221_v20, %v228_v23 }
  0x3a   : > { %v232_v29 = vmul.f32 %v230_v27, %v225_v25  ;;  %v233_v30 = vmul.f32 %v230_v27, %v226_v26 }
  0x3b   : > { %v235_v28 = vrot.slane %v224_v24, 7 }
  0x3d   : > { %v236_v31 = vsel %vm229_vm4, %v224_v24, %v235_v28 }
  0x3e   : > { %v238_v32 = vadd.f32 %v236_v31, %v232_v29  ;;  %v239_v33 = vadd.f32 %v236_v31, %v233_v30 }
  0x40   : > { %v240_v34 = vmax.f32 %v238_v32, 0.0  ;;  %v241_v35 = vmax.f32 %v239_v33, 0.0 }
  0x42   : > { %v242_v36 = vmax.f32 %v240_v34, %v241_v35 }
  0x44   : > { %v244_v37 = vrot.slane %v242_v36, 1 }
  0x46   : > { %v246_v38 = vmax.f32 %v242_v36, %v244_v37 }
  0x48   : > { %247 = vst [vmem:[%s190_s5] sm:$0x1] %v246_v38 }
  0x49 PF: > { %s14_s15 = sadd.s32 1, %s319_s15  }
  0x4a   : > { %p11_p4 = scmp.ge.s32.totalorder %s14_s15, 4  }
  0x4c   :  { %13 = sbr.rel (!%p11_p4) target bundleno = 1 (0x1), region = 67 }

// kernel: gconvnet_forward.17
= control target key start
LH: loop header
LB: loop body
LE: loop exit
PB: predicated region body
PF: predicated region fallthrough
CT: control target
= control target key end

     0   :  { %s180_s0 = inlined_call_operand.vmem [shape: f32[2,32], index: 0, kind: input, shape index: {}]   ;;  %s181_s1 = inlined_call_operand.vmem [shape: f32[32,256], index: 1, kind: input, shape index: {}]   ;;  %s182_s2 = inlined_call_operand.vmem [shape: f32[1,256], index: 2, kind: input, shape index: {}]   ;;  %s183_s3 = inlined_call_operand.hbm [shape: f32[2,256], index: 3, kind: output, shape index: {}]  }
   0x1   :  { %v23_v0 = vld [vmem:[%s181_s1 + $0x38] sm:$0xff]  ;;  %v22_v1 = vld [vmem:[%s181_s1 + $0x30] sm:$0xff]  ;;  %v21_v2 = vld [vmem:[%s181_s1 + $0x28] sm:$0xff] }
   0x2   :  { %66 = vmatpush.msra.mxu1 %v23_v0  ;;  %46 = vmatpush.msra.mxu0 %v22_v1  ;;  %v20_v3 = vld [vmem:[%s181_s1 + $0x20] sm:$0xff]  ;;  %v19_v4 = vld [vmem:[%s181_s1 + $0x18] sm:$0xff]  ;;  %v18_v5 = vld [vmem:[%s181_s1 + $0x10] sm:$0xff] }
   0x4   :  { %67 = vmatpush.msra.mxu1 %v21_v2  ;;  %47 = vmatpush.msra.mxu0 %v20_v3 }
   0x5   :  { %8 = vsyncpa [#allocation3], 0  ;;  %v17_v6 = vld [vmem:[%s181_s1 + $0x8] sm:$0xff]  ;;  %v16_v7 = vld [vmem:[%s181_s1] sm:$0xff]  ;;  %vm30_vm0 = vcmask 261120   ;;  %s126_s1 = smov [#allocation2]  }
   0x6   :  { %68 = vmatpush.msra.mxu1 %v19_v4  ;;  %48 = vmatpush.msra.mxu0 %v18_v5  ;;  %v15_v8 = vld [vmem:[%s180_s0] sm:$0x3]  ;;  %s86_s5 = sshll.u32 %s126_s1, 4  ;;  %s88_s0 = sshll.u32 %s183_s3, 4  ;;  %vm77_vm1 = vcmask 1041408   ;;  %s87_s5 = int_to_ptr.vmem [resolvable:$true] %s86_s5  ;;  %s89_s0 = int_to_ptr.hbm [resolvable:$true] %s88_s0 }
   0x7   :  { %v24_v9 = vld [vmem:[%s182_s2] sm:$0x3] }
   0x8   :  { %69 = vmatpush.msra.mxu1 %v17_v6  ;;  %49 = vmatpush.msra.mxu0 %v16_v7  ;;  %v27_v10 = vperm.slane %v24_v9, 1  ;;  %v26_v11 = vperm.slane %v24_v9, 0 }
   0x9   :  { %98 = vmatmul.msk.f32.vlgmr.msra.gmra.mxu1 %vm30_vm0, %v15_v8  ;;  %97 = vmatmul.msk.f32.vlgmr.msra.gmra.mxu0 %vm30_vm0, %v15_v8 }
  0x86   :  { %v71_v12 = vpop.f32.mrf.mxu1  ;;  %v51_v13 = vpop.f32.mrf.mxu0 }
  0x87   :  { %v72_v14 = vadd.f32 %v71_v12, %v27_v10  ;;  %v52_v15 = vadd.f32 %v51_v13, %v26_v11 }
  0x89   :  { %v76_v16 = vrot.slane %v72_v14, 6 }
  0x8b   :  { %v78_v17 = vsel %vm77_vm1, %v52_v15, %v76_v16 }
  0x8c   :  { %80 = vst [vmem:[#allocation2] sm:$0xf] %v78_v17 }
  0x8d   :  { %91 = dma.vmem_to_hbm [thread:$0]  %s87_s5, 64, %s89_s0, [#allocation3]  }
  0x8e   :  { %124 = dma.done.wait [#allocation3], 64  }
  0x8f   :  { %125 = vsyncadd [#allocation3], 4294967232 }
  0x90   :  { %96 = vsyncpa [#allocation3], 1 }

</bundles_post_ra>
